<compile_context>
chip_gen: v6e
topology: v6e:2x2x1
jax: 0.10.0
libtpu: 0.0.40
codegen_flags: <defaults>
</compile_context>

<pallas_src>
import numpy as np
import jax
import jax.numpy as jnp
from jax.experimental import pallas as pl
from jax.experimental.pallas import tpu as pltpu

# ----------------------------- configuration ------------------------------ #
B = 2              # batch
L = 32             # raw sequence length
PATCH = 4          # patch_size
CHANNELS = 48      # input channels
DIM = 128          # model dim
DEPTH = 3
HEADS = 4
DIM_HEAD = 64
MLP_DIM = 64
NUM_CLASSES = 2
RATIO = 8          # OpAttention squeeze ratio

N = L // PATCH                     # num patches (8)
BN = B * N                         # fused batch*seq rows (16)
PATCH_DIM = CHANNELS * PATCH       # per-patch feature dim (192)
INNER = HEADS * DIM_HEAD           # qkv inner dim (256)
HPAD = 128                         # per-head lane-aligned width
RDIM = DIM // RATIO                # squeeze dim (16)
GN = HEADS * BN                    # stacked attention rows (64)
LN_EPS = 1e-5
APPROX_RECIP = True                # exact division for tight validation

assert N & (N - 1) == 0
N_SHIFT = N.bit_length() - 1       # log2(N)

# vecs (small-parameter) row layout
VEC_PER_LAYER = 6                                    # g_attn,b_attn,g_ff,b_ff,b1,b2
ROW_G_HEAD = DEPTH * VEC_PER_LAYER                   # 18
ROW_B_HEAD = ROW_G_HEAD + 1                          # 19
ROW_W_HEAD = ROW_B_HEAD + 1                          # 20 .. 20+C-1
ROW_BIAS_HEAD = ROW_W_HEAD + NUM_CLASSES             # 22
VEC_ROWS = ((ROW_BIAS_HEAD + 1 + 7) // 8) * 8        # 24


# ------------------------------ small helpers ----------------------------- #
def _layernorm(x, g, b):
    """PyTorch nn.LayerNorm over last dim (biased variance, eps=1e-5)."""
    mu = jnp.mean(x, axis=-1, keepdims=True)
    var = jnp.mean(jnp.square(x - mu), axis=-1, keepdims=True)
    return (x - mu) * jax.lax.rsqrt(var + LN_EPS) * g + b


def _gelu_tanh(x):
    # tanh-approximate GELU; tanh goes to the (otherwise idle) EUP slot.
    c = 0.7978845608028654
    return 0.5 * x * (1.0 + jnp.tanh(c * (x + 0.044715 * x * x * x)))


def _matmul_t(a, b):
    """a @ b.T without materialising the transpose (contract last dims)."""
    return jax.lax.dot_general(a, b, (((1,), (1,)), ((), ())),
                               preferred_element_type=jnp.float32)


def posemb_sincos_1d(n, dim, temperature=10000.0):
    x = jnp.arange(n, dtype=jnp.float32)
    omega = jnp.arange(dim // 2, dtype=jnp.float32) / (dim // 2 - 1)
    omega = 1.0 / (temperature ** omega)
    x = x[:, None] * omega[None, :]
    return jnp.concatenate([jnp.sin(x), jnp.cos(x)], axis=1)          # (n, dim)


# ------------------------------ fused kernel ------------------------------- #
def fused_vit_kernel(xp_ref, bpe_ref, w_embed_ref, w_qkv_ref, w_out_ref,
                     w_ff_ref, w_op_ref, vecs_ref, o_ref):
    f32 = jnp.float32
    bf16 = jnp.bfloat16

    def vrow(i):                       # (1, DIM) row of the packed small params
        return vecs_ref[i:i + 1, :]

    # ---- patch embedding + (bias + sincos positional embedding) ----
    x = jnp.dot(xp_ref[...].astype(bf16), w_embed_ref[...],
                preferred_element_type=f32) + bpe_ref[...]            # (BN, DIM)

    # Block-diagonal mask over (head, batch) groups of N rows; built once,
    # reused for every layer.  mask[i, j] = 0 iff i//N == j//N.
    ri = jax.lax.broadcasted_iota(jnp.int32, (GN, GN), 0)
    ci = jax.lax.broadcasted_iota(jnp.int32, (GN, GN), 1)
    same = (ri >> N_SHIFT) == (ci >> N_SHIFT)
    mask = jnp.where(same, f32(0.0), f32(-1e30))                      # (GN, GN)

    scale = DIM_HEAD ** -0.5

    for d in range(DEPTH):                       # static unrolled depth loop
        vb = d * VEC_PER_LAYER
        w_op_d = w_op_ref[d]                     # (2*RDIM, DIM)   f32
        w_qkv_d = w_qkv_ref[d]                   # (DIM, 3*H*HPAD) bf16
        w_out_d = w_out_ref[d]                   # (H*HPAD, DIM)   bf16
        w_ff_d = w_ff_ref[d]                     # (2*MLP_DIM,DIM) bf16

        # ---- OpAttention: squeeze-excite channel gate from sequence mean ---
        y = jnp.concatenate(
            [jnp.mean(x[b * N:(b + 1) * N, :], axis=0, keepdims=True)
             for b in range(B)], axis=0)                              # (B, DIM)
        h = jnp.maximum(_matmul_t(y, w_op_d[0:RDIM, :]), 0.0)          # (B, RDIM)
        s = jax.nn.sigmoid(jnp.dot(h, w_op_d[RDIM:2 * RDIM, :],
                                   preferred_element_type=f32))        # (B, DIM)
        x = jnp.concatenate(
            [x[b * N:(b + 1) * N, :] * s[b:b + 1, :] for b in range(B)], axis=0)

        # ---- Multi-head self attention (pre-LN, residual) ----
        xn = _layernorm(x, vrow(vb + 0), vrow(vb + 1))
        qkv = jnp.dot(xn.astype(bf16), w_qkv_d,
                      preferred_element_type=f32)                      # (BN, 3*H*HPAD)
        # lane-aligned per-head slices stacked along sublanes -> (GN, HPAD)
        q = jnp.concatenate([qkv[:, (0 * HEADS + hh) * HPAD:(0 * HEADS + hh + 1) * HPAD]
                             for hh in range(HEADS)], axis=0)
        k = jnp.concatenate([qkv[:, (1 * HEADS + hh) * HPAD:(1 * HEADS + hh + 1) * HPAD]
                             for hh in range(HEADS)], axis=0)
        v = jnp.concatenate([qkv[:, (2 * HEADS + hh) * HPAD:(2 * HEADS + hh + 1) * HPAD]
                             for hh in range(HEADS)], axis=0)
        # one masked score matrix + ONE softmax pass for all heads & batches
        scores = _matmul_t(q, k) * scale + mask                        # (GN, GN)
        scores = scores - jnp.max(scores, axis=-1, keepdims=True)
        e = jnp.exp(scores)
        denom = jnp.sum(e, axis=-1, keepdims=True)
        if APPROX_RECIP:
            attn = e * pl.reciprocal(denom, approx=True)
        else:
            attn = e / denom
        ctx = jnp.dot(attn, v, preferred_element_type=f32)             # (GN, HPAD)

        acc = x                                                        # residual init
        for hh in range(HEADS):
            acc = acc + jnp.dot(ctx[hh * BN:(hh + 1) * BN, :].astype(bf16),
                                w_out_d[hh * HPAD:(hh + 1) * HPAD, :],
                                preferred_element_type=f32)
        x = acc

        # ---- FeedForward (pre-LN, residual) ----
        xn = _layernorm(x, vrow(vb + 2), vrow(vb + 3))
        hdn = _matmul_t(xn.astype(bf16), w_ff_d[0:MLP_DIM, :]) \
            + vrow(vb + 4)[:, :MLP_DIM]
        hdn = _gelu_tanh(hdn)
        x = jnp.dot(hdn.astype(bf16), w_ff_d[MLP_DIM:2 * MLP_DIM, :],
                    preferred_element_type=f32) + vrow(vb + 5) + x

    # ---- head: per-batch mean over sequence + LayerNorm + Linear ----
    m = jnp.concatenate(
        [jnp.mean(x[b * N:(b + 1) * N, :], axis=0, keepdims=True)
         for b in range(B)], axis=0)                                   # (B, DIM)
    mn = _layernorm(m, vrow(ROW_G_HEAD), vrow(ROW_B_HEAD))
    w_head_t = vecs_ref[ROW_W_HEAD:ROW_W_HEAD + NUM_CLASSES, :]        # (C, DIM)
    bias = vrow(ROW_BIAS_HEAD)[:, :NUM_CLASSES]                        # (1, C)
    o_ref[...] = _matmul_t(mn, w_head_t) + bias


# ------------------------------ pallas wrapper ------------------------------ #
def _full_spec(shape):
    nd = len(shape)
    return pl.BlockSpec(shape, lambda i, nd=nd: (0,) * nd)


def _pack_params(params):
    """Pack / pad / transpose / bf16-cast the weights for the fused kernel."""
    pe = posemb_sincos_1d(N, DIM)
    bpe = jnp.tile(params["b_embed"] + pe, (B, 1)).astype(jnp.float32)   # (BN, DIM)

    qkv_l, out_l, ff_l, op_l, vec_rows = [], [], [], [], []
    for lp in params["layers"]:
        # head-padded qkv: (DIM, 3*H*HPAD), zero columns 64..127 of each head
        wq = lp["w_qkv"].reshape(DIM, 3 * HEADS, DIM_HEAD)
        wq = jnp.pad(wq, ((0, 0), (0, 0), (0, HPAD - DIM_HEAD)))
        qkv_l.append(wq.reshape(DIM, 3 * HEADS * HPAD))
        # head-padded out projection: (H*HPAD, DIM), zero rows 64..127 / head
        wo = lp["w_out"].reshape(HEADS, DIM_HEAD, DIM)
        wo = jnp.pad(wo, ((0, 0), (0, HPAD - DIM_HEAD), (0, 0)))
        out_l.append(wo.reshape(HEADS * HPAD, DIM))
        # FF weights: rows 0:64 = w1^T, rows 64:128 = w2
        ff_l.append(jnp.concatenate([lp["w1"].T, lp["w2"]], axis=0))
        # squeeze-excite: rows 0:16 = w_op1^T, rows 16:32 = w_op2
        op_l.append(jnp.concatenate([lp["w_op1"].T, lp["w_op2"]], axis=0))
        b1p = jnp.pad(lp["b1"], ((0, 0), (0, DIM - MLP_DIM)))
        vec_rows += [lp["g_attn"], lp["b_attn"], lp["g_ff"], lp["b_ff"],
                     b1p, lp["b2"]]
    vec_rows += [params["g_head"], params["b_head"], params["w_head"].T,
                 jnp.pad(params["bias_head"], ((0, 0), (0, DIM - NUM_CLASSES)))]
    vecs = jnp.concatenate(vec_rows, axis=0)
    vecs = jnp.pad(vecs, ((0, VEC_ROWS - vecs.shape[0]), (0, 0)))

    return dict(
        bpe=bpe,
        w_embed=params["w_embed"].astype(jnp.bfloat16),
        w_qkv=jnp.stack(qkv_l).astype(jnp.bfloat16),
        w_out=jnp.stack(out_l).astype(jnp.bfloat16),
        w_ff=jnp.stack(ff_l).astype(jnp.bfloat16),
        w_op=jnp.stack(op_l).astype(jnp.float32),
        vecs=vecs.astype(jnp.float32),
    )


def forward(img, params):
    # rearrange 'b (l p) c -> (b l) (p c)'  — batch fused into the row axis.
    xp = img.reshape(BN, PATCH_DIM)
    pk = _pack_params(params)

    out = pl.pallas_call(
        fused_vit_kernel,
        out_shape=jax.ShapeDtypeStruct((B, NUM_CLASSES), jnp.float32),
        grid=(1,),                                       # single fused step
        in_specs=[
            _full_spec((BN, PATCH_DIM)),                 # xp
            _full_spec((BN, DIM)),                       # bpe (bias + pos, tiled)
            _full_spec((PATCH_DIM, DIM)),                # w_embed       bf16
            _full_spec((DEPTH, DIM, 3 * HEADS * HPAD)),  # w_qkv (padded) bf16
            _full_spec((DEPTH, HEADS * HPAD, DIM)),      # w_out (padded) bf16
            _full_spec((DEPTH, 2 * MLP_DIM, DIM)),       # w1^T | w2      bf16
            _full_spec((DEPTH, 2 * RDIM, DIM)),          # w_op1^T | w_op2 f32
            _full_spec((VEC_ROWS, DIM)),                 # LN/bias/head vectors
        ],
        out_specs=_full_spec((B, NUM_CLASSES)),
        compiler_params=pltpu.CompilerParams(
            dimension_semantics=("arbitrary",)),
    )(xp, pk["bpe"], pk["w_embed"], pk["w_qkv"], pk["w_out"],
      pk["w_ff"], pk["w_op"], pk["vecs"])
    return out


simple_vit_forward = jax.jit(forward)


# ------------------------- deterministic parameters ------------------------ #
def init_params(key):
    keys = iter(jax.random.split(key, 4 + DEPTH * 8))

    def dense(fan_in, fan_out):
        return jax.random.normal(next(keys), (fan_in, fan_out),
                                 jnp.float32) * (1.0 / np.sqrt(fan_in))

    def bias(n):
        return jax.random.normal(next(keys), (1, n), jnp.float32) * 0.02

    params = {
        "w_embed": dense(PATCH_DIM, DIM),
        "b_embed": bias(DIM),
        "g_head": jnp.ones((1, DIM), jnp.float32),
        "b_head": jnp.zeros((1, DIM), jnp.float32),
        "w_head": dense(DIM, NUM_CLASSES),
        "bias_head": bias(NUM_CLASSES),
        "layers": [],
    }
    for _ in range(DEPTH):
        params["layers"].append({
            "w_op1": dense(DIM, DIM // RATIO),
            "w_op2": dense(DIM // RATIO, DIM),
            "g_attn": jnp.ones((1, DIM), jnp.float32),
            "b_attn": jnp.zeros((1, DIM), jnp.float32),
            "w_qkv": dense(DIM, 3 * INNER),
            "w_out": dense(INNER, DIM),
            "g_ff": jnp.ones((1, DIM), jnp.float32),
            "b_ff": jnp.zeros((1, DIM), jnp.float32),
            "w1": dense(DIM, MLP_DIM),
            "b1": bias(MLP_DIM),
            "w2": dense(MLP_DIM, DIM),
            "b2": bias(DIM),
        })
    return params


# ------------------------------ pure-JAX reference ------------------------- #
def ref_forward(img, params):
    xp = img.reshape(B, N, PATCH_DIM)
    x = xp @ params["w_embed"] + params["b_embed"] + posemb_sincos_1d(N, DIM)
    for lp in params["layers"]:
        # OpAttention
        y = jnp.mean(x, axis=1)                               # (B, DIM)
        y = jnp.maximum(y @ lp["w_op1"], 0.0)
        y = jax.nn.sigmoid(y @ lp["w_op2"])
        x = x * y[:, None, :]
        # Attention
        xn = _layernorm(x, lp["g_attn"], lp["b_attn"])
        qkv = xn @ lp["w_qkv"]
        q, k, v = jnp.split(qkv, 3, axis=-1)
        to_heads = lambda t: t.reshape(B, N, HEADS, DIM_HEAD).transpose(0, 2, 1, 3)
        q, k, v = to_heads(q), to_heads(k), to_heads(v)
        dots = jnp.einsum("bhnd,bhmd->bhnm", q, k) * (DIM_HEAD ** -0.5)
        attn = jax.nn.softmax(dots, axis=-1)
        o = jnp.einsum("bhnm,bhmd->bhnd", attn, v).transpose(0, 2, 1, 3).reshape(B, N, INNER)
        x = o @ lp["w_out"] + x
        # FeedForward
        xn = _layernorm(x, lp["g_ff"], lp["b_ff"])
        h = jax.nn.gelu(xn @ lp["w1"] + lp["b1"], approximate=False)
        x = h @ lp["w2"] + lp["b2"] + x
    m = jnp.mean(x, axis=1)
    mn = _layernorm(m, params["g_head"], params["b_head"])
    return mn @ params["w_head"] + params["bias_head"]


# ----------------------------------- main ---------------------------------- #
if __name__ == "__main__":
    key = jax.random.PRNGKey(0)
    pkey, xkey = jax.random.split(key)
    params = init_params(pkey)
    img = jax.random.normal(xkey, (B, L, CHANNELS), dtype=jnp.float32)

    out = simple_vit_forward(img, params)
    out = jax.block_until_ready(out)

    assert out.shape == (B, NUM_CLASSES)
    assert bool(jnp.all(jnp.isfinite(out)))

    ref = ref_forward(img, params)
    np.testing.assert_allclose(np.asarray(out), np.asarray(ref),
                               rtol=2e-2, atol=2e-2)
    print("KERNEL_OK")
</pallas_src>

<mosaic_0001>
module attributes {stable_mosaic.version = 11 : i64} {
  func.func @fused_vit_kernel(%arg0: i32, %arg1: memref<16x192xf32, #tpu.memory_space<vmem>>, %arg2: memref<16x128xf32, #tpu.memory_space<vmem>>, %arg3: memref<192x128xbf16, #tpu.memory_space<vmem>>, %arg4: memref<3x128x1536xbf16, #tpu.memory_space<vmem>>, %arg5: memref<3x512x128xbf16, #tpu.memory_space<vmem>>, %arg6: memref<3x128x128xbf16, #tpu.memory_space<vmem>>, %arg7: memref<3x32x128xf32, #tpu.memory_space<vmem>>, %arg8: memref<24x128xf32, #tpu.memory_space<vmem>>, %arg9: memref<2x2xf32, #tpu.memory_space<vmem>>) attributes {dimension_semantics = [#tpu.dimension_semantics<arbitrary>], iteration_bounds = array<i64: 1>, scalar_prefetch = 0 : i64, scratch_operands = 0 : i64, tpu.core_type = #tpu.core_type<tc>, window_params = [{pipeline_mode = #tpu.pipeline_mode<synchronous>, transform_indices = @transform_0, window_bounds = array<i64: 16, 192>}, {pipeline_mode = #tpu.pipeline_mode<synchronous>, transform_indices = @transform_1, window_bounds = array<i64: 16, 128>}, {pipeline_mode = #tpu.pipeline_mode<synchronous>, transform_indices = @transform_2, window_bounds = array<i64: 192, 128>}, {pipeline_mode = #tpu.pipeline_mode<synchronous>, transform_indices = @transform_3, window_bounds = array<i64: 3, 128, 1536>}, {pipeline_mode = #tpu.pipeline_mode<synchronous>, transform_indices = @transform_4, window_bounds = array<i64: 3, 512, 128>}, {pipeline_mode = #tpu.pipeline_mode<synchronous>, transform_indices = @transform_5, window_bounds = array<i64: 3, 128, 128>}, {pipeline_mode = #tpu.pipeline_mode<synchronous>, transform_indices = @transform_6, window_bounds = array<i64: 3, 32, 128>}, {pipeline_mode = #tpu.pipeline_mode<synchronous>, transform_indices = @transform_7, window_bounds = array<i64: 24, 128>}, {pipeline_mode = #tpu.pipeline_mode<synchronous>, transform_indices = @transform_8, window_bounds = array<i64: 2, 2>}]} {
    %c0 = arith.constant 0 : index
    %c0_0 = arith.constant 0 : index
    %0 = vector.load %arg1[%c0, %c0_0] : memref<16x192xf32, #tpu.memory_space<vmem>>, vector<16x192xf32>
    %1 = arith.truncf %0 : vector<16x192xf32> to vector<16x192xbf16>
    %c0_1 = arith.constant 0 : index
    %c0_2 = arith.constant 0 : index
    %2 = vector.load %arg3[%c0_1, %c0_2] : memref<192x128xbf16, #tpu.memory_space<vmem>>, vector<192x128xbf16>
    %cst = arith.constant dense<0.000000e+00> : vector<16x128xf32>
    %3 = tpu.matmul %1, %2, %cst {dimension_numbers = #tpu.dot_dimension_numbers<[1], [0], [0], [1], [0, 0, 1, 1], [], []>} : vector<16x192xbf16>, vector<192x128xbf16>, vector<16x128xf32> -> vector<16x128xf32>
    %c0_3 = arith.constant 0 : index
    %c0_4 = arith.constant 0 : index
    %4 = vector.load %arg2[%c0_3, %c0_4] : memref<16x128xf32, #tpu.memory_space<vmem>>, vector<16x128xf32>
    %5 = arith.addf %3, %4 : vector<16x128xf32>
    %6 = tpu.iota {dimensions = array<i32: 0>} : vector<64x64xi32>
    %7 = tpu.iota {dimensions = array<i32: 1>} : vector<64x64xi32>
    %c3_i32 = arith.constant 3 : i32
    %8 = vector.broadcast %c3_i32 : i32 to vector<64x64xi32>
    %9 = arith.shrsi %6, %8 : vector<64x64xi32>
    %c3_i32_5 = arith.constant 3 : i32
    %10 = vector.broadcast %c3_i32_5 : i32 to vector<64x64xi32>
    %11 = arith.shrsi %7, %10 : vector<64x64xi32>
    %12 = arith.cmpi eq, %9, %11 : vector<64x64xi32>
    %cst_6 = arith.constant 0.000000e+00 : f32
    %cst_7 = arith.constant -1.000000e+30 : f32
    %13 = vector.broadcast %cst_6 : f32 to vector<64x64xf32>
    %14 = vector.broadcast %cst_7 : f32 to vector<64x64xf32>
    %15 = arith.select %12, %13, %14 : vector<64x64xi1>, vector<64x64xf32>
    %c0_8 = arith.constant 0 : index
    %c0_9 = arith.constant 0 : index
    %c0_10 = arith.constant 0 : index
    %16 = vector.load %arg7[%c0_8, %c0_9, %c0_10] : memref<3x32x128xf32, #tpu.memory_space<vmem>>, vector<1x32x128xf32>
    %17 = vector.shape_cast %16 : vector<1x32x128xf32> to vector<32x128xf32>
    %c0_11 = arith.constant 0 : index
    %c0_12 = arith.constant 0 : index
    %c0_13 = arith.constant 0 : index
    %18 = vector.load %arg4[%c0_11, %c0_12, %c0_13] : memref<3x128x1536xbf16, #tpu.memory_space<vmem>>, vector<1x128x1536xbf16>
    %19 = vector.shape_cast %18 : vector<1x128x1536xbf16> to vector<128x1536xbf16>
    %c0_14 = arith.constant 0 : index
    %c0_15 = arith.constant 0 : index
    %c0_16 = arith.constant 0 : index
    %20 = vector.load %arg5[%c0_14, %c0_15, %c0_16] : memref<3x512x128xbf16, #tpu.memory_space<vmem>>, vector<1x512x128xbf16>
    %21 = vector.shape_cast %20 : vector<1x512x128xbf16> to vector<512x128xbf16>
    %c0_17 = arith.constant 0 : index
    %c0_18 = arith.constant 0 : index
    %c0_19 = arith.constant 0 : index
    %22 = vector.load %arg6[%c0_17, %c0_18, %c0_19] : memref<3x128x128xbf16, #tpu.memory_space<vmem>>, vector<1x128x128xbf16>
    %23 = vector.shape_cast %22 : vector<1x128x128xbf16> to vector<128x128xbf16>
    %24 = vector.extract_strided_slice %5 {offsets = [0, 0], sizes = [8, 128], strides = [1, 1]} : vector<16x128xf32> to vector<8x128xf32>
    %cst_20 = arith.constant dense<0.000000e+00> : vector<128xf32>
    %25 = vector.multi_reduction <add>, %24, %cst_20 [0] : vector<8x128xf32> to vector<128xf32>
    %26 = vector.shape_cast %25 : vector<128xf32> to vector<1x128xf32>
    %cst_21 = arith.constant 8.000000e+00 : f32
    %27 = vector.broadcast %cst_21 : f32 to vector<1x128xf32>
    %28 = arith.divf %26, %27 : vector<1x128xf32>
    %29 = vector.extract_strided_slice %5 {offsets = [8, 0], sizes = [8, 128], strides = [1, 1]} : vector<16x128xf32> to vector<8x128xf32>
    %cst_22 = arith.constant dense<0.000000e+00> : vector<128xf32>
    %30 = vector.multi_reduction <add>, %29, %cst_22 [0] : vector<8x128xf32> to vector<128xf32>
    %31 = vector.shape_cast %30 : vector<128xf32> to vector<1x128xf32>
    %cst_23 = arith.constant 8.000000e+00 : f32
    %32 = vector.broadcast %cst_23 : f32 to vector<1x128xf32>
    %33 = arith.divf %31, %32 : vector<1x128xf32>
    %34 = tpu.concatenate %28, %33 in 0 : vector<1x128xf32>, vector<1x128xf32> -> vector<2x128xf32>
    %35 = vector.extract_strided_slice %17 {offsets = [0, 0], sizes = [16, 128], strides = [1, 1]} : vector<32x128xf32> to vector<16x128xf32>
    %cst_24 = arith.constant dense<0.000000e+00> : vector<2x16xf32>
    %36 = tpu.matmul %34, %35, %cst_24 {dimension_numbers = #tpu.dot_dimension_numbers<[1], [1], [0], [0], [0, 0, 1, 0], [], []>} : vector<2x128xf32>, vector<16x128xf32>, vector<2x16xf32> -> vector<2x16xf32>
    %cst_25 = arith.constant 0.000000e+00 : f32
    %37 = vector.broadcast %cst_25 : f32 to vector<2x16xf32>
    %38 = arith.maximumf %36, %37 : vector<2x16xf32>
    %39 = vector.extract_strided_slice %17 {offsets = [16, 0], sizes = [16, 128], strides = [1, 1]} : vector<32x128xf32> to vector<16x128xf32>
    %cst_26 = arith.constant dense<0.000000e+00> : vector<2x128xf32>
    %40 = tpu.matmul %38, %39, %cst_26 {dimension_numbers = #tpu.dot_dimension_numbers<[1], [0], [0], [1], [0, 0, 1, 1], [], []>} : vector<2x16xf32>, vector<16x128xf32>, vector<2x128xf32> -> vector<2x128xf32>
    %41 = arith.negf %40 : vector<2x128xf32>
    %42 = math.exp %41 : vector<2x128xf32>
    %cst_27 = arith.constant 1.000000e+00 : f32
    %43 = vector.broadcast %cst_27 : f32 to vector<2x128xf32>
    %44 = arith.addf %43, %42 : vector<2x128xf32>
    %45 = arith.divf %43, %44 : vector<2x128xf32>
    %46 = vector.extract_strided_slice %5 {offsets = [0, 0], sizes = [8, 128], strides = [1, 1]} : vector<16x128xf32> to vector<8x128xf32>
    %47 = vector.extract_strided_slice %45 {offsets = [0, 0], sizes = [1, 128], strides = [1, 1]} : vector<2x128xf32> to vector<1x128xf32>
    %48 = vector.broadcast %47 : vector<1x128xf32> to vector<8x128xf32>
    %49 = arith.mulf %46, %48 : vector<8x128xf32>
    %50 = vector.extract_strided_slice %5 {offsets = [8, 0], sizes = [8, 128], strides = [1, 1]} : vector<16x128xf32> to vector<8x128xf32>
    %51 = vector.extract_strided_slice %45 {offsets = [1, 0], sizes = [1, 128], strides = [1, 1]} : vector<2x128xf32> to vector<1x128xf32>
    %52 = vector.broadcast %51 : vector<1x128xf32> to vector<8x128xf32>
    %53 = arith.mulf %50, %52 : vector<8x128xf32>
    %54 = tpu.concatenate %49, %53 in 0 : vector<8x128xf32>, vector<8x128xf32> -> vector<16x128xf32>
    %c0_28 = arith.constant 0 : index
    %c0_29 = arith.constant 0 : index
    %55 = vector.load %arg8[%c0_28, %c0_29] : memref<24x128xf32, #tpu.memory_space<vmem>>, vector<1x128xf32>
    %c1 = arith.constant 1 : index
    %c0_30 = arith.constant 0 : index
    %56 = vector.load %arg8[%c1, %c0_30] : memref<24x128xf32, #tpu.memory_space<vmem>>, vector<1x128xf32>
    %cst_31 = arith.constant dense<0.000000e+00> : vector<16xf32>
    %57 = vector.multi_reduction <add>, %54, %cst_31 [1] : vector<16x128xf32> to vector<16xf32>
    %58 = vector.shape_cast %57 : vector<16xf32> to vector<16x1xf32>
    %cst_32 = arith.constant 1.280000e+02 : f32
    %59 = vector.broadcast %cst_32 : f32 to vector<16x1xf32>
    %60 = arith.divf %58, %59 : vector<16x1xf32>
    %61 = vector.broadcast %60 : vector<16x1xf32> to vector<16x128xf32>
    %62 = arith.subf %54, %61 : vector<16x128xf32>
    %63 = arith.mulf %62, %62 : vector<16x128xf32>
    %cst_33 = arith.constant dense<0.000000e+00> : vector<16xf32>
    %64 = vector.multi_reduction <add>, %63, %cst_33 [1] : vector<16x128xf32> to vector<16xf32>
    %65 = vector.shape_cast %64 : vector<16xf32> to vector<16x1xf32>
    %cst_34 = arith.constant 1.280000e+02 : f32
    %66 = vector.broadcast %cst_34 : f32 to vector<16x1xf32>
    %67 = arith.divf %65, %66 : vector<16x1xf32>
    %68 = vector.broadcast %60 : vector<16x1xf32> to vector<16x128xf32>
    %69 = arith.subf %54, %68 : vector<16x128xf32>
    %cst_35 = arith.constant 9.99999974E-6 : f32
    %70 = vector.broadcast %cst_35 : f32 to vector<16x1xf32>
    %71 = arith.addf %67, %70 : vector<16x1xf32>
    %72 = math.rsqrt %71 : vector<16x1xf32>
    %73 = vector.broadcast %72 : vector<16x1xf32> to vector<16x128xf32>
    %74 = arith.mulf %69, %73 : vector<16x128xf32>
    %75 = vector.broadcast %55 : vector<1x128xf32> to vector<16x128xf32>
    %76 = arith.mulf %74, %75 : vector<16x128xf32>
    %77 = vector.broadcast %56 : vector<1x128xf32> to vector<16x128xf32>
    %78 = arith.addf %76, %77 : vector<16x128xf32>
    %79 = arith.truncf %78 : vector<16x128xf32> to vector<16x128xbf16>
    %cst_36 = arith.constant dense<0.000000e+00> : vector<16x1536xf32>
    %80 = tpu.matmul %79, %19, %cst_36 {dimension_numbers = #tpu.dot_dimension_numbers<[1], [0], [0], [1], [0, 0, 1, 1], [], []>} : vector<16x128xbf16>, vector<128x1536xbf16>, vector<16x1536xf32> -> vector<16x1536xf32>
    %81 = vector.extract_strided_slice %80 {offsets = [0, 0], sizes = [16, 128], strides = [1, 1]} : vector<16x1536xf32> to vector<16x128xf32>
    %82 = vector.extract_strided_slice %80 {offsets = [0, 128], sizes = [16, 128], strides = [1, 1]} : vector<16x1536xf32> to vector<16x128xf32>
    %83 = vector.extract_strided_slice %80 {offsets = [0, 256], sizes = [16, 128], strides = [1, 1]} : vector<16x1536xf32> to vector<16x128xf32>
    %84 = vector.extract_strided_slice %80 {offsets = [0, 384], sizes = [16, 128], strides = [1, 1]} : vector<16x1536xf32> to vector<16x128xf32>
    %85 = tpu.concatenate %81, %82, %83, %84 in 0 : vector<16x128xf32>, vector<16x128xf32>, vector<16x128xf32>, vector<16x128xf32> -> vector<64x128xf32>
    %86 = vector.extract_strided_slice %80 {offsets = [0, 512], sizes = [16, 128], strides = [1, 1]} : vector<16x1536xf32> to vector<16x128xf32>
    %87 = vector.extract_strided_slice %80 {offsets = [0, 640], sizes = [16, 128], strides = [1, 1]} : vector<16x1536xf32> to vector<16x128xf32>
    %88 = vector.extract_strided_slice %80 {offsets = [0, 768], sizes = [16, 128], strides = [1, 1]} : vector<16x1536xf32> to vector<16x128xf32>
    %89 = vector.extract_strided_slice %80 {offsets = [0, 896], sizes = [16, 128], strides = [1, 1]} : vector<16x1536xf32> to vector<16x128xf32>
    %90 = tpu.concatenate %86, %87, %88, %89 in 0 : vector<16x128xf32>, vector<16x128xf32>, vector<16x128xf32>, vector<16x128xf32> -> vector<64x128xf32>
    %91 = vector.extract_strided_slice %80 {offsets = [0, 1024], sizes = [16, 128], strides = [1, 1]} : vector<16x1536xf32> to vector<16x128xf32>
    %92 = vector.extract_strided_slice %80 {offsets = [0, 1152], sizes = [16, 128], strides = [1, 1]} : vector<16x1536xf32> to vector<16x128xf32>
    %93 = vector.extract_strided_slice %80 {offsets = [0, 1280], sizes = [16, 128], strides = [1, 1]} : vector<16x1536xf32> to vector<16x128xf32>
    %94 = vector.extract_strided_slice %80 {offsets = [0, 1408], sizes = [16, 128], strides = [1, 1]} : vector<16x1536xf32> to vector<16x128xf32>
    %95 = tpu.concatenate %91, %92, %93, %94 in 0 : vector<16x128xf32>, vector<16x128xf32>, vector<16x128xf32>, vector<16x128xf32> -> vector<64x128xf32>
    %cst_37 = arith.constant dense<0.000000e+00> : vector<64x64xf32>
    %96 = tpu.matmul %85, %90, %cst_37 {dimension_numbers = #tpu.dot_dimension_numbers<[1], [1], [0], [0], [0, 0, 1, 0], [], []>} : vector<64x128xf32>, vector<64x128xf32>, vector<64x64xf32> -> vector<64x64xf32>
    %cst_38 = arith.constant 1.250000e-01 : f32
    %97 = vector.broadcast %cst_38 : f32 to vector<64x64xf32>
    %98 = arith.mulf %96, %97 : vector<64x64xf32>
    %99 = arith.addf %98, %15 : vector<64x64xf32>
    %cst_39 = arith.constant dense<0xFF800000> : vector<64xf32>
    %100 = vector.multi_reduction <maximumf>, %99, %cst_39 [1] : vector<64x64xf32> to vector<64xf32>
    %101 = vector.shape_cast %100 : vector<64xf32> to vector<64x1xf32>
    %102 = vector.broadcast %101 : vector<64x1xf32> to vector<64x64xf32>
    %103 = arith.subf %99, %102 : vector<64x64xf32>
    %104 = math.exp %103 : vector<64x64xf32>
    %cst_40 = arith.constant dense<0.000000e+00> : vector<64xf32>
    %105 = vector.multi_reduction <add>, %104, %cst_40 [1] : vector<64x64xf32> to vector<64xf32>
    %106 = vector.shape_cast %105 : vector<64xf32> to vector<64x1xf32>
    %107 = tpu.reciprocal %106 {approx = true} : vector<64x1xf32> -> vector<64x1xf32>
    %108 = vector.broadcast %107 : vector<64x1xf32> to vector<64x64xf32>
    %109 = arith.mulf %104, %108 : vector<64x64xf32>
    %cst_41 = arith.constant dense<0.000000e+00> : vector<64x128xf32>
    %110 = tpu.matmul %109, %95, %cst_41 {dimension_numbers = #tpu.dot_dimension_numbers<[1], [0], [0], [1], [0, 0, 1, 1], [], []>} : vector<64x64xf32>, vector<64x128xf32>, vector<64x128xf32> -> vector<64x128xf32>
    %111 = vector.extract_strided_slice %110 {offsets = [0, 0], sizes = [16, 128], strides = [1, 1]} : vector<64x128xf32> to vector<16x128xf32>
    %112 = arith.truncf %111 : vector<16x128xf32> to vector<16x128xbf16>
    %113 = vector.extract_strided_slice %21 {offsets = [0, 0], sizes = [128, 128], strides = [1, 1]} : vector<512x128xbf16> to vector<128x128xbf16>
    %cst_42 = arith.constant dense<0.000000e+00> : vector<16x128xf32>
    %114 = tpu.matmul %112, %113, %cst_42 {dimension_numbers = #tpu.dot_dimension_numbers<[1], [0], [0], [1], [0, 0, 1, 1], [], []>} : vector<16x128xbf16>, vector<128x128xbf16>, vector<16x128xf32> -> vector<16x128xf32>
    %115 = arith.addf %54, %114 : vector<16x128xf32>
    %116 = vector.extract_strided_slice %110 {offsets = [16, 0], sizes = [16, 128], strides = [1, 1]} : vector<64x128xf32> to vector<16x128xf32>
    %117 = arith.truncf %116 : vector<16x128xf32> to vector<16x128xbf16>
    %118 = vector.extract_strided_slice %21 {offsets = [128, 0], sizes = [128, 128], strides = [1, 1]} : vector<512x128xbf16> to vector<128x128xbf16>
    %cst_43 = arith.constant dense<0.000000e+00> : vector<16x128xf32>
    %119 = tpu.matmul %117, %118, %cst_43 {dimension_numbers = #tpu.dot_dimension_numbers<[1], [0], [0], [1], [0, 0, 1, 1], [], []>} : vector<16x128xbf16>, vector<128x128xbf16>, vector<16x128xf32> -> vector<16x128xf32>
    %120 = arith.addf %115, %119 : vector<16x128xf32>
    %121 = vector.extract_strided_slice %110 {offsets = [32, 0], sizes = [16, 128], strides = [1, 1]} : vector<64x128xf32> to vector<16x128xf32>
    %122 = arith.truncf %121 : vector<16x128xf32> to vector<16x128xbf16>
    %123 = vector.extract_strided_slice %21 {offsets = [256, 0], sizes = [128, 128], strides = [1, 1]} : vector<512x128xbf16> to vector<128x128xbf16>
    %cst_44 = arith.constant dense<0.000000e+00> : vector<16x128xf32>
    %124 = tpu.matmul %122, %123, %cst_44 {dimension_numbers = #tpu.dot_dimension_numbers<[1], [0], [0], [1], [0, 0, 1, 1], [], []>} : vector<16x128xbf16>, vector<128x128xbf16>, vector<16x128xf32> -> vector<16x128xf32>
    %125 = arith.addf %120, %124 : vector<16x128xf32>
    %126 = vector.extract_strided_slice %110 {offsets = [48, 0], sizes = [16, 128], strides = [1, 1]} : vector<64x128xf32> to vector<16x128xf32>
    %127 = arith.truncf %126 : vector<16x128xf32> to vector<16x128xbf16>
    %128 = vector.extract_strided_slice %21 {offsets = [384, 0], sizes = [128, 128], strides = [1, 1]} : vector<512x128xbf16> to vector<128x128xbf16>
    %cst_45 = arith.constant dense<0.000000e+00> : vector<16x128xf32>
    %129 = tpu.matmul %127, %128, %cst_45 {dimension_numbers = #tpu.dot_dimension_numbers<[1], [0], [0], [1], [0, 0, 1, 1], [], []>} : vector<16x128xbf16>, vector<128x128xbf16>, vector<16x128xf32> -> vector<16x128xf32>
    %130 = arith.addf %125, %129 : vector<16x128xf32>
    %c2 = arith.constant 2 : index
    %c0_46 = arith.constant 0 : index
    %131 = vector.load %arg8[%c2, %c0_46] : memref<24x128xf32, #tpu.memory_space<vmem>>, vector<1x128xf32>
    %c3 = arith.constant 3 : index
    %c0_47 = arith.constant 0 : index
    %132 = vector.load %arg8[%c3, %c0_47] : memref<24x128xf32, #tpu.memory_space<vmem>>, vector<1x128xf32>
    %cst_48 = arith.constant dense<0.000000e+00> : vector<16xf32>
    %133 = vector.multi_reduction <add>, %130, %cst_48 [1] : vector<16x128xf32> to vector<16xf32>
    %134 = vector.shape_cast %133 : vector<16xf32> to vector<16x1xf32>
    %cst_49 = arith.constant 1.280000e+02 : f32
    %135 = vector.broadcast %cst_49 : f32 to vector<16x1xf32>
    %136 = arith.divf %134, %135 : vector<16x1xf32>
    %137 = vector.broadcast %136 : vector<16x1xf32> to vector<16x128xf32>
    %138 = arith.subf %130, %137 : vector<16x128xf32>
    %139 = arith.mulf %138, %138 : vector<16x128xf32>
    %cst_50 = arith.constant dense<0.000000e+00> : vector<16xf32>
    %140 = vector.multi_reduction <add>, %139, %cst_50 [1] : vector<16x128xf32> to vector<16xf32>
    %141 = vector.shape_cast %140 : vector<16xf32> to vector<16x1xf32>
    %cst_51 = arith.constant 1.280000e+02 : f32
    %142 = vector.broadcast %cst_51 : f32 to vector<16x1xf32>
    %143 = arith.divf %141, %142 : vector<16x1xf32>
    %144 = vector.broadcast %136 : vector<16x1xf32> to vector<16x128xf32>
    %145 = arith.subf %130, %144 : vector<16x128xf32>
    %cst_52 = arith.constant 9.99999974E-6 : f32
    %146 = vector.broadcast %cst_52 : f32 to vector<16x1xf32>
    %147 = arith.addf %143, %146 : vector<16x1xf32>
    %148 = math.rsqrt %147 : vector<16x1xf32>
    %149 = vector.broadcast %148 : vector<16x1xf32> to vector<16x128xf32>
    %150 = arith.mulf %145, %149 : vector<16x128xf32>
    %151 = vector.broadcast %131 : vector<1x128xf32> to vector<16x128xf32>
    %152 = arith.mulf %150, %151 : vector<16x128xf32>
    %153 = vector.broadcast %132 : vector<1x128xf32> to vector<16x128xf32>
    %154 = arith.addf %152, %153 : vector<16x128xf32>
    %155 = arith.truncf %154 : vector<16x128xf32> to vector<16x128xbf16>
    %156 = vector.extract_strided_slice %23 {offsets = [0, 0], sizes = [64, 128], strides = [1, 1]} : vector<128x128xbf16> to vector<64x128xbf16>
    %cst_53 = arith.constant dense<0.000000e+00> : vector<16x64xf32>
    %157 = tpu.matmul %155, %156, %cst_53 {dimension_numbers = #tpu.dot_dimension_numbers<[1], [1], [0], [0], [0, 0, 1, 0], [], []>} : vector<16x128xbf16>, vector<64x128xbf16>, vector<16x64xf32> -> vector<16x64xf32>
    %c4 = arith.constant 4 : index
    %c0_54 = arith.constant 0 : index
    %158 = vector.load %arg8[%c4, %c0_54] : memref<24x128xf32, #tpu.memory_space<vmem>>, vector<1x128xf32>
    %159 = vector.extract_strided_slice %158 {offsets = [0, 0], sizes = [1, 64], strides = [1, 1]} : vector<1x128xf32> to vector<1x64xf32>
    %160 = vector.broadcast %159 : vector<1x64xf32> to vector<16x64xf32>
    %161 = arith.addf %157, %160 : vector<16x64xf32>
    %cst_55 = arith.constant 5.000000e-01 : f32
    %162 = vector.broadcast %cst_55 : f32 to vector<16x64xf32>
    %163 = arith.mulf %162, %161 : vector<16x64xf32>
    %cst_56 = arith.constant 4.471500e-02 : f32
    %164 = vector.broadcast %cst_56 : f32 to vector<16x64xf32>
    %165 = arith.mulf %164, %161 : vector<16x64xf32>
    %166 = arith.mulf %165, %161 : vector<16x64xf32>
    %167 = arith.mulf %166, %161 : vector<16x64xf32>
    %168 = arith.addf %161, %167 : vector<16x64xf32>
    %cst_57 = arith.constant 0.797884583 : f32
    %169 = vector.broadcast %cst_57 : f32 to vector<16x64xf32>
    %170 = arith.mulf %169, %168 : vector<16x64xf32>
    %171 = math.tanh %170 : vector<16x64xf32>
    %cst_58 = arith.constant 1.000000e+00 : f32
    %172 = vector.broadcast %cst_58 : f32 to vector<16x64xf32>
    %173 = arith.addf %172, %171 : vector<16x64xf32>
    %174 = arith.mulf %163, %173 : vector<16x64xf32>
    %175 = arith.truncf %174 : vector<16x64xf32> to vector<16x64xbf16>
    %176 = vector.extract_strided_slice %23 {offsets = [64, 0], sizes = [64, 128], strides = [1, 1]} : vector<128x128xbf16> to vector<64x128xbf16>
    %cst_59 = arith.constant dense<0.000000e+00> : vector<16x128xf32>
    %177 = tpu.matmul %175, %176, %cst_59 {dimension_numbers = #tpu.dot_dimension_numbers<[1], [0], [0], [1], [0, 0, 1, 1], [], []>} : vector<16x64xbf16>, vector<64x128xbf16>, vector<16x128xf32> -> vector<16x128xf32>
    %c5 = arith.constant 5 : index
    %c0_60 = arith.constant 0 : index
    %178 = vector.load %arg8[%c5, %c0_60] : memref<24x128xf32, #tpu.memory_space<vmem>>, vector<1x128xf32>
    %179 = vector.broadcast %178 : vector<1x128xf32> to vector<16x128xf32>
    %180 = arith.addf %177, %179 : vector<16x128xf32>
    %181 = arith.addf %180, %130 : vector<16x128xf32>
    %c1_61 = arith.constant 1 : index
    %c0_62 = arith.constant 0 : index
    %c0_63 = arith.constant 0 : index
    %182 = vector.load %arg7[%c1_61, %c0_62, %c0_63] : memref<3x32x128xf32, #tpu.memory_space<vmem>>, vector<1x32x128xf32>
    %183 = vector.shape_cast %182 : vector<1x32x128xf32> to vector<32x128xf32>
    %c1_64 = arith.constant 1 : index
    %c0_65 = arith.constant 0 : index
    %c0_66 = arith.constant 0 : index
    %184 = vector.load %arg4[%c1_64, %c0_65, %c0_66] : memref<3x128x1536xbf16, #tpu.memory_space<vmem>>, vector<1x128x1536xbf16>
    %185 = vector.shape_cast %184 : vector<1x128x1536xbf16> to vector<128x1536xbf16>
    %c1_67 = arith.constant 1 : index
    %c0_68 = arith.constant 0 : index
    %c0_69 = arith.constant 0 : index
    %186 = vector.load %arg5[%c1_67, %c0_68, %c0_69] : memref<3x512x128xbf16, #tpu.memory_space<vmem>>, vector<1x512x128xbf16>
    %187 = vector.shape_cast %186 : vector<1x512x128xbf16> to vector<512x128xbf16>
    %c1_70 = arith.constant 1 : index
    %c0_71 = arith.constant 0 : index
    %c0_72 = arith.constant 0 : index
    %188 = vector.load %arg6[%c1_70, %c0_71, %c0_72] : memref<3x128x128xbf16, #tpu.memory_space<vmem>>, vector<1x128x128xbf16>
    %189 = vector.shape_cast %188 : vector<1x128x128xbf16> to vector<128x128xbf16>
    %190 = vector.extract_strided_slice %181 {offsets = [0, 0], sizes = [8, 128], strides = [1, 1]} : vector<16x128xf32> to vector<8x128xf32>
    %cst_73 = arith.constant dense<0.000000e+00> : vector<128xf32>
    %191 = vector.multi_reduction <add>, %190, %cst_73 [0] : vector<8x128xf32> to vector<128xf32>
    %192 = vector.shape_cast %191 : vector<128xf32> to vector<1x128xf32>
    %cst_74 = arith.constant 8.000000e+00 : f32
    %193 = vector.broadcast %cst_74 : f32 to vector<1x128xf32>
    %194 = arith.divf %192, %193 : vector<1x128xf32>
    %195 = vector.extract_strided_slice %181 {offsets = [8, 0], sizes = [8, 128], strides = [1, 1]} : vector<16x128xf32> to vector<8x128xf32>
    %cst_75 = arith.constant dense<0.000000e+00> : vector<128xf32>
    %196 = vector.multi_reduction <add>, %195, %cst_75 [0] : vector<8x128xf32> to vector<128xf32>
    %197 = vector.shape_cast %196 : vector<128xf32> to vector<1x128xf32>
    %cst_76 = arith.constant 8.000000e+00 : f32
    %198 = vector.broadcast %cst_76 : f32 to vector<1x128xf32>
    %199 = arith.divf %197, %198 : vector<1x128xf32>
    %200 = tpu.concatenate %194, %199 in 0 : vector<1x128xf32>, vector<1x128xf32> -> vector<2x128xf32>
    %201 = vector.extract_strided_slice %183 {offsets = [0, 0], sizes = [16, 128], strides = [1, 1]} : vector<32x128xf32> to vector<16x128xf32>
    %cst_77 = arith.constant dense<0.000000e+00> : vector<2x16xf32>
    %202 = tpu.matmul %200, %201, %cst_77 {dimension_numbers = #tpu.dot_dimension_numbers<[1], [1], [0], [0], [0, 0, 1, 0], [], []>} : vector<2x128xf32>, vector<16x128xf32>, vector<2x16xf32> -> vector<2x16xf32>
    %cst_78 = arith.constant 0.000000e+00 : f32
    %203 = vector.broadcast %cst_78 : f32 to vector<2x16xf32>
    %204 = arith.maximumf %202, %203 : vector<2x16xf32>
    %205 = vector.extract_strided_slice %183 {offsets = [16, 0], sizes = [16, 128], strides = [1, 1]} : vector<32x128xf32> to vector<16x128xf32>
    %cst_79 = arith.constant dense<0.000000e+00> : vector<2x128xf32>
    %206 = tpu.matmul %204, %205, %cst_79 {dimension_numbers = #tpu.dot_dimension_numbers<[1], [0], [0], [1], [0, 0, 1, 1], [], []>} : vector<2x16xf32>, vector<16x128xf32>, vector<2x128xf32> -> vector<2x128xf32>
    %207 = arith.negf %206 : vector<2x128xf32>
    %208 = math.exp %207 : vector<2x128xf32>
    %cst_80 = arith.constant 1.000000e+00 : f32
    %209 = vector.broadcast %cst_80 : f32 to vector<2x128xf32>
    %210 = arith.addf %209, %208 : vector<2x128xf32>
    %211 = arith.divf %209, %210 : vector<2x128xf32>
    %212 = vector.extract_strided_slice %181 {offsets = [0, 0], sizes = [8, 128], strides = [1, 1]} : vector<16x128xf32> to vector<8x128xf32>
    %213 = vector.extract_strided_slice %211 {offsets = [0, 0], sizes = [1, 128], strides = [1, 1]} : vector<2x128xf32> to vector<1x128xf32>
    %214 = vector.broadcast %213 : vector<1x128xf32> to vector<8x128xf32>
    %215 = arith.mulf %212, %214 : vector<8x128xf32>
    %216 = vector.extract_strided_slice %181 {offsets = [8, 0], sizes = [8, 128], strides = [1, 1]} : vector<16x128xf32> to vector<8x128xf32>
    %217 = vector.extract_strided_slice %211 {offsets = [1, 0], sizes = [1, 128], strides = [1, 1]} : vector<2x128xf32> to vector<1x128xf32>
    %218 = vector.broadcast %217 : vector<1x128xf32> to vector<8x128xf32>
    %219 = arith.mulf %216, %218 : vector<8x128xf32>
    %220 = tpu.concatenate %215, %219 in 0 : vector<8x128xf32>, vector<8x128xf32> -> vector<16x128xf32>
    %c6 = arith.constant 6 : index
    %c0_81 = arith.constant 0 : index
    %221 = vector.load %arg8[%c6, %c0_81] : memref<24x128xf32, #tpu.memory_space<vmem>>, vector<1x128xf32>
    %c7 = arith.constant 7 : index
    %c0_82 = arith.constant 0 : index
    %222 = vector.load %arg8[%c7, %c0_82] : memref<24x128xf32, #tpu.memory_space<vmem>>, vector<1x128xf32>
    %cst_83 = arith.constant dense<0.000000e+00> : vector<16xf32>
    %223 = vector.multi_reduction <add>, %220, %cst_83 [1] : vector<16x128xf32> to vector<16xf32>
    %224 = vector.shape_cast %223 : vector<16xf32> to vector<16x1xf32>
    %cst_84 = arith.constant 1.280000e+02 : f32
    %225 = vector.broadcast %cst_84 : f32 to vector<16x1xf32>
    %226 = arith.divf %224, %225 : vector<16x1xf32>
    %227 = vector.broadcast %226 : vector<16x1xf32> to vector<16x128xf32>
    %228 = arith.subf %220, %227 : vector<16x128xf32>
    %229 = arith.mulf %228, %228 : vector<16x128xf32>
    %cst_85 = arith.constant dense<0.000000e+00> : vector<16xf32>
    %230 = vector.multi_reduction <add>, %229, %cst_85 [1] : vector<16x128xf32> to vector<16xf32>
    %231 = vector.shape_cast %230 : vector<16xf32> to vector<16x1xf32>
    %cst_86 = arith.constant 1.280000e+02 : f32
    %232 = vector.broadcast %cst_86 : f32 to vector<16x1xf32>
    %233 = arith.divf %231, %232 : vector<16x1xf32>
    %234 = vector.broadcast %226 : vector<16x1xf32> to vector<16x128xf32>
    %235 = arith.subf %220, %234 : vector<16x128xf32>
    %cst_87 = arith.constant 9.99999974E-6 : f32
    %236 = vector.broadcast %cst_87 : f32 to vector<16x1xf32>
    %237 = arith.addf %233, %236 : vector<16x1xf32>
    %238 = math.rsqrt %237 : vector<16x1xf32>
    %239 = vector.broadcast %238 : vector<16x1xf32> to vector<16x128xf32>
    %240 = arith.mulf %235, %239 : vector<16x128xf32>
    %241 = vector.broadcast %221 : vector<1x128xf32> to vector<16x128xf32>
    %242 = arith.mulf %240, %241 : vector<16x128xf32>
    %243 = vector.broadcast %222 : vector<1x128xf32> to vector<16x128xf32>
    %244 = arith.addf %242, %243 : vector<16x128xf32>
    %245 = arith.truncf %244 : vector<16x128xf32> to vector<16x128xbf16>
    %cst_88 = arith.constant dense<0.000000e+00> : vector<16x1536xf32>
    %246 = tpu.matmul %245, %185, %cst_88 {dimension_numbers = #tpu.dot_dimension_numbers<[1], [0], [0], [1], [0, 0, 1, 1], [], []>} : vector<16x128xbf16>, vector<128x1536xbf16>, vector<16x1536xf32> -> vector<16x1536xf32>
    %247 = vector.extract_strided_slice %246 {offsets = [0, 0], sizes = [16, 128], strides = [1, 1]} : vector<16x1536xf32> to vector<16x128xf32>
    %248 = vector.extract_strided_slice %246 {offsets = [0, 128], sizes = [16, 128], strides = [1, 1]} : vector<16x1536xf32> to vector<16x128xf32>
    %249 = vector.extract_strided_slice %246 {offsets = [0, 256], sizes = [16, 128], strides = [1, 1]} : vector<16x1536xf32> to vector<16x128xf32>
    %250 = vector.extract_strided_slice %246 {offsets = [0, 384], sizes = [16, 128], strides = [1, 1]} : vector<16x1536xf32> to vector<16x128xf32>
    %251 = tpu.concatenate %247, %248, %249, %250 in 0 : vector<16x128xf32>, vector<16x128xf32>, vector<16x128xf32>, vector<16x128xf32> -> vector<64x128xf32>
    %252 = vector.extract_strided_slice %246 {offsets = [0, 512], sizes = [16, 128], strides = [1, 1]} : vector<16x1536xf32> to vector<16x128xf32>
    %253 = vector.extract_strided_slice %246 {offsets = [0, 640], sizes = [16, 128], strides = [1, 1]} : vector<16x1536xf32> to vector<16x128xf32>
    %254 = vector.extract_strided_slice %246 {offsets = [0, 768], sizes = [16, 128], strides = [1, 1]} : vector<16x1536xf32> to vector<16x128xf32>
    %255 = vector.extract_strided_slice %246 {offsets = [0, 896], sizes = [16, 128], strides = [1, 1]} : vector<16x1536xf32> to vector<16x128xf32>
    %256 = tpu.concatenate %252, %253, %254, %255 in 0 : vector<16x128xf32>, vector<16x128xf32>, vector<16x128xf32>, vector<16x128xf32> -> vector<64x128xf32>
    %257 = vector.extract_strided_slice %246 {offsets = [0, 1024], sizes = [16, 128], strides = [1, 1]} : vector<16x1536xf32> to vector<16x128xf32>
    %258 = vector.extract_strided_slice %246 {offsets = [0, 1152], sizes = [16, 128], strides = [1, 1]} : vector<16x1536xf32> to vector<16x128xf32>
    %259 = vector.extract_strided_slice %246 {offsets = [0, 1280], sizes = [16, 128], strides = [1, 1]} : vector<16x1536xf32> to vector<16x128xf32>
    %260 = vector.extract_strided_slice %246 {offsets = [0, 1408], sizes = [16, 128], strides = [1, 1]} : vector<16x1536xf32> to vector<16x128xf32>
    %261 = tpu.concatenate %257, %258, %259, %260 in 0 : vector<16x128xf32>, vector<16x128xf32>, vector<16x128xf32>, vector<16x128xf32> -> vector<64x128xf32>
    %cst_89 = arith.constant dense<0.000000e+00> : vector<64x64xf32>
    %262 = tpu.matmul %251, %256, %cst_89 {dimension_numbers = #tpu.dot_dimension_numbers<[1], [1], [0], [0], [0, 0, 1, 0], [], []>} : vector<64x128xf32>, vector<64x128xf32>, vector<64x64xf32> -> vector<64x64xf32>
    %cst_90 = arith.constant 1.250000e-01 : f32
    %263 = vector.broadcast %cst_90 : f32 to vector<64x64xf32>
    %264 = arith.mulf %262, %263 : vector<64x64xf32>
    %265 = arith.addf %264, %15 : vector<64x64xf32>
    %cst_91 = arith.constant dense<0xFF800000> : vector<64xf32>
    %266 = vector.multi_reduction <maximumf>, %265, %cst_91 [1] : vector<64x64xf32> to vector<64xf32>
    %267 = vector.shape_cast %266 : vector<64xf32> to vector<64x1xf32>
    %268 = vector.broadcast %267 : vector<64x1xf32> to vector<64x64xf32>
    %269 = arith.subf %265, %268 : vector<64x64xf32>
    %270 = math.exp %269 : vector<64x64xf32>
    %cst_92 = arith.constant dense<0.000000e+00> : vector<64xf32>
    %271 = vector.multi_reduction <add>, %270, %cst_92 [1] : vector<64x64xf32> to vector<64xf32>
    %272 = vector.shape_cast %271 : vector<64xf32> to vector<64x1xf32>
    %273 = tpu.reciprocal %272 {approx = true} : vector<64x1xf32> -> vector<64x1xf32>
    %274 = vector.broadcast %273 : vector<64x1xf32> to vector<64x64xf32>
    %275 = arith.mulf %270, %274 : vector<64x64xf32>
    %cst_93 = arith.constant dense<0.000000e+00> : vector<64x128xf32>
    %276 = tpu.matmul %275, %261, %cst_93 {dimension_numbers = #tpu.dot_dimension_numbers<[1], [0], [0], [1], [0, 0, 1, 1], [], []>} : vector<64x64xf32>, vector<64x128xf32>, vector<64x128xf32> -> vector<64x128xf32>
    %277 = vector.extract_strided_slice %276 {offsets = [0, 0], sizes = [16, 128], strides = [1, 1]} : vector<64x128xf32> to vector<16x128xf32>
    %278 = arith.truncf %277 : vector<16x128xf32> to vector<16x128xbf16>
    %279 = vector.extract_strided_slice %187 {offsets = [0, 0], sizes = [128, 128], strides = [1, 1]} : vector<512x128xbf16> to vector<128x128xbf16>
    %cst_94 = arith.constant dense<0.000000e+00> : vector<16x128xf32>
    %280 = tpu.matmul %278, %279, %cst_94 {dimension_numbers = #tpu.dot_dimension_numbers<[1], [0], [0], [1], [0, 0, 1, 1], [], []>} : vector<16x128xbf16>, vector<128x128xbf16>, vector<16x128xf32> -> vector<16x128xf32>
    %281 = arith.addf %220, %280 : vector<16x128xf32>
    %282 = vector.extract_strided_slice %276 {offsets = [16, 0], sizes = [16, 128], strides = [1, 1]} : vector<64x128xf32> to vector<16x128xf32>
    %283 = arith.truncf %282 : vector<16x128xf32> to vector<16x128xbf16>
    %284 = vector.extract_strided_slice %187 {offsets = [128, 0], sizes = [128, 128], strides = [1, 1]} : vector<512x128xbf16> to vector<128x128xbf16>
    %cst_95 = arith.constant dense<0.000000e+00> : vector<16x128xf32>
    %285 = tpu.matmul %283, %284, %cst_95 {dimension_numbers = #tpu.dot_dimension_numbers<[1], [0], [0], [1], [0, 0, 1, 1], [], []>} : vector<16x128xbf16>, vector<128x128xbf16>, vector<16x128xf32> -> vector<16x128xf32>
    %286 = arith.addf %281, %285 : vector<16x128xf32>
    %287 = vector.extract_strided_slice %276 {offsets = [32, 0], sizes = [16, 128], strides = [1, 1]} : vector<64x128xf32> to vector<16x128xf32>
    %288 = arith.truncf %287 : vector<16x128xf32> to vector<16x128xbf16>
    %289 = vector.extract_strided_slice %187 {offsets = [256, 0], sizes = [128, 128], strides = [1, 1]} : vector<512x128xbf16> to vector<128x128xbf16>
    %cst_96 = arith.constant dense<0.000000e+00> : vector<16x128xf32>
    %290 = tpu.matmul %288, %289, %cst_96 {dimension_numbers = #tpu.dot_dimension_numbers<[1], [0], [0], [1], [0, 0, 1, 1], [], []>} : vector<16x128xbf16>, vector<128x128xbf16>, vector<16x128xf32> -> vector<16x128xf32>
    %291 = arith.addf %286, %290 : vector<16x128xf32>
    %292 = vector.extract_strided_slice %276 {offsets = [48, 0], sizes = [16, 128], strides = [1, 1]} : vector<64x128xf32> to vector<16x128xf32>
    %293 = arith.truncf %292 : vector<16x128xf32> to vector<16x128xbf16>
    %294 = vector.extract_strided_slice %187 {offsets = [384, 0], sizes = [128, 128], strides = [1, 1]} : vector<512x128xbf16> to vector<128x128xbf16>
    %cst_97 = arith.constant dense<0.000000e+00> : vector<16x128xf32>
    %295 = tpu.matmul %293, %294, %cst_97 {dimension_numbers = #tpu.dot_dimension_numbers<[1], [0], [0], [1], [0, 0, 1, 1], [], []>} : vector<16x128xbf16>, vector<128x128xbf16>, vector<16x128xf32> -> vector<16x128xf32>
    %296 = arith.addf %291, %295 : vector<16x128xf32>
    %c8 = arith.constant 8 : index
    %c0_98 = arith.constant 0 : index
    %297 = vector.load %arg8[%c8, %c0_98] : memref<24x128xf32, #tpu.memory_space<vmem>>, vector<1x128xf32>
    %c9 = arith.constant 9 : index
    %c0_99 = arith.constant 0 : index
    %298 = vector.load %arg8[%c9, %c0_99] : memref<24x128xf32, #tpu.memory_space<vmem>>, vector<1x128xf32>
    %cst_100 = arith.constant dense<0.000000e+00> : vector<16xf32>
    %299 = vector.multi_reduction <add>, %296, %cst_100 [1] : vector<16x128xf32> to vector<16xf32>
    %300 = vector.shape_cast %299 : vector<16xf32> to vector<16x1xf32>
    %cst_101 = arith.constant 1.280000e+02 : f32
    %301 = vector.broadcast %cst_101 : f32 to vector<16x1xf32>
    %302 = arith.divf %300, %301 : vector<16x1xf32>
    %303 = vector.broadcast %302 : vector<16x1xf32> to vector<16x128xf32>
    %304 = arith.subf %296, %303 : vector<16x128xf32>
    %305 = arith.mulf %304, %304 : vector<16x128xf32>
    %cst_102 = arith.constant dense<0.000000e+00> : vector<16xf32>
    %306 = vector.multi_reduction <add>, %305, %cst_102 [1] : vector<16x128xf32> to vector<16xf32>
    %307 = vector.shape_cast %306 : vector<16xf32> to vector<16x1xf32>
    %cst_103 = arith.constant 1.280000e+02 : f32
    %308 = vector.broadcast %cst_103 : f32 to vector<16x1xf32>
    %309 = arith.divf %307, %308 : vector<16x1xf32>
    %310 = vector.broadcast %302 : vector<16x1xf32> to vector<16x128xf32>
    %311 = arith.subf %296, %310 : vector<16x128xf32>
    %cst_104 = arith.constant 9.99999974E-6 : f32
    %312 = vector.broadcast %cst_104 : f32 to vector<16x1xf32>
    %313 = arith.addf %309, %312 : vector<16x1xf32>
    %314 = math.rsqrt %313 : vector<16x1xf32>
    %315 = vector.broadcast %314 : vector<16x1xf32> to vector<16x128xf32>
    %316 = arith.mulf %311, %315 : vector<16x128xf32>
    %317 = vector.broadcast %297 : vector<1x128xf32> to vector<16x128xf32>
    %318 = arith.mulf %316, %317 : vector<16x128xf32>
    %319 = vector.broadcast %298 : vector<1x128xf32> to vector<16x128xf32>
    %320 = arith.addf %318, %319 : vector<16x128xf32>
    %321 = arith.truncf %320 : vector<16x128xf32> to vector<16x128xbf16>
    %322 = vector.extract_strided_slice %189 {offsets = [0, 0], sizes = [64, 128], strides = [1, 1]} : vector<128x128xbf16> to vector<64x128xbf16>
    %cst_105 = arith.constant dense<0.000000e+00> : vector<16x64xf32>
    %323 = tpu.matmul %321, %322, %cst_105 {dimension_numbers = #tpu.dot_dimension_numbers<[1], [1], [0], [0], [0, 0, 1, 0], [], []>} : vector<16x128xbf16>, vector<64x128xbf16>, vector<16x64xf32> -> vector<16x64xf32>
    %c10 = arith.constant 10 : index
    %c0_106 = arith.constant 0 : index
    %324 = vector.load %arg8[%c10, %c0_106] : memref<24x128xf32, #tpu.memory_space<vmem>>, vector<1x128xf32>
    %325 = vector.extract_strided_slice %324 {offsets = [0, 0], sizes = [1, 64], strides = [1, 1]} : vector<1x128xf32> to vector<1x64xf32>
    %326 = vector.broadcast %325 : vector<1x64xf32> to vector<16x64xf32>
    %327 = arith.addf %323, %326 : vector<16x64xf32>
    %cst_107 = arith.constant 5.000000e-01 : f32
    %328 = vector.broadcast %cst_107 : f32 to vector<16x64xf32>
    %329 = arith.mulf %328, %327 : vector<16x64xf32>
    %cst_108 = arith.constant 4.471500e-02 : f32
    %330 = vector.broadcast %cst_108 : f32 to vector<16x64xf32>
    %331 = arith.mulf %330, %327 : vector<16x64xf32>
    %332 = arith.mulf %331, %327 : vector<16x64xf32>
    %333 = arith.mulf %332, %327 : vector<16x64xf32>
    %334 = arith.addf %327, %333 : vector<16x64xf32>
    %cst_109 = arith.constant 0.797884583 : f32
    %335 = vector.broadcast %cst_109 : f32 to vector<16x64xf32>
    %336 = arith.mulf %335, %334 : vector<16x64xf32>
    %337 = math.tanh %336 : vector<16x64xf32>
    %cst_110 = arith.constant 1.000000e+00 : f32
    %338 = vector.broadcast %cst_110 : f32 to vector<16x64xf32>
    %339 = arith.addf %338, %337 : vector<16x64xf32>
    %340 = arith.mulf %329, %339 : vector<16x64xf32>
    %341 = arith.truncf %340 : vector<16x64xf32> to vector<16x64xbf16>
    %342 = vector.extract_strided_slice %189 {offsets = [64, 0], sizes = [64, 128], strides = [1, 1]} : vector<128x128xbf16> to vector<64x128xbf16>
    %cst_111 = arith.constant dense<0.000000e+00> : vector<16x128xf32>
    %343 = tpu.matmul %341, %342, %cst_111 {dimension_numbers = #tpu.dot_dimension_numbers<[1], [0], [0], [1], [0, 0, 1, 1], [], []>} : vector<16x64xbf16>, vector<64x128xbf16>, vector<16x128xf32> -> vector<16x128xf32>
    %c11 = arith.constant 11 : index
    %c0_112 = arith.constant 0 : index
    %344 = vector.load %arg8[%c11, %c0_112] : memref<24x128xf32, #tpu.memory_space<vmem>>, vector<1x128xf32>
    %345 = vector.broadcast %344 : vector<1x128xf32> to vector<16x128xf32>
    %346 = arith.addf %343, %345 : vector<16x128xf32>
    %347 = arith.addf %346, %296 : vector<16x128xf32>
    %c2_113 = arith.constant 2 : index
    %c0_114 = arith.constant 0 : index
    %c0_115 = arith.constant 0 : index
    %348 = vector.load %arg7[%c2_113, %c0_114, %c0_115] : memref<3x32x128xf32, #tpu.memory_space<vmem>>, vector<1x32x128xf32>
    %349 = vector.shape_cast %348 : vector<1x32x128xf32> to vector<32x128xf32>
    %c2_116 = arith.constant 2 : index
    %c0_117 = arith.constant 0 : index
    %c0_118 = arith.constant 0 : index
    %350 = vector.load %arg4[%c2_116, %c0_117, %c0_118] : memref<3x128x1536xbf16, #tpu.memory_space<vmem>>, vector<1x128x1536xbf16>
    %351 = vector.shape_cast %350 : vector<1x128x1536xbf16> to vector<128x1536xbf16>
    %c2_119 = arith.constant 2 : index
    %c0_120 = arith.constant 0 : index
    %c0_121 = arith.constant 0 : index
    %352 = vector.load %arg5[%c2_119, %c0_120, %c0_121] : memref<3x512x128xbf16, #tpu.memory_space<vmem>>, vector<1x512x128xbf16>
    %353 = vector.shape_cast %352 : vector<1x512x128xbf16> to vector<512x128xbf16>
    %c2_122 = arith.constant 2 : index
    %c0_123 = arith.constant 0 : index
    %c0_124 = arith.constant 0 : index
    %354 = vector.load %arg6[%c2_122, %c0_123, %c0_124] : memref<3x128x128xbf16, #tpu.memory_space<vmem>>, vector<1x128x128xbf16>
    %355 = vector.shape_cast %354 : vector<1x128x128xbf16> to vector<128x128xbf16>
    %356 = vector.extract_strided_slice %347 {offsets = [0, 0], sizes = [8, 128], strides = [1, 1]} : vector<16x128xf32> to vector<8x128xf32>
    %cst_125 = arith.constant dense<0.000000e+00> : vector<128xf32>
    %357 = vector.multi_reduction <add>, %356, %cst_125 [0] : vector<8x128xf32> to vector<128xf32>
    %358 = vector.shape_cast %357 : vector<128xf32> to vector<1x128xf32>
    %cst_126 = arith.constant 8.000000e+00 : f32
    %359 = vector.broadcast %cst_126 : f32 to vector<1x128xf32>
    %360 = arith.divf %358, %359 : vector<1x128xf32>
    %361 = vector.extract_strided_slice %347 {offsets = [8, 0], sizes = [8, 128], strides = [1, 1]} : vector<16x128xf32> to vector<8x128xf32>
    %cst_127 = arith.constant dense<0.000000e+00> : vector<128xf32>
    %362 = vector.multi_reduction <add>, %361, %cst_127 [0] : vector<8x128xf32> to vector<128xf32>
    %363 = vector.shape_cast %362 : vector<128xf32> to vector<1x128xf32>
    %cst_128 = arith.constant 8.000000e+00 : f32
    %364 = vector.broadcast %cst_128 : f32 to vector<1x128xf32>
    %365 = arith.divf %363, %364 : vector<1x128xf32>
    %366 = tpu.concatenate %360, %365 in 0 : vector<1x128xf32>, vector<1x128xf32> -> vector<2x128xf32>
    %367 = vector.extract_strided_slice %349 {offsets = [0, 0], sizes = [16, 128], strides = [1, 1]} : vector<32x128xf32> to vector<16x128xf32>
    %cst_129 = arith.constant dense<0.000000e+00> : vector<2x16xf32>
    %368 = tpu.matmul %366, %367, %cst_129 {dimension_numbers = #tpu.dot_dimension_numbers<[1], [1], [0], [0], [0, 0, 1, 0], [], []>} : vector<2x128xf32>, vector<16x128xf32>, vector<2x16xf32> -> vector<2x16xf32>
    %cst_130 = arith.constant 0.000000e+00 : f32
    %369 = vector.broadcast %cst_130 : f32 to vector<2x16xf32>
    %370 = arith.maximumf %368, %369 : vector<2x16xf32>
    %371 = vector.extract_strided_slice %349 {offsets = [16, 0], sizes = [16, 128], strides = [1, 1]} : vector<32x128xf32> to vector<16x128xf32>
    %cst_131 = arith.constant dense<0.000000e+00> : vector<2x128xf32>
    %372 = tpu.matmul %370, %371, %cst_131 {dimension_numbers = #tpu.dot_dimension_numbers<[1], [0], [0], [1], [0, 0, 1, 1], [], []>} : vector<2x16xf32>, vector<16x128xf32>, vector<2x128xf32> -> vector<2x128xf32>
    %373 = arith.negf %372 : vector<2x128xf32>
    %374 = math.exp %373 : vector<2x128xf32>
    %cst_132 = arith.constant 1.000000e+00 : f32
    %375 = vector.broadcast %cst_132 : f32 to vector<2x128xf32>
    %376 = arith.addf %375, %374 : vector<2x128xf32>
    %377 = arith.divf %375, %376 : vector<2x128xf32>
    %378 = vector.extract_strided_slice %347 {offsets = [0, 0], sizes = [8, 128], strides = [1, 1]} : vector<16x128xf32> to vector<8x128xf32>
    %379 = vector.extract_strided_slice %377 {offsets = [0, 0], sizes = [1, 128], strides = [1, 1]} : vector<2x128xf32> to vector<1x128xf32>
    %380 = vector.broadcast %379 : vector<1x128xf32> to vector<8x128xf32>
    %381 = arith.mulf %378, %380 : vector<8x128xf32>
    %382 = vector.extract_strided_slice %347 {offsets = [8, 0], sizes = [8, 128], strides = [1, 1]} : vector<16x128xf32> to vector<8x128xf32>
    %383 = vector.extract_strided_slice %377 {offsets = [1, 0], sizes = [1, 128], strides = [1, 1]} : vector<2x128xf32> to vector<1x128xf32>
    %384 = vector.broadcast %383 : vector<1x128xf32> to vector<8x128xf32>
    %385 = arith.mulf %382, %384 : vector<8x128xf32>
    %386 = tpu.concatenate %381, %385 in 0 : vector<8x128xf32>, vector<8x128xf32> -> vector<16x128xf32>
    %c12 = arith.constant 12 : index
    %c0_133 = arith.constant 0 : index
    %387 = vector.load %arg8[%c12, %c0_133] : memref<24x128xf32, #tpu.memory_space<vmem>>, vector<1x128xf32>
    %c13 = arith.constant 13 : index
    %c0_134 = arith.constant 0 : index
    %388 = vector.load %arg8[%c13, %c0_134] : memref<24x128xf32, #tpu.memory_space<vmem>>, vector<1x128xf32>
    %cst_135 = arith.constant dense<0.000000e+00> : vector<16xf32>
    %389 = vector.multi_reduction <add>, %386, %cst_135 [1] : vector<16x128xf32> to vector<16xf32>
    %390 = vector.shape_cast %389 : vector<16xf32> to vector<16x1xf32>
    %cst_136 = arith.constant 1.280000e+02 : f32
    %391 = vector.broadcast %cst_136 : f32 to vector<16x1xf32>
    %392 = arith.divf %390, %391 : vector<16x1xf32>
    %393 = vector.broadcast %392 : vector<16x1xf32> to vector<16x128xf32>
    %394 = arith.subf %386, %393 : vector<16x128xf32>
    %395 = arith.mulf %394, %394 : vector<16x128xf32>
    %cst_137 = arith.constant dense<0.000000e+00> : vector<16xf32>
    %396 = vector.multi_reduction <add>, %395, %cst_137 [1] : vector<16x128xf32> to vector<16xf32>
    %397 = vector.shape_cast %396 : vector<16xf32> to vector<16x1xf32>
    %cst_138 = arith.constant 1.280000e+02 : f32
    %398 = vector.broadcast %cst_138 : f32 to vector<16x1xf32>
    %399 = arith.divf %397, %398 : vector<16x1xf32>
    %400 = vector.broadcast %392 : vector<16x1xf32> to vector<16x128xf32>
    %401 = arith.subf %386, %400 : vector<16x128xf32>
    %cst_139 = arith.constant 9.99999974E-6 : f32
    %402 = vector.broadcast %cst_139 : f32 to vector<16x1xf32>
    %403 = arith.addf %399, %402 : vector<16x1xf32>
    %404 = math.rsqrt %403 : vector<16x1xf32>
    %405 = vector.broadcast %404 : vector<16x1xf32> to vector<16x128xf32>
    %406 = arith.mulf %401, %405 : vector<16x128xf32>
    %407 = vector.broadcast %387 : vector<1x128xf32> to vector<16x128xf32>
    %408 = arith.mulf %406, %407 : vector<16x128xf32>
    %409 = vector.broadcast %388 : vector<1x128xf32> to vector<16x128xf32>
    %410 = arith.addf %408, %409 : vector<16x128xf32>
    %411 = arith.truncf %410 : vector<16x128xf32> to vector<16x128xbf16>
    %cst_140 = arith.constant dense<0.000000e+00> : vector<16x1536xf32>
    %412 = tpu.matmul %411, %351, %cst_140 {dimension_numbers = #tpu.dot_dimension_numbers<[1], [0], [0], [1], [0, 0, 1, 1], [], []>} : vector<16x128xbf16>, vector<128x1536xbf16>, vector<16x1536xf32> -> vector<16x1536xf32>
    %413 = vector.extract_strided_slice %412 {offsets = [0, 0], sizes = [16, 128], strides = [1, 1]} : vector<16x1536xf32> to vector<16x128xf32>
    %414 = vector.extract_strided_slice %412 {offsets = [0, 128], sizes = [16, 128], strides = [1, 1]} : vector<16x1536xf32> to vector<16x128xf32>
    %415 = vector.extract_strided_slice %412 {offsets = [0, 256], sizes = [16, 128], strides = [1, 1]} : vector<16x1536xf32> to vector<16x128xf32>
    %416 = vector.extract_strided_slice %412 {offsets = [0, 384], sizes = [16, 128], strides = [1, 1]} : vector<16x1536xf32> to vector<16x128xf32>
    %417 = tpu.concatenate %413, %414, %415, %416 in 0 : vector<16x128xf32>, vector<16x128xf32>, vector<16x128xf32>, vector<16x128xf32> -> vector<64x128xf32>
    %418 = vector.extract_strided_slice %412 {offsets = [0, 512], sizes = [16, 128], strides = [1, 1]} : vector<16x1536xf32> to vector<16x128xf32>
    %419 = vector.extract_strided_slice %412 {offsets = [0, 640], sizes = [16, 128], strides = [1, 1]} : vector<16x1536xf32> to vector<16x128xf32>
    %420 = vector.extract_strided_slice %412 {offsets = [0, 768], sizes = [16, 128], strides = [1, 1]} : vector<16x1536xf32> to vector<16x128xf32>
    %421 = vector.extract_strided_slice %412 {offsets = [0, 896], sizes = [16, 128], strides = [1, 1]} : vector<16x1536xf32> to vector<16x128xf32>
    %422 = tpu.concatenate %418, %419, %420, %421 in 0 : vector<16x128xf32>, vector<16x128xf32>, vector<16x128xf32>, vector<16x128xf32> -> vector<64x128xf32>
    %423 = vector.extract_strided_slice %412 {offsets = [0, 1024], sizes = [16, 128], strides = [1, 1]} : vector<16x1536xf32> to vector<16x128xf32>
    %424 = vector.extract_strided_slice %412 {offsets = [0, 1152], sizes = [16, 128], strides = [1, 1]} : vector<16x1536xf32> to vector<16x128xf32>
    %425 = vector.extract_strided_slice %412 {offsets = [0, 1280], sizes = [16, 128], strides = [1, 1]} : vector<16x1536xf32> to vector<16x128xf32>
    %426 = vector.extract_strided_slice %412 {offsets = [0, 1408], sizes = [16, 128], strides = [1, 1]} : vector<16x1536xf32> to vector<16x128xf32>
    %427 = tpu.concatenate %423, %424, %425, %426 in 0 : vector<16x128xf32>, vector<16x128xf32>, vector<16x128xf32>, vector<16x128xf32> -> vector<64x128xf32>
    %cst_141 = arith.constant dense<0.000000e+00> : vector<64x64xf32>
    %428 = tpu.matmul %417, %422, %cst_141 {dimension_numbers = #tpu.dot_dimension_numbers<[1], [1], [0], [0], [0, 0, 1, 0], [], []>} : vector<64x128xf32>, vector<64x128xf32>, vector<64x64xf32> -> vector<64x64xf32>
    %cst_142 = arith.constant 1.250000e-01 : f32
    %429 = vector.broadcast %cst_142 : f32 to vector<64x64xf32>
    %430 = arith.mulf %428, %429 : vector<64x64xf32>
    %431 = arith.addf %430, %15 : vector<64x64xf32>
    %cst_143 = arith.constant dense<0xFF800000> : vector<64xf32>
    %432 = vector.multi_reduction <maximumf>, %431, %cst_143 [1] : vector<64x64xf32> to vector<64xf32>
    %433 = vector.shape_cast %432 : vector<64xf32> to vector<64x1xf32>
    %434 = vector.broadcast %433 : vector<64x1xf32> to vector<64x64xf32>
    %435 = arith.subf %431, %434 : vector<64x64xf32>
    %436 = math.exp %435 : vector<64x64xf32>
    %cst_144 = arith.constant dense<0.000000e+00> : vector<64xf32>
    %437 = vector.multi_reduction <add>, %436, %cst_144 [1] : vector<64x64xf32> to vector<64xf32>
    %438 = vector.shape_cast %437 : vector<64xf32> to vector<64x1xf32>
    %439 = tpu.reciprocal %438 {approx = true} : vector<64x1xf32> -> vector<64x1xf32>
    %440 = vector.broadcast %439 : vector<64x1xf32> to vector<64x64xf32>
    %441 = arith.mulf %436, %440 : vector<64x64xf32>
    %cst_145 = arith.constant dense<0.000000e+00> : vector<64x128xf32>
    %442 = tpu.matmul %441, %427, %cst_145 {dimension_numbers = #tpu.dot_dimension_numbers<[1], [0], [0], [1], [0, 0, 1, 1], [], []>} : vector<64x64xf32>, vector<64x128xf32>, vector<64x128xf32> -> vector<64x128xf32>
    %443 = vector.extract_strided_slice %442 {offsets = [0, 0], sizes = [16, 128], strides = [1, 1]} : vector<64x128xf32> to vector<16x128xf32>
    %444 = arith.truncf %443 : vector<16x128xf32> to vector<16x128xbf16>
    %445 = vector.extract_strided_slice %353 {offsets = [0, 0], sizes = [128, 128], strides = [1, 1]} : vector<512x128xbf16> to vector<128x128xbf16>
    %cst_146 = arith.constant dense<0.000000e+00> : vector<16x128xf32>
    %446 = tpu.matmul %444, %445, %cst_146 {dimension_numbers = #tpu.dot_dimension_numbers<[1], [0], [0], [1], [0, 0, 1, 1], [], []>} : vector<16x128xbf16>, vector<128x128xbf16>, vector<16x128xf32> -> vector<16x128xf32>
    %447 = arith.addf %386, %446 : vector<16x128xf32>
    %448 = vector.extract_strided_slice %442 {offsets = [16, 0], sizes = [16, 128], strides = [1, 1]} : vector<64x128xf32> to vector<16x128xf32>
    %449 = arith.truncf %448 : vector<16x128xf32> to vector<16x128xbf16>
    %450 = vector.extract_strided_slice %353 {offsets = [128, 0], sizes = [128, 128], strides = [1, 1]} : vector<512x128xbf16> to vector<128x128xbf16>
    %cst_147 = arith.constant dense<0.000000e+00> : vector<16x128xf32>
    %451 = tpu.matmul %449, %450, %cst_147 {dimension_numbers = #tpu.dot_dimension_numbers<[1], [0], [0], [1], [0, 0, 1, 1], [], []>} : vector<16x128xbf16>, vector<128x128xbf16>, vector<16x128xf32> -> vector<16x128xf32>
    %452 = arith.addf %447, %451 : vector<16x128xf32>
    %453 = vector.extract_strided_slice %442 {offsets = [32, 0], sizes = [16, 128], strides = [1, 1]} : vector<64x128xf32> to vector<16x128xf32>
    %454 = arith.truncf %453 : vector<16x128xf32> to vector<16x128xbf16>
    %455 = vector.extract_strided_slice %353 {offsets = [256, 0], sizes = [128, 128], strides = [1, 1]} : vector<512x128xbf16> to vector<128x128xbf16>
    %cst_148 = arith.constant dense<0.000000e+00> : vector<16x128xf32>
    %456 = tpu.matmul %454, %455, %cst_148 {dimension_numbers = #tpu.dot_dimension_numbers<[1], [0], [0], [1], [0, 0, 1, 1], [], []>} : vector<16x128xbf16>, vector<128x128xbf16>, vector<16x128xf32> -> vector<16x128xf32>
    %457 = arith.addf %452, %456 : vector<16x128xf32>
    %458 = vector.extract_strided_slice %442 {offsets = [48, 0], sizes = [16, 128], strides = [1, 1]} : vector<64x128xf32> to vector<16x128xf32>
    %459 = arith.truncf %458 : vector<16x128xf32> to vector<16x128xbf16>
    %460 = vector.extract_strided_slice %353 {offsets = [384, 0], sizes = [128, 128], strides = [1, 1]} : vector<512x128xbf16> to vector<128x128xbf16>
    %cst_149 = arith.constant dense<0.000000e+00> : vector<16x128xf32>
    %461 = tpu.matmul %459, %460, %cst_149 {dimension_numbers = #tpu.dot_dimension_numbers<[1], [0], [0], [1], [0, 0, 1, 1], [], []>} : vector<16x128xbf16>, vector<128x128xbf16>, vector<16x128xf32> -> vector<16x128xf32>
    %462 = arith.addf %457, %461 : vector<16x128xf32>
    %c14 = arith.constant 14 : index
    %c0_150 = arith.constant 0 : index
    %463 = vector.load %arg8[%c14, %c0_150] : memref<24x128xf32, #tpu.memory_space<vmem>>, vector<1x128xf32>
    %c15 = arith.constant 15 : index
    %c0_151 = arith.constant 0 : index
    %464 = vector.load %arg8[%c15, %c0_151] : memref<24x128xf32, #tpu.memory_space<vmem>>, vector<1x128xf32>
    %cst_152 = arith.constant dense<0.000000e+00> : vector<16xf32>
    %465 = vector.multi_reduction <add>, %462, %cst_152 [1] : vector<16x128xf32> to vector<16xf32>
    %466 = vector.shape_cast %465 : vector<16xf32> to vector<16x1xf32>
    %cst_153 = arith.constant 1.280000e+02 : f32
    %467 = vector.broadcast %cst_153 : f32 to vector<16x1xf32>
    %468 = arith.divf %466, %467 : vector<16x1xf32>
    %469 = vector.broadcast %468 : vector<16x1xf32> to vector<16x128xf32>
    %470 = arith.subf %462, %469 : vector<16x128xf32>
    %471 = arith.mulf %470, %470 : vector<16x128xf32>
    %cst_154 = arith.constant dense<0.000000e+00> : vector<16xf32>
    %472 = vector.multi_reduction <add>, %471, %cst_154 [1] : vector<16x128xf32> to vector<16xf32>
    %473 = vector.shape_cast %472 : vector<16xf32> to vector<16x1xf32>
    %cst_155 = arith.constant 1.280000e+02 : f32
    %474 = vector.broadcast %cst_155 : f32 to vector<16x1xf32>
    %475 = arith.divf %473, %474 : vector<16x1xf32>
    %476 = vector.broadcast %468 : vector<16x1xf32> to vector<16x128xf32>
    %477 = arith.subf %462, %476 : vector<16x128xf32>
    %cst_156 = arith.constant 9.99999974E-6 : f32
    %478 = vector.broadcast %cst_156 : f32 to vector<16x1xf32>
    %479 = arith.addf %475, %478 : vector<16x1xf32>
    %480 = math.rsqrt %479 : vector<16x1xf32>
    %481 = vector.broadcast %480 : vector<16x1xf32> to vector<16x128xf32>
    %482 = arith.mulf %477, %481 : vector<16x128xf32>
    %483 = vector.broadcast %463 : vector<1x128xf32> to vector<16x128xf32>
    %484 = arith.mulf %482, %483 : vector<16x128xf32>
    %485 = vector.broadcast %464 : vector<1x128xf32> to vector<16x128xf32>
    %486 = arith.addf %484, %485 : vector<16x128xf32>
    %487 = arith.truncf %486 : vector<16x128xf32> to vector<16x128xbf16>
    %488 = vector.extract_strided_slice %355 {offsets = [0, 0], sizes = [64, 128], strides = [1, 1]} : vector<128x128xbf16> to vector<64x128xbf16>
    %cst_157 = arith.constant dense<0.000000e+00> : vector<16x64xf32>
    %489 = tpu.matmul %487, %488, %cst_157 {dimension_numbers = #tpu.dot_dimension_numbers<[1], [1], [0], [0], [0, 0, 1, 0], [], []>} : vector<16x128xbf16>, vector<64x128xbf16>, vector<16x64xf32> -> vector<16x64xf32>
    %c16 = arith.constant 16 : index
    %c0_158 = arith.constant 0 : index
    %490 = vector.load %arg8[%c16, %c0_158] : memref<24x128xf32, #tpu.memory_space<vmem>>, vector<1x128xf32>
    %491 = vector.extract_strided_slice %490 {offsets = [0, 0], sizes = [1, 64], strides = [1, 1]} : vector<1x128xf32> to vector<1x64xf32>
    %492 = vector.broadcast %491 : vector<1x64xf32> to vector<16x64xf32>
    %493 = arith.addf %489, %492 : vector<16x64xf32>
    %cst_159 = arith.constant 5.000000e-01 : f32
    %494 = vector.broadcast %cst_159 : f32 to vector<16x64xf32>
    %495 = arith.mulf %494, %493 : vector<16x64xf32>
    %cst_160 = arith.constant 4.471500e-02 : f32
    %496 = vector.broadcast %cst_160 : f32 to vector<16x64xf32>
    %497 = arith.mulf %496, %493 : vector<16x64xf32>
    %498 = arith.mulf %497, %493 : vector<16x64xf32>
    %499 = arith.mulf %498, %493 : vector<16x64xf32>
    %500 = arith.addf %493, %499 : vector<16x64xf32>
    %cst_161 = arith.constant 0.797884583 : f32
    %501 = vector.broadcast %cst_161 : f32 to vector<16x64xf32>
    %502 = arith.mulf %501, %500 : vector<16x64xf32>
    %503 = math.tanh %502 : vector<16x64xf32>
    %cst_162 = arith.constant 1.000000e+00 : f32
    %504 = vector.broadcast %cst_162 : f32 to vector<16x64xf32>
    %505 = arith.addf %504, %503 : vector<16x64xf32>
    %506 = arith.mulf %495, %505 : vector<16x64xf32>
    %507 = arith.truncf %506 : vector<16x64xf32> to vector<16x64xbf16>
    %508 = vector.extract_strided_slice %355 {offsets = [64, 0], sizes = [64, 128], strides = [1, 1]} : vector<128x128xbf16> to vector<64x128xbf16>
    %cst_163 = arith.constant dense<0.000000e+00> : vector<16x128xf32>
    %509 = tpu.matmul %507, %508, %cst_163 {dimension_numbers = #tpu.dot_dimension_numbers<[1], [0], [0], [1], [0, 0, 1, 1], [], []>} : vector<16x64xbf16>, vector<64x128xbf16>, vector<16x128xf32> -> vector<16x128xf32>
    %c17 = arith.constant 17 : index
    %c0_164 = arith.constant 0 : index
    %510 = vector.load %arg8[%c17, %c0_164] : memref<24x128xf32, #tpu.memory_space<vmem>>, vector<1x128xf32>
    %511 = vector.broadcast %510 : vector<1x128xf32> to vector<16x128xf32>
    %512 = arith.addf %509, %511 : vector<16x128xf32>
    %513 = arith.addf %512, %462 : vector<16x128xf32>
    %514 = vector.extract_strided_slice %513 {offsets = [0, 0], sizes = [8, 128], strides = [1, 1]} : vector<16x128xf32> to vector<8x128xf32>
    %cst_165 = arith.constant dense<0.000000e+00> : vector<128xf32>
    %515 = vector.multi_reduction <add>, %514, %cst_165 [0] : vector<8x128xf32> to vector<128xf32>
    %516 = vector.shape_cast %515 : vector<128xf32> to vector<1x128xf32>
    %cst_166 = arith.constant 8.000000e+00 : f32
    %517 = vector.broadcast %cst_166 : f32 to vector<1x128xf32>
    %518 = arith.divf %516, %517 : vector<1x128xf32>
    %519 = vector.extract_strided_slice %513 {offsets = [8, 0], sizes = [8, 128], strides = [1, 1]} : vector<16x128xf32> to vector<8x128xf32>
    %cst_167 = arith.constant dense<0.000000e+00> : vector<128xf32>
    %520 = vector.multi_reduction <add>, %519, %cst_167 [0] : vector<8x128xf32> to vector<128xf32>
    %521 = vector.shape_cast %520 : vector<128xf32> to vector<1x128xf32>
    %cst_168 = arith.constant 8.000000e+00 : f32
    %522 = vector.broadcast %cst_168 : f32 to vector<1x128xf32>
    %523 = arith.divf %521, %522 : vector<1x128xf32>
    %524 = tpu.concatenate %518, %523 in 0 : vector<1x128xf32>, vector<1x128xf32> -> vector<2x128xf32>
    %c18 = arith.constant 18 : index
    %c0_169 = arith.constant 0 : index
    %525 = vector.load %arg8[%c18, %c0_169] : memref<24x128xf32, #tpu.memory_space<vmem>>, vector<1x128xf32>
    %c19 = arith.constant 19 : index
    %c0_170 = arith.constant 0 : index
    %526 = vector.load %arg8[%c19, %c0_170] : memref<24x128xf32, #tpu.memory_space<vmem>>, vector<1x128xf32>
    %cst_171 = arith.constant dense<0.000000e+00> : vector<2xf32>
    %527 = vector.multi_reduction <add>, %524, %cst_171 [1] : vector<2x128xf32> to vector<2xf32>
    %528 = vector.shape_cast %527 : vector<2xf32> to vector<2x1xf32>
    %cst_172 = arith.constant 1.280000e+02 : f32
    %529 = vector.broadcast %cst_172 : f32 to vector<2x1xf32>
    %530 = arith.divf %528, %529 : vector<2x1xf32>
    %531 = vector.broadcast %530 : vector<2x1xf32> to vector<2x128xf32>
    %532 = arith.subf %524, %531 : vector<2x128xf32>
    %533 = arith.mulf %532, %532 : vector<2x128xf32>
    %cst_173 = arith.constant dense<0.000000e+00> : vector<2xf32>
    %534 = vector.multi_reduction <add>, %533, %cst_173 [1] : vector<2x128xf32> to vector<2xf32>
    %535 = vector.shape_cast %534 : vector<2xf32> to vector<2x1xf32>
    %cst_174 = arith.constant 1.280000e+02 : f32
    %536 = vector.broadcast %cst_174 : f32 to vector<2x1xf32>
    %537 = arith.divf %535, %536 : vector<2x1xf32>
    %538 = vector.broadcast %530 : vector<2x1xf32> to vector<2x128xf32>
    %539 = arith.subf %524, %538 : vector<2x128xf32>
    %cst_175 = arith.constant 9.99999974E-6 : f32
    %540 = vector.broadcast %cst_175 : f32 to vector<2x1xf32>
    %541 = arith.addf %537, %540 : vector<2x1xf32>
    %542 = math.rsqrt %541 : vector<2x1xf32>
    %543 = vector.broadcast %542 : vector<2x1xf32> to vector<2x128xf32>
    %544 = arith.mulf %539, %543 : vector<2x128xf32>
    %545 = vector.broadcast %525 : vector<1x128xf32> to vector<2x128xf32>
    %546 = arith.mulf %544, %545 : vector<2x128xf32>
    %547 = vector.broadcast %526 : vector<1x128xf32> to vector<2x128xf32>
    %548 = arith.addf %546, %547 : vector<2x128xf32>
    %c20 = arith.constant 20 : index
    %c0_176 = arith.constant 0 : index
    %549 = vector.load %arg8[%c20, %c0_176] : memref<24x128xf32, #tpu.memory_space<vmem>>, vector<2x128xf32>
    %c22 = arith.constant 22 : index
    %c0_177 = arith.constant 0 : index
    %550 = vector.load %arg8[%c22, %c0_177] : memref<24x128xf32, #tpu.memory_space<vmem>>, vector<1x128xf32>
    %551 = vector.extract_strided_slice %550 {offsets = [0, 0], sizes = [1, 2], strides = [1, 1]} : vector<1x128xf32> to vector<1x2xf32>
    %cst_178 = arith.constant dense<0.000000e+00> : vector<2x2xf32>
    %552 = tpu.matmul %548, %549, %cst_178 {dimension_numbers = #tpu.dot_dimension_numbers<[1], [1], [0], [0], [0, 0, 1, 0], [], []>} : vector<2x128xf32>, vector<2x128xf32>, vector<2x2xf32> -> vector<2x2xf32>
    %553 = vector.broadcast %551 : vector<1x2xf32> to vector<2x2xf32>
    %554 = arith.addf %552, %553 : vector<2x2xf32>
    %c0_179 = arith.constant 0 : index
    %c0_180 = arith.constant 0 : index
    %555 = vector.load %arg9[%c0_179, %c0_180] : memref<2x2xf32, #tpu.memory_space<vmem>>, vector<2x2xf32>
    tpu.vector_store %arg9[%c0_179, %c0_180], %554 {strides = array<i32>} : memref<2x2xf32, #tpu.memory_space<vmem>>, vector<2x2xf32>,
    return
  }
  func.func @transform_0(%arg0: i32) -> (i32, i32) {
    %c0_i32 = arith.constant 0 : i32
    %c0_i32_0 = arith.constant 0 : i32
    %c0_i32_1 = arith.constant 0 : i32
    return %c0_i32, %c0_i32_0 : i32, i32
  }
  func.func @transform_1(%arg0: i32) -> (i32, i32) {
    %c0_i32 = arith.constant 0 : i32
    %c0_i32_0 = arith.constant 0 : i32
    %c0_i32_1 = arith.constant 0 : i32
    return %c0_i32, %c0_i32_0 : i32, i32
  }
  func.func @transform_2(%arg0: i32) -> (i32, i32) {
    %c0_i32 = arith.constant 0 : i32
    %c0_i32_0 = arith.constant 0 : i32
    %c0_i32_1 = arith.constant 0 : i32
    return %c0_i32, %c0_i32_0 : i32, i32
  }
  func.func @transform_3(%arg0: i32) -> (i32, i32, i32) {
    %c0_i32 = arith.constant 0 : i32
    %c0_i32_0 = arith.constant 0 : i32
    %c0_i32_1 = arith.constant 0 : i32
    %c0_i32_2 = arith.constant 0 : i32
    return %c0_i32, %c0_i32_0, %c0_i32_1 : i32, i32, i32
  }
  func.func @transform_4(%arg0: i32) -> (i32, i32, i32) {
    %c0_i32 = arith.constant 0 : i32
    %c0_i32_0 = arith.constant 0 : i32
    %c0_i32_1 = arith.constant 0 : i32
    %c0_i32_2 = arith.constant 0 : i32
    return %c0_i32, %c0_i32_0, %c0_i32_1 : i32, i32, i32
  }
  func.func @transform_5(%arg0: i32) -> (i32, i32, i32) {
    %c0_i32 = arith.constant 0 : i32
    %c0_i32_0 = arith.constant 0 : i32
    %c0_i32_1 = arith.constant 0 : i32
    %c0_i32_2 = arith.constant 0 : i32
    return %c0_i32, %c0_i32_0, %c0_i32_1 : i32, i32, i32
  }
  func.func @transform_6(%arg0: i32) -> (i32, i32, i32) {
    %c0_i32 = arith.constant 0 : i32
    %c0_i32_0 = arith.constant 0 : i32
    %c0_i32_1 = arith.constant 0 : i32
    %c0_i32_2 = arith.constant 0 : i32
    return %c0_i32, %c0_i32_0, %c0_i32_1 : i32, i32, i32
  }
  func.func @transform_7(%arg0: i32) -> (i32, i32) {
    %c0_i32 = arith.constant 0 : i32
    %c0_i32_0 = arith.constant 0 : i32
    %c0_i32_1 = arith.constant 0 : i32
    return %c0_i32, %c0_i32_0 : i32, i32
  }
  func.func @transform_8(%arg0: i32) -> (i32, i32) {
    %c0_i32 = arith.constant 0 : i32
    %c0_i32_0 = arith.constant 0 : i32
    %c0_i32_1 = arith.constant 0 : i32
    return %c0_i32, %c0_i32_0 : i32, i32
  }
}

</mosaic_0001>

<bundles_post_ra>
// kernel: forward.1
= control target key start
LH: loop header
LB: loop body
LE: loop exit
PB: predicated region body
PF: predicated region fallthrough
CT: control target
= control target key end

     0   :  { %v8825_v1 = vmov 0   ;;  %vm135_vm0 = vcmask 523264   ;;  %v8826_v20 = vmov 0.0   ;;  %vm8827_vm1 = vmmov 0   ;;  %s10796_s0 = inlined_call_operand.vmem [shape: f32[16,192], index: 0, kind: input, shape index: {}]   ;;  %s10797_s1 = inlined_call_operand.vmem [shape: f32[16,128], index: 1, kind: input, shape index: {}]   ;;  %s10798_s2 = inlined_call_operand.vmem [shape: bf16[192,128], index: 2, kind: input, shape index: {}]   ;;  %s10799_s3 = inlined_call_operand.vmem [shape: bf16[3,128,1536], index: 3, kind: input, shape index: {}]   ;;  %s10800_s4 = inlined_call_operand.vmem [shape: bf16[3,512,128], index: 4, kind: input, shape index: {}]   ;;  %s10801_s5 = inlined_call_operand.vmem [shape: bf16[3,128,128], index: 5, kind: input, shape index: {}]   ;;  %s10802_s6 = inlined_call_operand.vmem [shape: f32[3,32,128], index: 6, kind: input, shape index: {}]   ;;  %s10803_s7 = inlined_call_operand.vmem [shape: f32[24,128], index: 7, kind: input, shape index: {}]   ;;  %s10804_s8 = inlined_call_operand.hbm [shape: f32[2,2], index: 8, kind: output, shape index: {}]  }
   0x1   :  { %v8093_v0 = vld [vmem:[%s10798_s2 + $0x38] sm:$0xff]   ;;  %139 = vmatprep.subr.bf16.mxu0 %v8825_v1  ;;  %v8094_v2 = vld [vmem:[%s10798_s2 + $0x30] sm:$0xff]   ;;  %v8095_v3 = vld [vmem:[%s10798_s2 + $0x28] sm:$0xff]   ;;  %7561 = vmatprep.subr.mxu1 %v8826_v20 }
   0x2   :  { %140 = vmatpush1.bf16.msra.mxu0 %v8093_v0  ;;  %v8096_v4 = vld [vmem:[%s10798_s2 + $0x20] sm:$0xff]   ;;  %v32_v5 = vld [vmem:[%s10796_s0 + $0x8] sm:$0xff]  ;;  %v34_v6 = vld [vmem:[%s10796_s0 + $0x18] sm:$0xff]  ;;  %7565 = vmatprep.mubr.msk.f32.mxu1 %vm8827_vm1, %v8826_v20 }
   0x3   :  { %141 = vmatprep.subr.bf16.mxu0 %v8825_v1  ;;  %v8097_v7 = vld [vmem:[%s10798_s2 + $0x18] sm:$0xff]   ;;  %v36_v8 = vpack.c.bf16 %v34_v6, %v32_v5  ;;  %v8098_v9 = vld [vmem:[%s10798_s2 + $0x10] sm:$0xff]   ;;  %v8099_v10 = vld [vmem:[%s10798_s2 + $0x8] sm:$0xff]  }
   0x4   :  { %v8100_v11 = vld [vmem:[%s10798_s2] sm:$0xff]   ;;  %v8101_v12 = vld [vmem:[%s10798_s2 + $0x58] sm:$0xff]   ;;  %v8102_v13 = vld [vmem:[%s10798_s2 + $0x50] sm:$0xff]  }
   0x5   :  { %6484 = vmatprep.mubr.msk.bf16.mxu0 %vm135_vm0, %v36_v8  ;;  %v8103_v14 = vld [vmem:[%s10798_s2 + $0x48] sm:$0xff]   ;;  %v8104_v15 = vld [vmem:[%s10798_s2 + $0x40] sm:$0xff]   ;;  %v33_v17 = vld [vmem:[%s10796_s0 + $0x10] sm:$0xff] }
   0x6   :  { %142 = vmatpush1.bf16.msra.mxu0 %v8094_v2  ;;  %v31_v16 = vld [vmem:[%s10796_s0] sm:$0xff]  ;;  %v217_v19 = vld [vmem:[%s10802_s6 + $0x8] sm:$0xff] }
   0x7   :  { %143 = vmatprep.subr.bf16.mxu0 %v8825_v1  ;;  %v35_v18 = vpack.c.bf16 %v33_v17, %v31_v16  ;;  %v216_v21 = vld [vmem:[%s10802_s6] sm:$0xff]  ;;  %7562 = vmatpush3.xpose.msra.mxu1 %v217_v19 }
   0x8   :  { %7563 = vmatprep.subr.mxu1 %v8826_v20 }
   0xa   :  { %144 = vmatpush1.bf16.msra.mxu0 %v8095_v3 }
   0xb   :  { %145 = vmatprep.subr.bf16.mxu0 %v8825_v1  ;;  %7564 = vmatpush3.xpose.msra.mxu1 %v216_v21 }
   0xc   :  { %7568 = vmatprep.subr.mxu1 %v8826_v20 }
   0xe   :  { %146 = vmatpush1.bf16.msra.mxu0 %v8096_v4 }
   0xf   :  { %147 = vmatprep.subr.bf16.mxu0 %v8825_v1 }
  0x12   :  { %148 = vmatpush1.bf16.msra.mxu0 %v8097_v7 }
  0x13   :  { %149 = vmatprep.subr.bf16.mxu0 %v8825_v1 }
  0x16   :  { %150 = vmatpush1.bf16.msra.mxu0 %v8098_v9 }
  0x17   :  { %151 = vmatprep.subr.bf16.mxu0 %v8825_v1 }
  0x1a   :  { %152 = vmatpush1.bf16.msra.mxu0 %v8099_v10 }
  0x1b   :  { %153 = vmatprep.subr.bf16.mxu0 %v8825_v1 }
  0x1e   :  { %154 = vmatpush1.bf16.msra.mxu0 %v8100_v11 }
  0x1f   :  { %163 = vmatprep.subr.bf16.mxu0 %v8825_v1 }
  0x22   :  { %164 = vmatpush2.bf16.msra.mxu0 %v8101_v12 }
  0x23   :  { %165 = vmatprep.subr.bf16.mxu0 %v8825_v1 }
  0x26   :  { %166 = vmatpush2.bf16.msra.mxu0 %v8102_v13 }
  0x27   :  { %167 = vmatprep.subr.bf16.mxu0 %v8825_v1 }
  0x2a   :  { %168 = vmatpush2.bf16.msra.mxu0 %v8103_v14 }
  0x2b   :  { %169 = vmatprep.subr.bf16.mxu0 %v8825_v1 }
  0x2e   :  { %170 = vmatpush2.bf16.msra.mxu0 %v8104_v15 }
  0x31   :  { %172 = vmatmul.mubr.bf16.vlgmr.msra.gmra.mxu0 %v35_v18 }
  0x32   :  { %1210 = vmatprep.mubr.bf16.mxu0 %v8825_v1 }
  0x33   :  { %13 = vsyncpa [#allocation3], 0  ;;  %v61_v22 = vld [vmem:[%s10797_s1] sm:$0xff]  ;;  %v62_v26 = vld [vmem:[%s10797_s1 + $0x8] sm:$0xff]  ;;  %vm411_vm2 = vcmask 1040384   ;;  %vm484_vm3 = vcmask 130048   ;;  %v180_v55 = vlaneseq }
  0x34   :  { %v219_v44 = vld [vmem:[%s10802_s6 + $0x18] sm:$0xff]  ;;  %v218_v46 = vld [vmem:[%s10802_s6 + $0x10] sm:$0xff]  ;;  %vm6356_vm12 = vcmask 1041408   ;;  %s8829_s10 = smov [#allocation2]   ;;  %vm6456_vm13 = vcmask 9216  }
  0x35   :  { %v8967_v56 = vshrl.u32 %v180_v55, 7  ;;  %v8105_v0 = vld [vmem:[%s10799_s3 + $0x2a0] ss:$48 sps:$4 sm:$0xff]   ;;  %v8107_v2 = vld [vmem:[%s10799_s3 + $0x2a4] ss:$48 sps:$4 sm:$0xff]  }
  0x36   :  { %v8108_v3 = vld [vmem:[%s10799_s3 + $0x2b0] ss:$48 sps:$4 sm:$0xff]   ;;  %v8110_v4 = vld [vmem:[%s10799_s3 + $0x2b4] ss:$48 sps:$4 sm:$0xff]  }
  0x37   :  { %v8970_v57 = vsub.s32 0, %v8967_v56  ;;  %v8973_v58 = vsub.s32 1, %v8967_v56  ;;  %1178 = vmatprep.subr.bf16.mxu0 %v8110_v4  ;;  %v8113_v13 = vld [vmem:[%s10799_s3 + $0x244] ss:$48 sps:$4 sm:$0xff]   ;;  %v8111_v15 = vld [vmem:[%s10799_s3 + $0x240] ss:$48 sps:$4 sm:$0xff]  }
  0x38   :  { %1179 = vmatpush1.bf16.msra.mxu0 %v8108_v3  ;;  %v8116_v14 = vld [vmem:[%s10799_s3 + $0x254] ss:$48 sps:$4 sm:$0xff]   ;;  %v8114_v16 = vld [vmem:[%s10799_s3 + $0x250] ss:$48 sps:$4 sm:$0xff]   ;;  %v8153_v3 = vld [vmem:[%s10799_s3 + $0x2a8] ss:$48 sps:$4 sm:$0xff]  }
  0x39   :  { %1180 = vmatprep.subr.bf16.mxu0 %v8116_v14  ;;  %v8119_v17 = vld [vmem:[%s10799_s3 + $0x1e4] ss:$48 sps:$4 sm:$0xff]   ;;  %v8117_v19 = vld [vmem:[%s10799_s3 + $0x1e0] ss:$48 sps:$4 sm:$0xff]   ;;  %v8173_v14 = vld [vmem:[%s10799_s3 + $0x18c] ss:$48 sps:$4 sm:$0xff]  }
  0x3a   :  { %v8122_v18 = vld [vmem:[%s10799_s3 + $0x1f4] ss:$48 sps:$4 sm:$0xff]   ;;  %v8120_v21 = vld [vmem:[%s10799_s3 + $0x1f0] ss:$48 sps:$4 sm:$0xff]  }
  0x3b   :  { %v8156_v4 = vld [vmem:[%s10799_s3 + $0x2c0] ss:$48 sps:$4 sm:$0xff]  }
  0x3c   :  { %1181 = vmatpush1.bf16.msra.mxu0 %v8114_v16  ;;  %v8171_v16 = vld [vmem:[%s10799_s3 + $0x188] ss:$48 sps:$4 sm:$0xff]  }
  0x3d   :  { %1182 = vmatprep.subr.bf16.mxu0 %v8122_v18  ;;  %v8179_v18 = vld [vmem:[%s10799_s3 + $0x12c] ss:$48 sps:$4 sm:$0xff]  }
  0x40   :  { %1183 = vmatpush1.bf16.msra.mxu0 %v8120_v21  ;;  %v8177_v21 = vld [vmem:[%s10799_s3 + $0x128] ss:$48 sps:$4 sm:$0xff]  }
  0xf1   :  { %v173_v23 = vpop.f32.mrf.mxu0 }
  0xf2   :  { %v174_v24 = vadd.f32 %v173_v23, %v61_v22  ;;  %v8125_v22 = vld [vmem:[%s10799_s3 + $0x184] ss:$48 sps:$4 sm:$0xff]  }
  0xf3   :  { %v175_v25 = vpop.f32.mrf.mxu0  ;;  %v8128_v23 = vld [vmem:[%s10799_s3 + $0x194] ss:$48 sps:$4 sm:$0xff]  }
  0xf4   :  { %v396_v27 = vrot.slane %v174_v24, 4  ;;  %v8126_v25 = vld [vmem:[%s10799_s3 + $0x190] ss:$48 sps:$4 sm:$0xff]   ;;  %1184 = vmatprep.subr.bf16.mxu0 %v8128_v23  ;;  %v8185_v23 = vld [vmem:[%s10799_s3 + $0xcc] ss:$48 sps:$4 sm:$0xff]  }
  0xf5   :  { %v176_v28 = vpop.f32.mrf.mxu0  ;;  %1185 = vmatpush1.bf16.msra.mxu0 %v8126_v25  ;;  %v8183_v25 = vld [vmem:[%s10799_s3 + $0xc8] ss:$48 sps:$4 sm:$0xff]  }
  0xf6   :  { %v397_v29 = vadd.f32 %v396_v27, %v174_v24  ;;  %v177_v30 = vadd.f32 %v176_v28, %v62_v26  ;;  %v8131_v26 = vld [vmem:[%s10799_s3 + $0x124] ss:$48 sps:$4 sm:$0xff]   ;;  %v8129_v28 = vld [vmem:[%s10799_s3 + $0x120] ss:$48 sps:$4 sm:$0xff]  }
  0xf7   :  { %v178_v31 = vpop.f32.mrf.mxu0  ;;  %v8134_v27 = vld [vmem:[%s10799_s3 + $0x134] ss:$48 sps:$4 sm:$0xff]  }
  0xf8   :  { %v398_v32 = vrot.slane %v397_v29, 2  ;;  %v404_v33 = vrot.slane %v177_v30, 4  ;;  %1186 = vmatprep.subr.bf16.mxu0 %v8134_v27  ;;  %v8140_v31 = vld [vmem:[%s10799_s3 + $0xd4] ss:$48 sps:$4 sm:$0xff]   ;;  %v8191_v27 = vld [vmem:[%s10799_s3 + $0x6c] ss:$48 sps:$4 sm:$0xff]  }
  0xfa   :  { %v399_v34 = vadd.f32 %v398_v32, %v397_v29  ;;  %v405_v35 = vadd.f32 %v404_v33, %v177_v30  ;;  %v8132_v29 = vld [vmem:[%s10799_s3 + $0x130] ss:$48 sps:$4 sm:$0xff]  }
  0xfb   :  { %1187 = vmatpush1.bf16.msra.mxu0 %v8132_v29  ;;  %v8135_v32 = vld [vmem:[%s10799_s3 + $0xc0] ss:$48 sps:$4 sm:$0xff]   ;;  %v8189_v29 = vld [vmem:[%s10799_s3 + $0x68] ss:$48 sps:$4 sm:$0xff]  }
  0xfc   :  { %v406_v36 = vrot.slane %v405_v35, 2  ;;  %v400_v37 = vrot.slane %v399_v34, 1  ;;  %v8138_v33 = vld [vmem:[%s10799_s3 + $0xd0] ss:$48 sps:$4 sm:$0xff]   ;;  %1188 = vmatprep.subr.bf16.mxu0 %v8140_v31  ;;  %v8197_v31 = vld [vmem:[%s10799_s3 + $0xc] ss:$48 sps:$4 sm:$0xff]  }
  0xfe   :  { %v407_v38 = vadd.f32 %v406_v36, %v405_v35  ;;  %v401_v39 = vadd.f32 %v400_v37, %v399_v34  ;;  %v8143_v34 = vld [vmem:[%s10799_s3 + $0x64] ss:$48 sps:$4 sm:$0xff]   ;;  %v8141_v36 = vld [vmem:[%s10799_s3 + $0x60] ss:$48 sps:$4 sm:$0xff]  }
  0xff   :  { %1189 = vmatpush1.bf16.msra.mxu0 %v8138_v33  ;;  %v8146_v35 = vld [vmem:[%s10799_s3 + $0x74] ss:$48 sps:$4 sm:$0xff]   ;;  %v8144_v37 = vld [vmem:[%s10799_s3 + $0x70] ss:$48 sps:$4 sm:$0xff]   ;;  %v8195_v33 = vld [vmem:[%s10799_s3 + $0x8] ss:$48 sps:$4 sm:$0xff]  }
 0x100   :  { %v408_v40 = vrot.slane %v407_v38, 1  ;;  %v403_v42 = vmul.f32 0.125, %v401_v39  ;;  %1190 = vmatprep.subr.bf16.mxu0 %v8146_v35  ;;  %v8152_v39 = vld [vmem:[%s10799_s3 + $0x14] ss:$48 sps:$4 sm:$0xff]   ;;  %v8203_v35 = vld [vmem:[%s10799_s3 + $0x2bc] ss:$48 sps:$4 sm:$0xff]  }
 0x102   :  { %v409_v41 = vadd.f32 %v408_v40, %v407_v38  ;;  %v8149_v38 = vld [vmem:[%s10799_s3 + $0x4] ss:$48 sps:$4 sm:$0xff]   ;;  %v8147_v40 = vld [vmem:[%s10799_s3] ss:$48 sps:$4 sm:$0xff]  }
 0x103   :  { %1191 = vmatpush1.bf16.msra.mxu0 %v8144_v37  ;;  %v8206_v37 = vld [vmem:[%s10799_s3 + $0x25c] ss:$48 sps:$4 sm:$0xff]  }
 0x104   :  { %v410_v43 = vmul.f32 0.125, %v409_v41  ;;  %v8150_v41 = vld [vmem:[%s10799_s3 + $0x10] ss:$48 sps:$4 sm:$0xff]   ;;  %1192 = vmatprep.subr.bf16.mxu0 %v8152_v39  ;;  %v8209_v39 = vld [vmem:[%s10799_s3 + $0x1fc] ss:$48 sps:$4 sm:$0xff]  }
 0x106   :  { %v412_v45 = vsel %vm411_vm2, %v403_v42, %v410_v43  ;;  %v8155_v42 = vld [vmem:[%s10799_s3 + $0x2ac] ss:$48 sps:$4 sm:$0xff]   ;;  %v8158_v43 = vld [vmem:[%s10799_s3 + $0x2c4] ss:$48 sps:$4 sm:$0xff]  }
 0x107   :  { %7566 = vmatmul.mubr.f32.vlgmr.msra.gmra.mxu1 %v412_v45  ;;  %1193 = vmatpush1.bf16.msra.mxu0 %v8150_v41  ;;  %v8212_v41 = vld [vmem:[%s10799_s3 + $0x19c] ss:$48 sps:$4 sm:$0xff]  }
 0x108   :  { %7569 = vmatpush3.msra.mxu1 %v219_v44  ;;  %7572 = vmatprep.mubr.msk.f32.mxu1 %vm8827_vm1, %v8826_v20 }
 0x109   :  { %7570 = vmatprep.subr.mxu1 %v8826_v20  ;;  %1264 = vmatprep.subr.bf16.mxu0 %v8158_v43  ;;  %v8215_v43 = vld [vmem:[%s10799_s3 + $0x13c] ss:$48 sps:$4 sm:$0xff]  }
 0x10a   :  { %7571 = vmatpush3.msra.mxu1 %v218_v46 }
 0x10b   :  { %1092 = vmatprep.subr.bf16.mxu1 %v8107_v2 }
 0x1c7   :  { %v479_v47 = vpop.f32.mrf.mxu1 }
 0x1c8   :  { %v483_v48 = vmax.f32 %v479_v47, 0.0 }
 0x1c9   :  { %v7567_v49 = vpop.f32.mrf.mxu1 }
 0x1ca   :  { %7573 = vmatmul.mubr.msk.f32.vlgmr.msra.gmra.mxu1 %vm484_vm3, %v483_v48 }
 0x1cb   :  { %1124 = vmatprep.mubr.bf16.mxu1 %v8825_v1  ;;  %1093 = vmatpush1.bf16.msra.mxu1 %v8105_v0 }
 0x1cc   :  { %1094 = vmatprep.subr.bf16.mxu1 %v8113_v13  ;;  %v8168_v13 = vld [vmem:[%s10799_s3 + $0x200] ss:$48 sps:$4 sm:$0xff]  }
 0x1cf   :  { %1095 = vmatpush1.bf16.msra.mxu1 %v8111_v15  ;;  %v8176_v15 = vld [vmem:[%s10799_s3 + $0x1a4] ss:$48 sps:$4 sm:$0xff]  }
 0x1d0   :  { %1096 = vmatprep.subr.bf16.mxu1 %v8119_v17  ;;  %v8174_v17 = vld [vmem:[%s10799_s3 + $0x1a0] ss:$48 sps:$4 sm:$0xff]  }
 0x1d3   :  { %1097 = vmatpush1.bf16.msra.mxu1 %v8117_v19  ;;  %v8182_v19 = vld [vmem:[%s10799_s3 + $0x144] ss:$48 sps:$4 sm:$0xff]  }
 0x1d4   :  { %1098 = vmatprep.subr.bf16.mxu1 %v8125_v22  ;;  %v8180_v22 = vld [vmem:[%s10799_s3 + $0x140] ss:$48 sps:$4 sm:$0xff]  }
 0x28a   :  { %v554_v50 = vpop.f32.mrf.mxu1 }
 0x28b   :  { %v6486_v51 = vmul.f32 -1.442695, %v554_v50 }
 0x28c   :  { %v7574_v52 = vpop.f32.mrf.mxu1 }
 0x28d   :  { %8657 = vpow2.f32 %v6486_v51  ;;  %v6487_v52 = vld [vmem:[%s10803_s7] ss:$0 sm:$0xff] }
 0x29a   :  { %v8658_v53 = vpop.eup %8657 }
 0x29b   :  { %v561_v54 = vadd.f32 1.0, %v8658_v53 }
 0x29d   :  { %8659 = vrcp.f32 %v561_v54 }
 0x2aa   :  { %v8660_v59 = vpop.eup %8659 }
 0x2ab   :  { %v567_v60 = vrot.slane %v8660_v59, %v8970_v57  ;;  %v572_v62 = vrot.slane %v8660_v59, %v8973_v58 }
 0x2ad   :  { %v8976_v61 = vmul.f32 %v567_v60, %v174_v24  ;;  %v8980_v63 = vmul.f32 %v572_v62, %v177_v30  ;;  %v8123_v24 = vld [vmem:[%s10799_s3 + $0x180] ss:$48 sps:$4 sm:$0xff]   ;;  %v8137_v30 = vld [vmem:[%s10799_s3 + $0xc4] ss:$48 sps:$4 sm:$0xff]  }
 0x2ae   :  { %1099 = vmatpush1.bf16.msra.mxu1 %v8123_v24  ;;  %v6488_v60 = vld [vmem:[%s10803_s7 + $0x1] ss:$0 sm:$0xff]  ;;  %v8188_v24 = vld [vmem:[%s10799_s3 + $0xe4] ss:$48 sps:$4 sm:$0xff]  }
 0x2af   :  { %576 = vadd.xlane.f32.xlu0 %v8976_v61  ;;  %1100 = vmatprep.subr.bf16.mxu1 %v8131_v26  ;;  %v8186_v26 = vld [vmem:[%s10799_s3 + $0xe0] ss:$48 sps:$4 sm:$0xff]  }
 0x2b2   :  { %1101 = vmatpush1.bf16.msra.mxu1 %v8129_v28  ;;  %v8194_v28 = vld [vmem:[%s10799_s3 + $0x84] ss:$48 sps:$4 sm:$0xff]  }
 0x2b3   :  { %578 = vadd.xlane.f32.xlu0 %v8980_v63  ;;  %1102 = vmatprep.subr.bf16.mxu1 %v8137_v30  ;;  %v8192_v30 = vld [vmem:[%s10799_s3 + $0x80] ss:$48 sps:$4 sm:$0xff]  }
 0x2b6   :  { %1103 = vmatpush1.bf16.msra.mxu1 %v8135_v32  ;;  %v8200_v32 = vld [vmem:[%s10799_s3 + $0x24] ss:$48 sps:$4 sm:$0xff]  }
 0x2b7   :  { %1104 = vmatprep.subr.bf16.mxu1 %v8143_v34  ;;  %v8198_v34 = vld [vmem:[%s10799_s3 + $0x20] ss:$48 sps:$4 sm:$0xff]  }
 0x2ba   :  { %1105 = vmatpush1.bf16.msra.mxu1 %v8141_v36  ;;  %v8201_v36 = vld [vmem:[%s10799_s3 + $0x2b8] ss:$48 sps:$4 sm:$0xff]  }
 0x2bb   :  { %1106 = vmatprep.subr.bf16.mxu1 %v8149_v38  ;;  %v8204_v38 = vld [vmem:[%s10799_s3 + $0x258] ss:$48 sps:$4 sm:$0xff]  }
 0x2be   :  { %1107 = vmatpush1.bf16.msra.mxu1 %v8147_v40  ;;  %v8207_v40 = vld [vmem:[%s10799_s3 + $0x1f8] ss:$48 sps:$4 sm:$0xff]  }
 0x2bf   :  { %1135 = vmatprep.subr.bf16.mxu1 %v8155_v42  ;;  %v8210_v42 = vld [vmem:[%s10799_s3 + $0x198] ss:$48 sps:$4 sm:$0xff]  }
 0x338   :  { %v577_v5 = vpop.xlane.xlu0 %576 }
 0x339   :  { %v581_v6 = vmul.f32 0.0078125, %v577_v5 }
 0x33b   :  { %v8996_v7 = vsub.f32 %v8976_v61, %v581_v6  ;;  %v8161_v6 = vld [vmem:[%s10799_s3 + $0x24c] ss:$48 sps:$4 sm:$0xff]  }
 0x33c   :  { %v579_v8 = vpop.xlane.xlu0 %578 }
 0x33d   :  { %v582_v9 = vmul.f32 0.0078125, %v579_v8  ;;  %v585_v10 = vmul.f32 %v8996_v7, %v8996_v7  ;;  %v8159_v8 = vld [vmem:[%s10799_s3 + $0x248] ss:$48 sps:$4 sm:$0xff]  }
 0x33f   :  { %v9001_v11 = vsub.f32 %v8980_v63, %v582_v9  ;;  %587 = vadd.xlane.f32.xlu1 %v585_v10  ;;  %v8162_v9 = vld [vmem:[%s10799_s3 + $0x260] ss:$48 sps:$4 sm:$0xff]   ;;  %v8167_v10 = vld [vmem:[%s10799_s3 + $0x1ec] ss:$48 sps:$4 sm:$0xff]  }
 0x341   :  { %v586_v12 = vmul.f32 %v9001_v11, %v9001_v11 }
 0x343   :  { %589 = vadd.xlane.f32.xlu1 %v586_v12  ;;  %v8165_v12 = vld [vmem:[%s10799_s3 + $0x1e8] ss:$48 sps:$4 sm:$0xff]  }
 0x3c8   :  { %v588_v44 = vpop.xlane.xlu1 %587 }
 0x3c9   :  { %v591_v45 = vmul.f32 0.0078125, %v588_v44  ;;  %v8213_v44 = vld [vmem:[%s10799_s3 + $0x138] ss:$48 sps:$4 sm:$0xff]  }
 0x3cb   :  { %v593_v46 = vadd.f32 1e-05, %v591_v45  ;;  %v8218_v45 = vld [vmem:[%s10799_s3 + $0xdc] ss:$48 sps:$4 sm:$0xff]  }
 0x3cc   :  { %v590_v47 = vpop.xlane.xlu1 %589 }
 0x3cd   :  { %8661 = vrsqrt.f32 %v593_v46  ;;  %v592_v48 = vmul.f32 0.0078125, %v590_v47  ;;  %v8216_v46 = vld [vmem:[%s10799_s3 + $0xd8] ss:$48 sps:$4 sm:$0xff]   ;;  %v8221_v47 = vld [vmem:[%s10799_s3 + $0x7c] ss:$48 sps:$4 sm:$0xff]  }
 0x3cf   :  { %v594_v49 = vadd.f32 1e-05, %v592_v48  ;;  %v8219_v48 = vld [vmem:[%s10799_s3 + $0x78] ss:$48 sps:$4 sm:$0xff]  }
 0x3d1   :  { %8663 = vrsqrt.f32 %v594_v49  ;;  %v8224_v49 = vld [vmem:[%s10799_s3 + $0x1c] ss:$48 sps:$4 sm:$0xff]  }
 0x3da   :  { %v8662_v50 = vpop.eup %8661 }
 0x3db   :  { %v597_v51 = vmul.f32 %v8662_v50, %v8996_v7  ;;  %v8164_v7 = vld [vmem:[%s10799_s3 + $0x264] ss:$48 sps:$4 sm:$0xff]   ;;  %v8222_v50 = vld [vmem:[%s10799_s3 + $0x18] ss:$48 sps:$4 sm:$0xff]  }
 0x3dd   :  { %v603_v54 = vmul.f32 %v6487_v52, %v597_v51  ;;  %v8227_v51 = vld [vmem:[%s10799_s3 + $0x2cc] ss:$48 sps:$4 sm:$0xff]  }
 0x3de   :  { %v8664_v53 = vpop.eup %8663 }
 0x3df   :  { %v598_v59 = vmul.f32 %v8664_v53, %v9001_v11  ;;  %v609_v0 = vadd.f32 %v6488_v60, %v603_v54  ;;  %v8170_v11 = vld [vmem:[%s10799_s3 + $0x204] ss:$48 sps:$4 sm:$0xff]   ;;  %v8230_v53 = vld [vmem:[%s10799_s3 + $0x26c] ss:$48 sps:$4 sm:$0xff]   ;;  %v8228_v54 = vld [vmem:[%s10799_s3 + $0x268] ss:$48 sps:$4 sm:$0xff]  }
 0x3e1   :  { %v604_v62 = vmul.f32 %v6487_v52, %v598_v59  ;;  %v8225_v52 = vld [vmem:[%s10799_s3 + $0x2c8] ss:$48 sps:$4 sm:$0xff]   ;;  %v8233_v59 = vld [vmem:[%s10799_s3 + $0x20c] ss:$48 sps:$4 sm:$0xff]  }
 0x3e3   :  { %v610_v2 = vadd.f32 %v6488_v60, %v604_v62  ;;  %v8231_v60 = vld [vmem:[%s10799_s3 + $0x208] ss:$48 sps:$4 sm:$0xff]   ;;  %v8236_v62 = vld [vmem:[%s10799_s3 + $0x1ac] ss:$48 sps:$4 sm:$0xff]  }
 0x3e5   :  { %v9109_v5 = vpack.c.bf16 %v610_v2, %v609_v0  ;;  %v8234_v0 = vld [vmem:[%s10799_s3 + $0x1a8] ss:$48 sps:$4 sm:$0xff]   ;;  %v8239_v2 = vld [vmem:[%s10799_s3 + $0x14c] ss:$48 sps:$4 sm:$0xff]  }
 0x3e7   :  { %1125 = vmatmul.mubr.bf16.vlgmr.msra.gmra.mxu1 %v9109_v5  ;;  %1211 = vmatmul.mubr.bf16.vlgmr.msra.gmra.mxu0 %v9109_v5 }
 0x3e8   :  { %1136 = vmatpush1.bf16.msra.mxu1 %v8153_v3  ;;  %1265 = vmatpush1.bf16.msra.mxu0 %v8156_v4  ;;  %v8237_v3 = vld [vmem:[%s10799_s3 + $0x148] ss:$48 sps:$4 sm:$0xff]   ;;  %v8242_v4 = vld [vmem:[%s10799_s3 + $0xec] ss:$48 sps:$4 sm:$0xff]  }
 0x3e9   :  { %1137 = vmatprep.subr.bf16.mxu1 %v8161_v6  ;;  %1266 = vmatprep.subr.bf16.mxu0 %v8164_v7  ;;  %v8240_v6 = vld [vmem:[%s10799_s3 + $0xe8] ss:$48 sps:$4 sm:$0xff]   ;;  %v8245_v7 = vld [vmem:[%s10799_s3 + $0x8c] ss:$48 sps:$4 sm:$0xff]  }
 0x3ea   :  { %1167 = vmatprep.mubr.bf16.mxu1 %v8825_v1  ;;  %1296 = vmatprep.mubr.bf16.mxu0 %v8825_v1 }
 0x3ec   :  { %1138 = vmatpush1.bf16.msra.mxu1 %v8159_v8  ;;  %1267 = vmatpush1.bf16.msra.mxu0 %v8162_v9  ;;  %v8243_v8 = vld [vmem:[%s10799_s3 + $0x88] ss:$48 sps:$4 sm:$0xff]   ;;  %v8248_v9 = vld [vmem:[%s10799_s3 + $0x2c] ss:$48 sps:$4 sm:$0xff]  }
 0x3ed   :  { %1139 = vmatprep.subr.bf16.mxu1 %v8167_v10  ;;  %1268 = vmatprep.subr.bf16.mxu0 %v8170_v11  ;;  %v8246_v10 = vld [vmem:[%s10799_s3 + $0x28] ss:$48 sps:$4 sm:$0xff]  }
 0x3f0   :  { %1140 = vmatpush1.bf16.msra.mxu1 %v8165_v12  ;;  %1269 = vmatpush1.bf16.msra.mxu0 %v8168_v13 }
 0x3f1   :  { %1141 = vmatprep.subr.bf16.mxu1 %v8173_v14  ;;  %1270 = vmatprep.subr.bf16.mxu0 %v8176_v15 }
 0x3f4   :  { %1142 = vmatpush1.bf16.msra.mxu1 %v8171_v16  ;;  %1271 = vmatpush1.bf16.msra.mxu0 %v8174_v17 }
 0x3f5   :  { %1143 = vmatprep.subr.bf16.mxu1 %v8179_v18  ;;  %1272 = vmatprep.subr.bf16.mxu0 %v8182_v19 }
 0x3f8   :  { %1144 = vmatpush1.bf16.msra.mxu1 %v8177_v21  ;;  %1273 = vmatpush1.bf16.msra.mxu0 %v8180_v22 }
 0x3f9   :  { %1145 = vmatprep.subr.bf16.mxu1 %v8185_v23  ;;  %1274 = vmatprep.subr.bf16.mxu0 %v8188_v24 }
 0x3fc   :  { %1146 = vmatpush1.bf16.msra.mxu1 %v8183_v25  ;;  %1275 = vmatpush1.bf16.msra.mxu0 %v8186_v26 }
 0x3fd   :  { %1147 = vmatprep.subr.bf16.mxu1 %v8191_v27  ;;  %1276 = vmatprep.subr.bf16.mxu0 %v8194_v28 }
 0x400   :  { %1148 = vmatpush1.bf16.msra.mxu1 %v8189_v29  ;;  %1277 = vmatpush1.bf16.msra.mxu0 %v8192_v30 }
 0x401   :  { %1149 = vmatprep.subr.bf16.mxu1 %v8197_v31  ;;  %1278 = vmatprep.subr.bf16.mxu0 %v8200_v32 }
 0x404   :  { %1150 = vmatpush1.bf16.msra.mxu1 %v8195_v33  ;;  %1279 = vmatpush1.bf16.msra.mxu0 %v8198_v34 }
 0x405   :  { %1221 = vmatprep.subr.bf16.mxu1 %v8203_v35  ;;  %v182_v35 = vadd.s32 8, %v8967_v56 }
 0x407   :  { %1168 = vmatmul.mubr.bf16.vlgmr.msra.gmra.mxu1 %v9109_v5  ;;  %1297 = vmatmul.mubr.bf16.vlgmr.msra.gmra.mxu0 %v9109_v5 }
 0x408   :  { %1222 = vmatpush1.bf16.msra.mxu1 %v8201_v36  ;;  %1253 = vmatprep.mubr.bf16.mxu1 %v8825_v1  ;;  %v190_v36 = vand.u32 127, %v180_v55 }
 0x409   :  { %1223 = vmatprep.subr.bf16.mxu1 %v8206_v37  ;;  %v192_v37 = vshra.s32 %v182_v35, 3 }
 0x40c   :  { %1224 = vmatpush1.bf16.msra.mxu1 %v8204_v38  ;;  %v199_v38 = vshra.s32 %v190_v36, 3 }
 0x40d   :  { %1225 = vmatprep.subr.bf16.mxu1 %v8209_v39  ;;  %v184_v39 = vadd.s32 24, %v8967_v56 }
 0x40e   :  { %vm201_vm4 = vcmp.eq.s32.totalorder %v192_v37, %v199_v38 }
 0x410   :  { %1226 = vmatpush1.bf16.msra.mxu1 %v8207_v40  ;;  %v191_v40 = vshra.s32 %v8967_v56, 3 }
 0x411   :  { %1227 = vmatprep.subr.bf16.mxu1 %v8212_v41  ;;  %v183_v41 = vadd.s32 16, %v8967_v56 }
 0x412   :  { %vm200_vm5 = vcmp.eq.s32.totalorder %v191_v40, %v199_v38 }
 0x414   :  { %1228 = vmatpush1.bf16.msra.mxu1 %v8210_v42  ;;  %v186_v42 = vadd.s32 40, %v8967_v56 }
 0x415   :  { %1229 = vmatprep.subr.bf16.mxu1 %v8215_v43  ;;  %v194_v43 = vshra.s32 %v184_v39, 3 }
 0x416   :  { %v196_v55 = vshra.s32 %v186_v42, 3 }
 0x417   :  { %vm203_vm6 = vcmp.eq.s32.totalorder %v194_v43, %v199_v38 }
 0x418   :  { %1230 = vmatpush1.bf16.msra.mxu1 %v8213_v44  ;;  %v185_v44 = vadd.s32 32, %v8967_v56  ;;  %vm205_vm8 = vcmp.eq.s32.totalorder %v196_v55, %v199_v38 }
 0x419   :  { %1231 = vmatprep.subr.bf16.mxu1 %v8218_v45  ;;  %v193_v45 = vshra.s32 %v183_v41, 3 }
 0x41b   :  { %vm202_vm7 = vcmp.eq.s32.totalorder %v193_v45, %v199_v38 }
 0x41c   :  { %1232 = vmatpush1.bf16.msra.mxu1 %v8216_v46 }
 0x41d   :  { %1233 = vmatprep.subr.bf16.mxu1 %v8221_v47  ;;  %v8828_v47 = vmov -1e+30  }
 0x420   :  { %1234 = vmatpush1.bf16.msra.mxu1 %v8219_v48  ;;  %v9312_v48 = vsel %vm201_vm4, 0.0, %v8828_v47 }
 0x421   :  { %1235 = vmatprep.subr.bf16.mxu1 %v8224_v49 }
 0x424   :  { %1236 = vmatpush1.bf16.msra.mxu1 %v8222_v50  ;;  %v188_v50 = vadd.s32 56, %v8967_v56 }
 0x425   :  { %1307 = vmatprep.subr.bf16.mxu1 %v8227_v51 }
 0x427   :  { %1254 = vmatmul.mubr.bf16.vlgmr.msra.gmra.mxu1 %v9109_v5 }
 0x428   :  { %1308 = vmatpush1.bf16.msra.mxu1 %v8225_v52  ;;  %1339 = vmatprep.mubr.bf16.mxu1 %v8825_v1  ;;  %v9315_v52 = vsel %vm200_vm5, 0.0, %v8828_v47 }
 0x429   :  { %1309 = vmatprep.subr.bf16.mxu1 %v8230_v53  ;;  %v195_v53 = vshra.s32 %v185_v44, 3 }
 0x42b   :  { %vm204_vm9 = vcmp.eq.s32.totalorder %v195_v53, %v199_v38 }
 0x42c   :  { %1310 = vmatpush1.bf16.msra.mxu1 %v8228_v54 }
 0x42d   :  { %1311 = vmatprep.subr.bf16.mxu1 %v8233_v59 }
 0x430   :  { %1312 = vmatpush1.bf16.msra.mxu1 %v8231_v60  ;;  %v187_v60 = vadd.s32 48, %v8967_v56 }
 0x431   :  { %1313 = vmatprep.subr.bf16.mxu1 %v8236_v62 }
 0x434   :  { %1314 = vmatpush1.bf16.msra.mxu1 %v8234_v0  ;;  %v9319_v0 = vsel %vm203_vm6, 0.0, %v8828_v47 }
 0x435   :  { %1315 = vmatprep.subr.bf16.mxu1 %v8239_v2 }
 0x438   :  { %1316 = vmatpush1.bf16.msra.mxu1 %v8237_v3 }
 0x439   :  { %1317 = vmatprep.subr.bf16.mxu1 %v8242_v4 }
 0x43c   :  { %1318 = vmatpush1.bf16.msra.mxu1 %v8240_v6  ;;  %v198_v6 = vshra.s32 %v188_v50, 3 }
 0x43d   :  { %1319 = vmatprep.subr.bf16.mxu1 %v8245_v7 }
 0x43e   :  { %vm207_vm10 = vcmp.eq.s32.totalorder %v198_v6, %v199_v38 }
 0x440   :  { %1320 = vmatpush1.bf16.msra.mxu1 %v8243_v8  ;;  %v9323_v8 = vsel %vm202_vm7, 0.0, %v8828_v47 }
 0x441   :  { %1321 = vmatprep.subr.bf16.mxu1 %v8248_v9 }
 0x444   :  { %1322 = vmatpush1.bf16.msra.mxu1 %v8246_v10 }
 0x447   :  { %1340 = vmatmul.mubr.bf16.vlgmr.msra.gmra.mxu1 %v9109_v5 }
 0x4a7   :  { %v1126_v11 = vpop.f32.mrf.mxu1  ;;  %v1212_v24 = vpop.f32.mrf.mxu0 }
 0x4a8   :  { %7591 = vmatprep.mubr.f32.mxu0 %v1126_v11  ;;  %v197_v11 = vshra.s32 %v187_v60, 3 }
 0x4a9   :  { %v1128_v12 = vpop.f32.mrf.mxu1  ;;  %v1214_v25 = vpop.f32.mrf.mxu0 }
 0x4aa   :  { %vm206_vm11 = vcmp.eq.s32.totalorder %v197_v11, %v199_v38 }
 0x4ab   :  { %v1130_v13 = vpop.f32.mrf.mxu1  ;;  %v1216_v5 = vpop.f32.mrf.mxu0 }
 0x4ad   :  { %v1132_v14 = vpop.f32.mrf.mxu1  ;;  %v1218_v26 = vpop.f32.mrf.mxu0 }
 0x4c7   :  { %v1169_v15 = vpop.f32.mrf.mxu1  ;;  %v1298_v28 = vpop.f32.mrf.mxu0 }
 0x4c9   :  { %v1171_v16 = vpop.f32.mrf.mxu1  ;;  %v1300_v31 = vpop.f32.mrf.mxu0 }
 0x4cb   :  { %v1173_v17 = vpop.f32.mrf.mxu1  ;;  %v1302_v33 = vpop.f32.mrf.mxu0 }
 0x4cd   :  { %v1175_v18 = vpop.f32.mrf.mxu1  ;;  %v1304_v34 = vpop.f32.mrf.mxu0 }
 0x4e7   :  { %v1255_v19 = vpop.f32.mrf.mxu1 }
 0x4e9   :  { %v1257_v21 = vpop.f32.mrf.mxu1 }
 0x4eb   :  { %v1259_v22 = vpop.f32.mrf.mxu1 }
 0x4ed   :  { %v1261_v23 = vpop.f32.mrf.mxu1 }
 0x4ee   :  { %7575 = vmatprep.subr.mxu0 %v1261_v23 }
 0x4ef   :  { %7576 = vmatpush3.xpose.msra.mxu0 %v1261_v23 }
 0x4f0   :  { %7577 = vmatprep.subr.mxu0 %v1257_v21 }
 0x4f3   :  { %7578 = vmatpush3.xpose.msra.mxu0 %v1257_v21 }
 0x4f4   :  { %7579 = vmatprep.subr.mxu0 %v1259_v22 }
 0x4f7   :  { %7580 = vmatpush3.xpose.msra.mxu0 %v1259_v22 }
 0x4f8   :  { %7581 = vmatprep.subr.mxu0 %v1255_v19 }
 0x4fb   :  { %7582 = vmatpush3.xpose.msra.mxu0 %v1255_v19 }
 0x4fc   :  { %7583 = vmatprep.subr.mxu0 %v1218_v26 }
 0x4ff   :  { %7584 = vmatpush3.xpose.msra.mxu0 %v1218_v26 }
 0x500   :  { %7585 = vmatprep.subr.mxu0 %v1214_v25 }
 0x503   :  { %7586 = vmatpush3.xpose.msra.mxu0 %v1214_v25 }
 0x504   :  { %7587 = vmatprep.subr.mxu0 %v1216_v5 }
 0x507   :  { %v1341_v27 = vpop.f32.mrf.mxu1  ;;  %7588 = vmatpush3.xpose.msra.mxu0 %v1216_v5 }
 0x508   :  { %7589 = vmatprep.subr.mxu0 %v1212_v24 }
 0x509   :  { %v1343_v29 = vpop.f32.mrf.mxu1 }
 0x50b   :  { %v1345_v30 = vpop.f32.mrf.mxu1  ;;  %7590 = vmatpush3.xpose.msra.mxu0 %v1212_v24  ;;  %v9335_v24 = vsel %vm207_vm10, 0.0, %v8828_v47 }
 0x50c   :  { %7631 = vmatprep.subr.bf16.mxu0 %v8826_v20 }
 0x50d   :  { %v1347_v32 = vpop.f32.mrf.mxu1 }
 0x50e   :  { %7592 = vmatmul.mubr.f32.vlgmr.msra.gmra.mxu0 %v1130_v13  ;;  %7603 = vmatprep.subr.mxu1 %v1347_v32  ;;  %v9327_v13 = vsel %vm205_vm8, 0.0, %v8828_v47 }
 0x50f   :  { %7594 = vmatprep.mubr.f32.mxu0 %v1128_v12  ;;  %7604 = vmatpush3.msra.mxu1 %v1347_v32 }
 0x510   :  { %7605 = vmatprep.subr.mxu1 %v1343_v29 }
 0x511   :  { %7606 = vmatpush3.msra.mxu1 %v1343_v29 }
 0x512   :  { %7595 = vmatmul.mubr.f32.gmra.mxu0 %v1132_v14  ;;  %7607 = vmatprep.subr.mxu1 %v1345_v30 }
 0x513   :  { %7597 = vmatprep.mubr.f32.mxu0 %v1169_v15  ;;  %7608 = vmatpush3.msra.mxu1 %v1345_v30 }
 0x514   :  { %7609 = vmatprep.subr.mxu1 %v1341_v27 }
 0x515   :  { %7610 = vmatpush3.msra.mxu1 %v1341_v27 }
 0x516   :  { %7598 = vmatmul.mubr.f32.gmra.mxu0 %v1173_v17  ;;  %7611 = vmatprep.subr.mxu1 %v1304_v34 }
 0x517   :  { %7600 = vmatprep.mubr.f32.mxu0 %v1171_v16  ;;  %7612 = vmatpush3.msra.mxu1 %v1304_v34 }
 0x518   :  { %7613 = vmatprep.subr.mxu1 %v1300_v31 }
 0x519   :  { %7614 = vmatpush3.msra.mxu1 %v1300_v31 }
 0x51a   :  { %7601 = vmatmul.mubr.f32.gmra.mxu0 %v1175_v18  ;;  %7615 = vmatprep.subr.mxu1 %v1302_v33  ;;  %v9331_v18 = vsel %vm204_vm9, 0.0, %v8828_v47 }
 0x51b   :  { %7616 = vmatpush3.msra.mxu1 %v1302_v33  ;;  %7647 = vmatprep.mubr.msk.bf16.mxu0 %vm8827_vm1, %v8826_v20 }
 0x51c   :  { %7617 = vmatprep.subr.mxu1 %v1298_v28 }
 0x51d   :  { %7618 = vmatpush3.msra.mxu1 %v1298_v28  ;;  %v9339_v28 = vsel %vm206_vm11, 0.0, %v8828_v47 }
 0x51e   :  { %7651 = vmatprep.subr.bf16.mxu1 %v8826_v20 }
 0x5ce   :  { %v7593_v46 = vpop.f32.mrf.mxu0 }
 0x5cf   :  { %v1456_v49 = vmul.f32 0.125, %v7593_v46 }
 0x5d0   :  { %v1416_v51 = vpop.f32.mrf.mxu0 }
 0x5d1   :  { %v1455_v54 = vmul.f32 0.125, %v1416_v51  ;;  %v1464_v59 = vadd.f32 %v1456_v49, %v9312_v48 }
 0x5d2   :  { %v7596_v62 = vpop.f32.mrf.mxu0 }
 0x5d3   :  { %v1458_v2 = vmul.f32 0.125, %v7596_v62  ;;  %v1474_v3 = vsel %vm135_vm0, %v1464_v59, -inf  ;;  %v1463_v4 = vadd.f32 %v1455_v54, %v9315_v52 }
 0x5d4   :  { %1475 = vmax.xlane.f32.xlu1 %v1474_v3  ;;  %v1426_v7 = vpop.f32.mrf.mxu0 }
 0x5d5   :  { %v1457_v9 = vmul.f32 0.125, %v1426_v7  ;;  %v1471_v10 = vsel %vm135_vm0, %v1463_v4, -inf  ;;  %v1466_v56 = vadd.f32 %v1458_v2, %v9319_v0 }
 0x5d6   :  { %1472 = vmax.xlane.f32.xlu0 %v1471_v10  ;;  %v7599_v12 = vpop.f32.mrf.mxu0 }
 0x5d7   :  { %v1460_v14 = vmul.f32 0.125, %v7599_v12  ;;  %v1480_v15 = vsel %vm135_vm0, %v1466_v56, -inf  ;;  %v1465_v16 = vadd.f32 %v1457_v9, %v9323_v8 }
 0x5d8   :  { %1481 = vmax.xlane.f32.xlu1 %v1480_v15  ;;  %v1436_v17 = vpop.f32.mrf.mxu0 }
 0x5d9   :  { %v1459_v19 = vmul.f32 0.125, %v1436_v17  ;;  %v1477_v21 = vsel %vm135_vm0, %v1465_v16, -inf  ;;  %v1468_v22 = vadd.f32 %v1460_v14, %v9327_v13 }
 0x5da   :  { %1478 = vmax.xlane.f32.xlu0 %v1477_v21  ;;  %v7602_v23 = vpop.f32.mrf.mxu0 }
 0x5db   :  { %v1462_v25 = vmul.f32 0.125, %v7602_v23  ;;  %v1486_v5 = vsel %vm135_vm0, %v1468_v22, -inf  ;;  %v1467_v26 = vadd.f32 %v1459_v19, %v9331_v18 }
 0x5dc   :  { %1487 = vmax.xlane.f32.xlu1 %v1486_v5  ;;  %v1446_v27 = vpop.f32.mrf.mxu0  ;;  %v8250_v5 = vld [vmem:[%s10800_s4 + $0x30] sm:$0xff]  }
 0x5dd   :  { %v1461_v29 = vmul.f32 0.125, %v1446_v27  ;;  %v1483_v30 = vsel %vm135_vm0, %v1467_v26, -inf  ;;  %v1470_v31 = vadd.f32 %v1462_v25, %v9335_v24  ;;  %v8249_v25 = vld [vmem:[%s10800_s4 + $0x38] sm:$0xff]   ;;  %v8254_v27 = vld [vmem:[%s10800_s4 + $0x20] sm:$0xff]  }
 0x5de   :  { %1484 = vmax.xlane.f32.xlu0 %v1483_v30  ;;  %7632 = vmatpush3.bf16.msra.mxu0 %v8249_v25  ;;  %v8258_v30 = vld [vmem:[%s10800_s4 + $0x10] sm:$0xff]  }
 0x5df   :  { %v1492_v32 = vsel %vm135_vm0, %v1470_v31, -inf  ;;  %v1469_v33 = vadd.f32 %v1461_v29, %v9339_v28  ;;  %7633 = vmatprep.subr.bf16.mxu0 %v8826_v20  ;;  %v8256_v29 = vld [vmem:[%s10800_s4 + $0x18] sm:$0xff]   ;;  %v8269_v25 = vld [vmem:[%s10800_s4 + $0xf0] sm:$0xff]  }
 0x5e0   :  { %1493 = vmax.xlane.f32.xlu1 %v1492_v32 }
 0x5e1   :  { %v1489_v34 = vsel %vm135_vm0, %v1469_v33, -inf }
 0x5e2   :  { %1490 = vmax.xlane.f32.xlu0 %v1489_v34  ;;  %7634 = vmatpush3.bf16.msra.mxu0 %v8250_v5  ;;  %v8270_v5 = vld [vmem:[%s10800_s4 + $0xa0] sm:$0xff]  }
 0x5e3   :  { %7635 = vmatprep.subr.bf16.mxu0 %v8826_v20 }
 0x65d   :  { %v1476_v35 = vpop.xlane.xlu1 %1475 }
 0x65e   :  { %v1496_v36 = vsub.f32 %v1464_v59, %v1476_v35 }
 0x65f   :  { %v1473_v37 = vpop.xlane.xlu0 %1472 }
 0x660   :  { %v1505_v38 = vmul.f32 1.442695, %v1496_v36  ;;  %v1495_v39 = vsub.f32 %v1463_v4, %v1473_v37 }
 0x661   :  { %v1482_v40 = vpop.xlane.xlu1 %1481 }
 0x662   :  { %8665 = vpow2.f32 %v1505_v38  ;;  %v1503_v41 = vmul.f32 1.442695, %v1495_v39  ;;  %v1498_v42 = vsub.f32 %v1466_v56, %v1482_v40 }
 0x663   :  { %v1479_v43 = vpop.xlane.xlu0 %1478 }
 0x664   :  { %8667 = vpow2.f32 %v1503_v41  ;;  %v1509_v44 = vmul.f32 1.442695, %v1498_v42  ;;  %v1497_v45 = vsub.f32 %v1465_v16, %v1479_v43  ;;  %v8251_v43 = vld [vmem:[%s10800_s4 + $0x78] sm:$0xff]  }
 0x665   :  { %v1488_v46 = vpop.xlane.xlu1 %1487 }
 0x666   :  { %8669 = vpow2.f32 %v1509_v44  ;;  %v1507_v47 = vmul.f32 1.442695, %v1497_v45  ;;  %v1500_v55 = vsub.f32 %v1468_v22, %v1488_v46 }
 0x667   :  { %v1485_v49 = vpop.xlane.xlu0 %1484 }
 0x668   :  { %8671 = vpow2.f32 %v1507_v47  ;;  %v1513_v50 = vmul.f32 1.442695, %v1500_v55  ;;  %v1499_v51 = vsub.f32 %v1467_v26, %v1485_v49  ;;  %v8252_v26 = vld [vmem:[%s10800_s4 + $0x28] sm:$0xff]   ;;  %v8253_v55 = vld [vmem:[%s10800_s4 + $0x70] sm:$0xff]  }
 0x669   :  { %v1494_v53 = vpop.xlane.xlu1 %1493  ;;  %7636 = vmatpush3.bf16.msra.mxu0 %v8252_v26  ;;  %v8271_v26 = vld [vmem:[%s10800_s4 + $0xe8] sm:$0xff]  }
 0x66a   :  { %8673 = vpow2.f32 %v1513_v50  ;;  %v1511_v54 = vmul.f32 1.442695, %v1499_v51  ;;  %v1502_v59 = vsub.f32 %v1470_v31, %v1494_v53  ;;  %7637 = vmatprep.subr.bf16.mxu0 %v8826_v20  ;;  %v8260_v31 = vld [vmem:[%s10800_s4 + $0x8] sm:$0xff]  }
 0x66b   :  { %v1491_v60 = vpop.xlane.xlu0 %1490 }
 0x66c   :  { %8675 = vpow2.f32 %v1511_v54  ;;  %v1517_v62 = vmul.f32 1.442695, %v1502_v59  ;;  %v1501_v2 = vsub.f32 %v1469_v33, %v1491_v60  ;;  %v8255_v54 = vld [vmem:[%s10800_s4 + $0x68] sm:$0xff]  }
 0x66d   :  { %7638 = vmatpush3.bf16.msra.mxu0 %v8254_v27  ;;  %v8272_v27 = vld [vmem:[%s10800_s4 + $0x98] sm:$0xff]  }
 0x66e   :  { %8677 = vpow2.f32 %v1517_v62  ;;  %v1515_v3 = vmul.f32 1.442695, %v1501_v2  ;;  %7639 = vmatprep.subr.bf16.mxu0 %v8826_v20 }
 0x66f   :  { %v9346_v4 = vpop.eup %8665 }
 0x670   :  { %8679 = vpow2.f32 %v1515_v3  ;;  %v1522_v6 = vsel %vm135_vm0, %v9346_v4, 0.0  ;;  %v8257_v3 = vld [vmem:[%s10800_s4 + $0x60] sm:$0xff]  }
 0x671   :  { %v8668_v7 = vpop.eup %8667  ;;  %1523 = vadd.xlane.f32.xlu1 %v1522_v6  ;;  %7640 = vmatpush3.bf16.msra.mxu0 %v8256_v29  ;;  %v8259_v6 = vld [vmem:[%s10800_s4 + $0x58] sm:$0xff]   ;;  %v8273_v29 = vld [vmem:[%s10800_s4 + $0xe0] sm:$0xff]  }
 0x672   :  { %v1519_v9 = vsel %vm135_vm0, %v8668_v7, 0.0  ;;  %7641 = vmatprep.subr.bf16.mxu0 %v8826_v20 }
 0x673   :  { %v9351_v10 = vpop.eup %8669  ;;  %1520 = vadd.xlane.f32.xlu0 %v1519_v9  ;;  %v8262_v9 = vld [vmem:[%s10800_s4] sm:$0xff]  }
 0x674   :  { %v1528_v56 = vsel %vm135_vm0, %v9351_v10, 0.0 }
 0x675   :  { %v8672_v11 = vpop.eup %8671  ;;  %1529 = vadd.xlane.f32.xlu1 %v1528_v56  ;;  %7642 = vmatpush3.bf16.msra.mxu0 %v8258_v30  ;;  %v8264_v56 = vld [vmem:[%s10800_s4 + $0x40] sm:$0xff]   ;;  %v8274_v30 = vld [vmem:[%s10800_s4 + $0x90] sm:$0xff]  }
 0x676   :  { %v1525_v12 = vsel %vm135_vm0, %v8672_v11, 0.0  ;;  %7643 = vmatprep.subr.bf16.mxu0 %v8826_v20 }
 0x677   :  { %v9356_v14 = vpop.eup %8673  ;;  %1526 = vadd.xlane.f32.xlu0 %v1525_v12 }
 0x678   :  { %v1534_v15 = vsel %vm135_vm0, %v9356_v14, 0.0 }
 0x679   :  { %v9360_v16 = vpop.eup %8675  ;;  %1535 = vadd.xlane.f32.xlu1 %v1534_v15  ;;  %7644 = vmatpush3.bf16.msra.mxu0 %v8260_v31  ;;  %v8275_v31 = vld [vmem:[%s10800_s4 + $0xd8] sm:$0xff]  }
 0x67a   :  { %v1531_v17 = vsel %vm135_vm0, %v9360_v16, 0.0  ;;  %7645 = vmatprep.subr.bf16.mxu0 %v8826_v20 }
 0x67b   :  { %v9364_v19 = vpop.eup %8677  ;;  %1532 = vadd.xlane.f32.xlu0 %v1531_v17 }
 0x67c   :  { %v1540_v21 = vsel %vm135_vm0, %v9364_v19, 0.0 }
 0x67d   :  { %v9368_v22 = vpop.eup %8679  ;;  %1541 = vadd.xlane.f32.xlu1 %v1540_v21  ;;  %7646 = vmatpush3.bf16.msra.mxu0 %v8262_v9  ;;  %v8267_v21 = vld [vmem:[%s10800_s4 + $0xf8] sm:$0xff]  }
 0x67e   :  { %v1537_v23 = vsel %vm135_vm0, %v9368_v22, 0.0  ;;  %7671 = vmatprep.subr.bf16.mxu0 %v8826_v20 }
 0x67f   :  { %1538 = vadd.xlane.f32.xlu0 %v1537_v23  ;;  %v8268_v23 = vld [vmem:[%s10800_s4 + $0xa8] sm:$0xff]  }
 0x6fa   :  { %v1524_v32 = vpop.xlane.xlu1 %1523 }
 0x6fb   :  { %8681 = vrcp.f32 %v1524_v32 }
 0x6fc   :  { %v1521_v33 = vpop.xlane.xlu0 %1520 }
 0x6fd   :  { %8683 = vrcp.f32 %v1521_v33  ;;  %v8276_v33 = vld [vmem:[%s10800_s4 + $0x88] sm:$0xff]  }
 0x6fe   :  { %v1530_v34 = vpop.xlane.xlu1 %1529 }
 0x6ff   :  { %8685 = vrcp.f32 %v1530_v34  ;;  %v8277_v34 = vld [vmem:[%s10800_s4 + $0xd0] sm:$0xff]  }
 0x700   :  { %v1527_v35 = vpop.xlane.xlu0 %1526 }
 0x701   :  { %8687 = vrcp.f32 %v1527_v35 }
 0x702   :  { %v1536_v36 = vpop.xlane.xlu1 %1535 }
 0x703   :  { %8689 = vrcp.f32 %v1536_v36  ;;  %v8278_v36 = vld [vmem:[%s10800_s4 + $0x80] sm:$0xff]  }
 0x704   :  { %v1533_v37 = vpop.xlane.xlu0 %1532 }
 0x705   :  { %8691 = vrcp.f32 %v1533_v37  ;;  %v8279_v37 = vld [vmem:[%s10800_s4 + $0xc8] sm:$0xff]  }
 0x706   :  { %v1542_v38 = vpop.xlane.xlu1 %1541 }
 0x707   :  { %8693 = vrcp.f32 %v1542_v38 }
 0x708   :  { %v1539_v39 = vpop.xlane.xlu0 %1538  ;;  %v8682_v40 = vpop.eup %8681 }
 0x709   :  { %8695 = vrcp.f32 %v1539_v39  ;;  %v1552_v44 = vmul.f32 %v8682_v40, %v9346_v4  ;;  %v8280_v39 = vld [vmem:[%s10800_s4 + $0xc0] sm:$0xff]  }
 0x70a   :  { %v8684_v41 = vpop.eup %8683 }
 0x70b   :  { %v1551_v42 = vmul.f32 %v8684_v41, %v8668_v7  ;;  %v8261_v7 = vld [vmem:[%s10800_s4 + $0x50] sm:$0xff]  }
 0x70c   :  { %v8686_v45 = vpop.eup %8685 }
 0x70d   :  { %7619 = vmatprep.mubr.msk.f32.mxu1 %vm135_vm0, %v1551_v42  ;;  %v1554_v49 = vmul.f32 %v8686_v45, %v9351_v10  ;;  %v8263_v10 = vld [vmem:[%s10800_s4 + $0x48] sm:$0xff]  }
 0x70e   :  { %v8688_v46 = vpop.eup %8687  ;;  %7620 = vmatmul.mubr.msk.f32.vlgmr.msra.gmra.mxu1 %vm135_vm0, %v1552_v44 }
 0x70f   :  { %v1553_v47 = vmul.f32 %v8688_v46, %v8672_v11  ;;  %7652 = vmatpush3.bf16.msra.mxu1 %v8251_v43 }
 0x710   :  { %7653 = vmatprep.subr.bf16.mxu1 %v8826_v20  ;;  %v8690_v50 = vpop.eup %8689 }
 0x711   :  { %7622 = vmatprep.mubr.msk.f32.mxu1 %vm135_vm0, %v1553_v47  ;;  %v1556_v59 = vmul.f32 %v8690_v50, %v9356_v14  ;;  %v8265_v14 = vld [vmem:[%s10800_s4 + $0xb8] sm:$0xff]  }
 0x712   :  { %v8692_v51 = vpop.eup %8691  ;;  %7623 = vmatmul.mubr.msk.f32.gmra.mxu1 %vm135_vm0, %v1554_v49 }
 0x713   :  { %v1555_v53 = vmul.f32 %v8692_v51, %v9360_v16  ;;  %7654 = vmatpush3.bf16.msra.mxu1 %v8253_v55 }
 0x714   :  { %7655 = vmatprep.subr.bf16.mxu1 %v8826_v20  ;;  %v8694_v60 = vpop.eup %8693 }
 0x715   :  { %7625 = vmatprep.mubr.msk.f32.mxu1 %vm135_vm0, %v1555_v53  ;;  %v1558_v4 = vmul.f32 %v8694_v60, %v9364_v19  ;;  %v8266_v19 = vld [vmem:[%s10800_s4 + $0xb0] sm:$0xff]  }
 0x716   :  { %v8696_v62 = vpop.eup %8695  ;;  %7626 = vmatmul.mubr.msk.f32.gmra.mxu1 %vm135_vm0, %v1556_v59 }
 0x717   :  { %v1557_v2 = vmul.f32 %v8696_v62, %v9368_v22  ;;  %7656 = vmatpush3.bf16.msra.mxu1 %v8255_v54 }
 0x718   :  { %7657 = vmatprep.subr.bf16.mxu1 %v8826_v20 }
 0x719   :  { %7628 = vmatprep.mubr.msk.f32.mxu1 %vm135_vm0, %v1557_v2 }
 0x71a   :  { %7629 = vmatmul.mubr.msk.f32.gmra.mxu1 %vm135_vm0, %v1558_v4 }
 0x71b   :  { %7658 = vmatpush3.bf16.msra.mxu1 %v8257_v3  ;;  %7667 = vmatprep.mubr.msk.bf16.mxu1 %vm8827_vm1, %v8826_v20 }
 0x71c   :  { %7659 = vmatprep.subr.bf16.mxu1 %v8826_v20 }
 0x71f   :  { %7660 = vmatpush3.bf16.msra.mxu1 %v8259_v6 }
 0x720   :  { %7661 = vmatprep.subr.bf16.mxu1 %v8826_v20 }
 0x723   :  { %7662 = vmatpush3.bf16.msra.mxu1 %v8261_v7 }
 0x724   :  { %7663 = vmatprep.subr.bf16.mxu1 %v8826_v20 }
 0x727   :  { %7664 = vmatpush3.bf16.msra.mxu1 %v8263_v10 }
 0x728   :  { %7665 = vmatprep.subr.bf16.mxu1 %v8826_v20 }
 0x72b   :  { %7666 = vmatpush3.bf16.msra.mxu1 %v8264_v56 }
 0x72c   :  { %7691 = vmatprep.subr.bf16.mxu1 %v8826_v20 }
 0x7ce   :  { %v7621_v11 = vpop.f32.mrf.mxu1 }
 0x7d0   :  { %v1649_v12 = vpop.f32.mrf.mxu1 }
 0x7d1   :  { %v1688_v15 = vpack.c.bf16 %v7621_v11, %v1649_v12 }
 0x7d2   :  { %v7624_v16 = vpop.f32.mrf.mxu1 }
 0x7d3   :  { %7648 = vmatmul.mubr.bf16.vlgmr.msra.gmra.mxu0 %v1688_v15 }
 0x7d4   :  { %7672 = vmatpush3.bf16.msra.mxu0 %v8265_v14  ;;  %v1659_v17 = vpop.f32.mrf.mxu1  ;;  %7687 = vmatprep.mubr.msk.bf16.mxu0 %vm8827_vm1, %v8826_v20 }
 0x7d5   :  { %v1780_v22 = vpack.c.bf16 %v7624_v16, %v1659_v17  ;;  %7673 = vmatprep.subr.bf16.mxu0 %v8826_v20 }
 0x7d6   :  { %v7627_v32 = vpop.f32.mrf.mxu1 }
 0x7d7   :  { %7668 = vmatmul.mubr.bf16.vlgmr.msra.gmra.mxu1 %v1780_v22 }
 0x7d8   :  { %7674 = vmatpush3.bf16.msra.mxu0 %v8266_v19  ;;  %7692 = vmatpush3.bf16.msra.mxu1 %v8267_v21  ;;  %v1669_v35 = vpop.f32.mrf.mxu1 }
 0x7d9   :  { %7675 = vmatprep.subr.bf16.mxu0 %v8826_v20  ;;  %7693 = vmatprep.subr.bf16.mxu1 %v8826_v20  ;;  %v1872_v40 = vpack.c.bf16 %v7627_v32, %v1669_v35  ;;  %v6625_v35 = vld [vmem:[%s10803_s7 + $0x2] ss:$0 sm:$0xff] }
 0x7da   :  { %7707 = vmatprep.mubr.msk.bf16.mxu1 %vm8827_vm1, %v8826_v20  ;;  %v7630_v38 = vpop.f32.mrf.mxu1 }
 0x7dc   :  { %7676 = vmatpush3.bf16.msra.mxu0 %v8268_v23  ;;  %7694 = vmatpush3.bf16.msra.mxu1 %v8269_v25  ;;  %v1679_v41 = vpop.f32.mrf.mxu1  ;;  %v8282_v23 = vld [vmem:[%s10801_s5 + $0x10] sm:$0xff]   ;;  %v8283_v25 = vld [vmem:[%s10801_s5 + $0x8] sm:$0xff]  }
 0x7dd   :  { %7677 = vmatprep.subr.bf16.mxu0 %v8826_v20  ;;  %7695 = vmatprep.subr.bf16.mxu1 %v8826_v20  ;;  %v1964_v42 = vpack.c.bf16 %v7630_v38, %v1679_v41 }
 0x7e0   :  { %7678 = vmatpush3.bf16.msra.mxu0 %v8270_v5  ;;  %7696 = vmatpush3.bf16.msra.mxu1 %v8271_v26  ;;  %v8284_v5 = vld [vmem:[%s10801_s5] sm:$0xff]  }
 0x7e1   :  { %7679 = vmatprep.subr.bf16.mxu0 %v8826_v20  ;;  %7697 = vmatprep.subr.bf16.mxu1 %v8826_v20 }
 0x7e4   :  { %7680 = vmatpush3.bf16.msra.mxu0 %v8272_v27  ;;  %7698 = vmatpush3.bf16.msra.mxu1 %v8273_v29 }
 0x7e5   :  { %7681 = vmatprep.subr.bf16.mxu0 %v8826_v20  ;;  %7699 = vmatprep.subr.bf16.mxu1 %v8826_v20 }
 0x7e8   :  { %7682 = vmatpush3.bf16.msra.mxu0 %v8274_v30  ;;  %7700 = vmatpush3.bf16.msra.mxu1 %v8275_v31 }
 0x7e9   :  { %7683 = vmatprep.subr.bf16.mxu0 %v8826_v20  ;;  %7701 = vmatprep.subr.bf16.mxu1 %v8826_v20 }
 0x7ec   :  { %7684 = vmatpush3.bf16.msra.mxu0 %v8276_v33  ;;  %7702 = vmatpush3.bf16.msra.mxu1 %v8277_v34 }
 0x7ed   :  { %7685 = vmatprep.subr.bf16.mxu0 %v8826_v20  ;;  %7703 = vmatprep.subr.bf16.mxu1 %v8826_v20 }
 0x7f0   :  { %7686 = vmatpush3.bf16.msra.mxu0 %v8278_v36  ;;  %7704 = vmatpush3.bf16.msra.mxu1 %v8279_v37 }
 0x7f1   :  { %7705 = vmatprep.subr.bf16.mxu1 %v8826_v20  ;;  %7711 = vmatprep.subr.bf16.mxu0 %v8826_v20 }
 0x7f3   :  { %7688 = vmatmul.mubr.bf16.vlgmr.msra.gmra.mxu0 %v1872_v40 }
 0x7f4   :  { %7706 = vmatpush3.bf16.msra.mxu1 %v8280_v39  ;;  %7719 = vmatprep.mubr.msk.bf16.mxu0 %vm8827_vm1, %v8826_v20  ;;  %v6626_v39 = vld [vmem:[%s10803_s7 + $0x3] ss:$0 sm:$0xff] }
 0x7f5   :  { %7723 = vmatprep.subr.bf16.mxu1 %v8826_v20 }
 0x7f7   :  { %7708 = vmatmul.mubr.bf16.vlgmr.msra.gmra.mxu1 %v1964_v42 }
 0x7f8   :  { %7731 = vmatprep.mubr.msk.bf16.mxu1 %vm8827_vm1, %v8826_v20 }
 0x893   :  { %v1771_v43 = vpop.f32.mrf.mxu0 }
 0x894   :  { %v1778_v51 = vadd.f32 %v1771_v43, %v8976_v61 }
 0x895   :  { %v7649_v44 = vpop.f32.mrf.mxu0 }
 0x896   :  { %v8285_v44 = vld [vmem:[%s10801_s5 + $0x38] sm:$0xff]  }
 0x897   :  { %v1774_v45 = vpop.f32.mrf.mxu0  ;;  %v1863_v46 = vpop.f32.mrf.mxu1  ;;  %7724 = vmatpush3.bf16.msra.mxu1 %v8285_v44 }
 0x898   :  { %v1870_v54 = vadd.f32 %v1863_v46, %v1778_v51  ;;  %v1779_v60 = vadd.f32 %v1774_v45, %v8980_v63  ;;  %v8281_v63 = vld [vmem:[%s10801_s5 + $0x18] sm:$0xff]   ;;  %v8286_v45 = vld [vmem:[%s10801_s5 + $0x30] sm:$0xff]   ;;  %7725 = vmatprep.subr.bf16.mxu1 %v8826_v20  ;;  %v8287_v46 = vld [vmem:[%s10801_s5 + $0x28] sm:$0xff]  }
 0x899   :  { %v7650_v47 = vpop.f32.mrf.mxu0  ;;  %v7669_v55 = vpop.f32.mrf.mxu1  ;;  %7712 = vmatpush3.bf16.xpose.msra.mxu0 %v8281_v63 }
 0x89a   :  { %7713 = vmatprep.subr.bf16.mxu0 %v8826_v20  ;;  %v8288_v47 = vld [vmem:[%s10801_s5 + $0x20] sm:$0xff]  }
 0x89b   :  { %v1866_v49 = vpop.f32.mrf.mxu1  ;;  %7726 = vmatpush3.bf16.msra.mxu1 %v8286_v45  ;;  %v6627_v55 = vld [vmem:[%s10803_s7 + $0x4] ss:$0 sm:$0xff] }
 0x89c   :  { %v1871_v4 = vadd.f32 %v1866_v49, %v1779_v60  ;;  %7727 = vmatprep.subr.bf16.mxu1 %v8826_v20 }
 0x89d   :  { %v7670_v50 = vpop.f32.mrf.mxu1 }
 0x89f   :  { %7728 = vmatpush3.bf16.msra.mxu1 %v8287_v46 }
 0x8a0   :  { %7729 = vmatprep.subr.bf16.mxu1 %v8826_v20 }
 0x8a1   :  { %7714 = vmatpush3.bf16.xpose.msra.mxu0 %v8282_v23  ;;  %v6639_v23 = vld [vmem:[%s10802_s6 + $0x28] sm:$0xff] }
 0x8a2   :  { %7715 = vmatprep.subr.bf16.mxu0 %v8826_v20 }
 0x8a3   :  { %7730 = vmatpush3.bf16.msra.mxu1 %v8288_v47 }
 0x8a4   :  { %7735 = vmatprep.subr.mxu1 %v8826_v20 }
 0x8a9   :  { %7716 = vmatpush3.bf16.xpose.msra.mxu0 %v8283_v25  ;;  %v6638_v25 = vld [vmem:[%s10802_s6 + $0x20] sm:$0xff] }
 0x8aa   :  { %7717 = vmatprep.subr.bf16.mxu0 %v8826_v20 }
 0x8b1   :  { %7718 = vmatpush3.bf16.xpose.msra.mxu0 %v8284_v5  ;;  %v6641_v5 = vld [vmem:[%s10802_s6 + $0x38] sm:$0xff] }
 0x8b2   :  { %7742 = vmatprep.subr.mxu0 %v8826_v20 }
 0x8b3   :  { %v1955_v53 = vpop.f32.mrf.mxu0 }
 0x8b4   :  { %v1962_v62 = vadd.f32 %v1955_v53, %v1870_v54 }
 0x8b5   :  { %v7689_v59 = vpop.f32.mrf.mxu0 }
 0x8b7   :  { %v1958_v2 = vpop.f32.mrf.mxu0  ;;  %v2047_v3 = vpop.f32.mrf.mxu1 }
 0x8b8   :  { %v9526_v6 = vadd.f32 %v2047_v3, %v1962_v62  ;;  %v1963_v10 = vadd.f32 %v1958_v2, %v1871_v4 }
 0x8b9   :  { %v7690_v7 = vpop.f32.mrf.mxu0  ;;  %v7709_v9 = vpop.f32.mrf.mxu1 }
 0x8ba   :  { %2058 = vadd.xlane.f32.xlu0 %v9526_v6 }
 0x8bb   :  { %v2050_v56 = vpop.f32.mrf.mxu1 }
 0x8bc   :  { %v9529_v11 = vadd.f32 %v2050_v56, %v1963_v10 }
 0x8bd   :  { %v7710_v61 = vpop.f32.mrf.mxu1 }
 0x8be   :  { %2060 = vadd.xlane.f32.xlu1 %v9529_v11 }
 0x943   :  { %v2059_v12 = vpop.xlane.xlu0 %2058 }
 0x944   :  { %v2062_v14 = vmul.f32 0.0078125, %v2059_v12 }
 0x946   :  { %v2064_v15 = vsub.f32 %v9526_v6, %v2062_v14 }
 0x947   :  { %v2061_v16 = vpop.xlane.xlu1 %2060 }
 0x948   :  { %v2063_v17 = vmul.f32 0.0078125, %v2061_v16  ;;  %v2066_v19 = vmul.f32 %v2064_v15, %v2064_v15 }
 0x94a   :  { %v2065_v21 = vsub.f32 %v9529_v11, %v2063_v17  ;;  %2068 = vadd.xlane.f32.xlu0 %v2066_v19 }
 0x94c   :  { %v2067_v22 = vmul.f32 %v2065_v21, %v2065_v21 }
 0x94e   :  { %2070 = vadd.xlane.f32.xlu1 %v2067_v22 }
 0x9d3   :  { %v2069_v26 = vpop.xlane.xlu0 %2068 }
 0x9d4   :  { %v2072_v27 = vmul.f32 0.0078125, %v2069_v26  ;;  %v6640_v26 = vld [vmem:[%s10802_s6 + $0x30] sm:$0xff] }
 0x9d6   :  { %v2074_v29 = vadd.f32 1e-05, %v2072_v27  ;;  %v6632_v27 = vld [vmem:[%s10803_s7 + $0x5] ss:$0 sm:$0xff] }
 0x9d7   :  { %v2071_v30 = vpop.xlane.xlu1 %2070 }
 0x9d8   :  { %8697 = vrsqrt.f32 %v2074_v29  ;;  %v2073_v31 = vmul.f32 0.0078125, %v2071_v30 }
 0x9da   :  { %v2075_v32 = vadd.f32 1e-05, %v2073_v31 }
 0x9dc   :  { %8699 = vrsqrt.f32 %v2075_v32 }
 0x9e5   :  { %v8698_v33 = vpop.eup %8697 }
 0x9e6   :  { %v2078_v34 = vmul.f32 %v8698_v33, %v2064_v15 }
 0x9e8   :  { %v2084_v38 = vmul.f32 %v6625_v35, %v2078_v34 }
 0x9e9   :  { %v8700_v36 = vpop.eup %8699 }
 0x9ea   :  { %v2079_v37 = vmul.f32 %v8700_v36, %v2065_v21  ;;  %v2090_v41 = vadd.f32 %v6626_v39, %v2084_v38 }
 0x9ec   :  { %v2085_v40 = vmul.f32 %v6625_v35, %v2079_v37 }
 0x9ee   :  { %v2091_v42 = vadd.f32 %v6626_v39, %v2085_v40 }
 0x9f0   :  { %v2092_v43 = vpack.c.bf16 %v2091_v42, %v2090_v41 }
 0x9f2   :  { %7720 = vmatmul.mubr.bf16.vlgmr.msra.gmra.mxu0 %v2092_v43 }
 0x9f3   :  { %7746 = vmatprep.mubr.msk.f32.mxu0 %vm8827_vm1, %v8826_v20  ;;  %7743 = vmatpush3.msra.mxu0 %v6641_v5 }
 0x9f4   :  { %7744 = vmatprep.subr.mxu0 %v8826_v20 }
 0x9f5   :  { %7745 = vmatpush3.msra.mxu0 %v6640_v26 }
 0xab2   :  { %v2156_v49 = vpop.f32.mrf.mxu0 }
 0xab3   :  { %v2157_v50 = vadd.f32 %v6627_v55, %v2156_v49 }
 0xab4   :  { %v7721_v51 = vpop.f32.mrf.mxu0 }
 0xab5   :  { %v2165_v53 = vmul.f32 0.044715, %v2157_v50  ;;  %v2163_v15 = vmul.f32 0.5, %v2157_v50 }
 0xab6   :  { %v2159_v54 = vpop.f32.mrf.mxu0 }
 0xab7   :  { %v2167_v59 = vmul.f32 %v2165_v53, %v2157_v50  ;;  %v2160_v60 = vadd.f32 %v6627_v55, %v2159_v54 }
 0xab8   :  { %v7722_v62 = vpop.f32.mrf.mxu0 }
 0xab9   :  { %v2169_v2 = vmul.f32 %v2167_v59, %v2157_v50  ;;  %v2166_v3 = vmul.f32 0.044715, %v2160_v60  ;;  %v2164_v16 = vmul.f32 0.5, %v2160_v60 }
 0xabb   :  { %v2171_v4 = vadd.f32 %v2169_v2, %v2157_v50  ;;  %v2168_v7 = vmul.f32 %v2166_v3, %v2160_v60 }
 0xabd   :  { %v2173_v9 = vmul.f32 0.7978846, %v2171_v4  ;;  %v2170_v10 = vmul.f32 %v2168_v7, %v2160_v60 }
 0xabf   :  { %8701 = vtanh.f32 %v2173_v9  ;;  %v2172_v56 = vadd.f32 %v2170_v10, %v2160_v60 }
 0xac1   :  { %v2174_v61 = vmul.f32 0.7978846, %v2172_v56  ;;  %v8289_v56 = vld [vmem:[%s10799_s3 + $0x5a0] ss:$48 sps:$4 sm:$0xff]  }
 0xac3   :  { %8703 = vtanh.f32 %v2174_v61  ;;  %v8291_v61 = vld [vmem:[%s10799_s3 + $0x5a4] ss:$48 sps:$4 sm:$0xff]  }
 0xacc   :  { %v8702_v63 = vpop.eup %8701 }
 0xacd   :  { %v2177_v12 = vadd.f32 1.0, %v8702_v63  ;;  %v8292_v63 = vld [vmem:[%s10799_s3 + $0x5a8] ss:$48 sps:$4 sm:$0xff]  }
 0xacf   :  { %v2179_v19 = vmul.f32 %v2177_v12, %v2163_v15  ;;  %v8294_v12 = vld [vmem:[%s10799_s3 + $0x5ac] ss:$48 sps:$4 sm:$0xff]  }
 0xad0   :  { %v8704_v14 = vpop.eup %8703  ;;  %v8300_v15 = vld [vmem:[%s10799_s3 + $0x54c] ss:$48 sps:$4 sm:$0xff]   ;;  %3176 = vmatprep.subr.bf16.mxu0 %v8294_v12  ;;  %v6821_v12 = vld [vmem:[%s10803_s7 + $0x7] ss:$0 sm:$0xff] }
 0xad1   :  { %v2178_v17 = vadd.f32 1.0, %v8704_v14  ;;  %v8297_v14 = vld [vmem:[%s10799_s3 + $0x544] ss:$48 sps:$4 sm:$0xff]  }
 0xad3   :  { %v2180_v21 = vmul.f32 %v2178_v17, %v2164_v16  ;;  %v8295_v16 = vld [vmem:[%s10799_s3 + $0x540] ss:$48 sps:$4 sm:$0xff]   ;;  %v8298_v17 = vld [vmem:[%s10799_s3 + $0x548] ss:$48 sps:$4 sm:$0xff]  }
 0xad5   :  { %v2181_v22 = vpack.c.bf16 %v2180_v21, %v2179_v19 }
 0xad7   :  { %7732 = vmatmul.mubr.msk.bf16.vlgmr.msra.gmra.mxu1 %vm135_vm0, %v2181_v22 }
 0xad8   :  { %7739 = vmatprep.mubr.msk.f32.mxu1 %vm8827_vm1, %v8826_v20  ;;  %7736 = vmatpush3.xpose.msra.mxu1 %v6639_v23 }
 0xad9   :  { %7737 = vmatprep.subr.mxu1 %v8826_v20 }
 0xadc   :  { %7738 = vmatpush3.xpose.msra.mxu1 %v6638_v25 }
 0xadd   :  { %3133 = vmatprep.subr.bf16.mxu1 %v8291_v61 }
 0xb97   :  { %v2248_v29 = vpop.f32.mrf.mxu1 }
 0xb98   :  { %v2249_v30 = vadd.f32 %v6632_v27, %v2248_v29  ;;  %v8303_v29 = vld [vmem:[%s10799_s3 + $0x4e4] ss:$48 sps:$4 sm:$0xff]  }
 0xb99   :  { %v7733_v31 = vpop.f32.mrf.mxu1 }
 0xb9a   :  { %v2255_v32 = vadd.f32 %v2249_v30, %v9526_v6  ;;  %v8306_v30 = vld [vmem:[%s10799_s3 + $0x4ec] ss:$48 sps:$4 sm:$0xff]   ;;  %v8301_v31 = vld [vmem:[%s10799_s3 + $0x4e0] ss:$48 sps:$4 sm:$0xff]  }
 0xb9b   :  { %v2251_v33 = vpop.f32.mrf.mxu1 }
 0xb9c   :  { %v2441_v34 = vrot.slane %v2255_v32, 4  ;;  %v2252_v35 = vadd.f32 %v6632_v27, %v2251_v33  ;;  %v8309_v33 = vld [vmem:[%s10799_s3 + $0x484] ss:$48 sps:$4 sm:$0xff]  }
 0xb9d   :  { %v7734_v36 = vpop.f32.mrf.mxu1 }
 0xb9e   :  { %v2442_v37 = vadd.f32 %v2441_v34, %v2255_v32  ;;  %v2256_v38 = vadd.f32 %v2252_v35, %v9529_v11  ;;  %v8312_v34 = vld [vmem:[%s10799_s3 + $0x48c] ss:$48 sps:$4 sm:$0xff]   ;;  %v8307_v35 = vld [vmem:[%s10799_s3 + $0x480] ss:$48 sps:$4 sm:$0xff]   ;;  %v8310_v36 = vld [vmem:[%s10799_s3 + $0x488] ss:$48 sps:$4 sm:$0xff]  }
 0xba0   :  { %v2443_v39 = vrot.slane %v2442_v37, 2  ;;  %v2448_v40 = vrot.slane %v2256_v38, 4 }
 0xba2   :  { %v2444_v41 = vadd.f32 %v2443_v39, %v2442_v37  ;;  %v2449_v42 = vadd.f32 %v2448_v40, %v2256_v38  ;;  %v8315_v37 = vld [vmem:[%s10799_s3 + $0x424] ss:$48 sps:$4 sm:$0xff]   ;;  %v8313_v39 = vld [vmem:[%s10799_s3 + $0x420] ss:$48 sps:$4 sm:$0xff]   ;;  %v8316_v40 = vld [vmem:[%s10799_s3 + $0x428] ss:$48 sps:$4 sm:$0xff]  }
 0xba4   :  { %v2450_v43 = vrot.slane %v2449_v42, 2  ;;  %v2445_v44 = vrot.slane %v2444_v41, 1 }
 0xba6   :  { %v2451_v45 = vadd.f32 %v2450_v43, %v2449_v42  ;;  %v2446_v46 = vadd.f32 %v2445_v44, %v2444_v41  ;;  %v8321_v41 = vld [vmem:[%s10799_s3 + $0x3c4] ss:$48 sps:$4 sm:$0xff]   ;;  %v8324_v42 = vld [vmem:[%s10799_s3 + $0x3cc] ss:$48 sps:$4 sm:$0xff]   ;;  %v8319_v43 = vld [vmem:[%s10799_s3 + $0x3c0] ss:$48 sps:$4 sm:$0xff]  }
 0xba7   :  { %v8322_v44 = vld [vmem:[%s10799_s3 + $0x3c8] ss:$48 sps:$4 sm:$0xff]  }
 0xba8   :  { %v2452_v47 = vrot.slane %v2451_v45, 1  ;;  %v2447_v49 = vmul.f32 0.125, %v2446_v46  ;;  %v8330_v46 = vld [vmem:[%s10799_s3 + $0x36c] ss:$48 sps:$4 sm:$0xff]  }
 0xbaa   :  { %v2453_v55 = vadd.f32 %v2452_v47, %v2451_v45  ;;  %v8327_v45 = vld [vmem:[%s10799_s3 + $0x364] ss:$48 sps:$4 sm:$0xff]   ;;  %v8325_v47 = vld [vmem:[%s10799_s3 + $0x360] ss:$48 sps:$4 sm:$0xff]  }
 0xbac   :  { %v2454_v50 = vmul.f32 0.125, %v2453_v55  ;;  %v8328_v55 = vld [vmem:[%s10799_s3 + $0x368] ss:$48 sps:$4 sm:$0xff]  }
 0xbae   :  { %v2455_v6 = vsel %vm411_vm2, %v2447_v49, %v2454_v50  ;;  %v8333_v49 = vld [vmem:[%s10799_s3 + $0x304] ss:$48 sps:$4 sm:$0xff]   ;;  %v8336_v50 = vld [vmem:[%s10799_s3 + $0x30c] ss:$48 sps:$4 sm:$0xff]  }
 0xbaf   :  { %7740 = vmatmul.mubr.f32.vlgmr.msra.gmra.mxu1 %v2455_v6  ;;  %v8331_v6 = vld [vmem:[%s10799_s3 + $0x300] ss:$48 sps:$4 sm:$0xff]  }
 0xbb0   :  { %3165 = vmatprep.mubr.bf16.mxu1 %v8825_v1  ;;  %3134 = vmatpush1.bf16.msra.mxu1 %v8289_v56 }
 0xbb1   :  { %3135 = vmatprep.subr.bf16.mxu1 %v8297_v14 }
 0xbb4   :  { %3136 = vmatpush1.bf16.msra.mxu1 %v8295_v16 }
 0xbb5   :  { %3137 = vmatprep.subr.bf16.mxu1 %v8303_v29  ;;  %v8354_v29 = vld [vmem:[%s10799_s3 + $0x4fc] ss:$48 sps:$4 sm:$0xff]  }
 0xbb8   :  { %3138 = vmatpush1.bf16.msra.mxu1 %v8301_v31  ;;  %v8352_v31 = vld [vmem:[%s10799_s3 + $0x4f8] ss:$48 sps:$4 sm:$0xff]  }
 0xbb9   :  { %3139 = vmatprep.subr.bf16.mxu1 %v8309_v33  ;;  %v8360_v33 = vld [vmem:[%s10799_s3 + $0x49c] ss:$48 sps:$4 sm:$0xff]  }
 0xbbc   :  { %3140 = vmatpush1.bf16.msra.mxu1 %v8307_v35  ;;  %v8358_v35 = vld [vmem:[%s10799_s3 + $0x498] ss:$48 sps:$4 sm:$0xff]  }
 0xbbd   :  { %3141 = vmatprep.subr.bf16.mxu1 %v8315_v37  ;;  %v8366_v37 = vld [vmem:[%s10799_s3 + $0x43c] ss:$48 sps:$4 sm:$0xff]  }
 0xbc0   :  { %3142 = vmatpush1.bf16.msra.mxu1 %v8313_v39  ;;  %v8364_v39 = vld [vmem:[%s10799_s3 + $0x438] ss:$48 sps:$4 sm:$0xff]  }
 0xbc1   :  { %3143 = vmatprep.subr.bf16.mxu1 %v8321_v41  ;;  %v8372_v41 = vld [vmem:[%s10799_s3 + $0x3dc] ss:$48 sps:$4 sm:$0xff]  }
 0xbc4   :  { %3144 = vmatpush1.bf16.msra.mxu1 %v8319_v43  ;;  %v8370_v43 = vld [vmem:[%s10799_s3 + $0x3d8] ss:$48 sps:$4 sm:$0xff]  }
 0xbc5   :  { %3145 = vmatprep.subr.bf16.mxu1 %v8327_v45  ;;  %v8378_v45 = vld [vmem:[%s10799_s3 + $0x37c] ss:$48 sps:$4 sm:$0xff]  }
 0xbc8   :  { %3146 = vmatpush1.bf16.msra.mxu1 %v8325_v47  ;;  %v8376_v47 = vld [vmem:[%s10799_s3 + $0x378] ss:$48 sps:$4 sm:$0xff]  }
 0xbc9   :  { %3147 = vmatprep.subr.bf16.mxu1 %v8333_v49  ;;  %v8384_v49 = vld [vmem:[%s10799_s3 + $0x31c] ss:$48 sps:$4 sm:$0xff]  }
 0xbcc   :  { %3148 = vmatpush1.bf16.msra.mxu1 %v8331_v6  ;;  %v8382_v6 = vld [vmem:[%s10799_s3 + $0x318] ss:$48 sps:$4 sm:$0xff]  }
 0xc6f   :  { %v2522_v51 = vpop.f32.mrf.mxu1 }
 0xc70   :  { %v2526_v53 = vmax.f32 %v2522_v51, 0.0  ;;  %v8334_v51 = vld [vmem:[%s10799_s3 + $0x308] ss:$48 sps:$4 sm:$0xff]  }
 0xc71   :  { %v7741_v11 = vpop.f32.mrf.mxu1 }
 0xc72   :  { %7747 = vmatmul.mubr.msk.f32.vlgmr.msra.gmra.mxu0 %vm484_vm3, %v2526_v53  ;;  %v8339_v53 = vld [vmem:[%s10799_s3 + $0x5b4] ss:$48 sps:$4 sm:$0xff]   ;;  %v8342_v11 = vld [vmem:[%s10799_s3 + $0x5bc] ss:$48 sps:$4 sm:$0xff]  }
 0xc73   :  { %3208 = vmatprep.mubr.bf16.mxu0 %v8825_v1  ;;  %3177 = vmatpush1.bf16.msra.mxu0 %v8292_v63 }
 0xc74   :  { %3178 = vmatprep.subr.bf16.mxu0 %v8300_v15  ;;  %3219 = vmatprep.subr.bf16.mxu1 %v8339_v53  ;;  %v8390_v53 = vld [vmem:[%s10799_s3 + $0x5cc] ss:$48 sps:$4 sm:$0xff]  }
 0xc77   :  { %3179 = vmatpush1.bf16.msra.mxu0 %v8298_v17 }
 0xc78   :  { %3180 = vmatprep.subr.bf16.mxu0 %v8306_v30  ;;  %v8349_v30 = vld [vmem:[%s10799_s3 + $0x4f0] ss:$48 sps:$4 sm:$0xff]  }
 0xd32   :  { %v2596_v54 = vpop.f32.mrf.mxu0 }
 0xd33   :  { %v6819_v59 = vmul.f32 -1.442695, %v2596_v54 }
 0xd34   :  { %v7748_v60 = vpop.f32.mrf.mxu0 }
 0xd35   :  { %8705 = vpow2.f32 %v6819_v59 }
 0xd42   :  { %v8706_v62 = vpop.eup %8705 }
 0xd43   :  { %v2603_v2 = vadd.f32 1.0, %v8706_v62 }
 0xd45   :  { %8707 = vrcp.f32 %v2603_v2 }
 0xd52   :  { %v8708_v3 = vpop.eup %8707 }
 0xd53   :  { %v2614_v4 = vrot.slane %v8708_v3, %v8973_v58  ;;  %v2609_v7 = vrot.slane %v8708_v3, %v8970_v57 }
 0xd55   :  { %v9605_v9 = vmul.f32 %v2614_v4, %v2256_v38  ;;  %v9607_v10 = vmul.f32 %v2609_v7, %v2255_v32  ;;  %v8304_v32 = vld [vmem:[%s10799_s3 + $0x4e8] ss:$48 sps:$4 sm:$0xff]   ;;  %v8318_v38 = vld [vmem:[%s10799_s3 + $0x42c] ss:$48 sps:$4 sm:$0xff]   ;;  %v6820_v7 = vld [vmem:[%s10803_s7 + $0x6] ss:$0 sm:$0xff] }
 0xd56   :  { %3181 = vmatpush1.bf16.msra.mxu0 %v8304_v32  ;;  %v8357_v32 = vld [vmem:[%s10799_s3 + $0x494] ss:$48 sps:$4 sm:$0xff]  }
 0xd57   :  { %2620 = vadd.xlane.f32.xlu1 %v9605_v9  ;;  %2618 = vadd.xlane.f32.xlu0 %v9607_v10 }
 0xd58   :  { %3182 = vmatprep.subr.bf16.mxu0 %v8312_v34  ;;  %v8355_v34 = vld [vmem:[%s10799_s3 + $0x490] ss:$48 sps:$4 sm:$0xff]  }
 0xd5a   :  { %3183 = vmatpush1.bf16.msra.mxu0 %v8310_v36  ;;  %v8363_v36 = vld [vmem:[%s10799_s3 + $0x434] ss:$48 sps:$4 sm:$0xff]  }
 0xd5b   :  { %3184 = vmatprep.subr.bf16.mxu0 %v8318_v38  ;;  %v8361_v38 = vld [vmem:[%s10799_s3 + $0x430] ss:$48 sps:$4 sm:$0xff]  }
 0xd5e   :  { %3185 = vmatpush1.bf16.msra.mxu0 %v8316_v40  ;;  %v8369_v40 = vld [vmem:[%s10799_s3 + $0x3d4] ss:$48 sps:$4 sm:$0xff]  }
 0xd5f   :  { %3186 = vmatprep.subr.bf16.mxu0 %v8324_v42  ;;  %v8367_v42 = vld [vmem:[%s10799_s3 + $0x3d0] ss:$48 sps:$4 sm:$0xff]  }
 0xd62   :  { %3187 = vmatpush1.bf16.msra.mxu0 %v8322_v44  ;;  %v8375_v44 = vld [vmem:[%s10799_s3 + $0x374] ss:$48 sps:$4 sm:$0xff]  }
 0xd63   :  { %3188 = vmatprep.subr.bf16.mxu0 %v8330_v46  ;;  %v8373_v46 = vld [vmem:[%s10799_s3 + $0x370] ss:$48 sps:$4 sm:$0xff]  }
 0xd66   :  { %3189 = vmatpush1.bf16.msra.mxu0 %v8328_v55  ;;  %v8381_v55 = vld [vmem:[%s10799_s3 + $0x314] ss:$48 sps:$4 sm:$0xff]  }
 0xd67   :  { %3190 = vmatprep.subr.bf16.mxu0 %v8336_v50  ;;  %v8379_v50 = vld [vmem:[%s10799_s3 + $0x310] ss:$48 sps:$4 sm:$0xff]  }
 0xd6a   :  { %3191 = vmatpush1.bf16.msra.mxu0 %v8334_v51  ;;  %v8387_v51 = vld [vmem:[%s10799_s3 + $0x5c4] ss:$48 sps:$4 sm:$0xff]  }
 0xd6b   :  { %3262 = vmatprep.subr.bf16.mxu0 %v8342_v11  ;;  %v8385_v11 = vld [vmem:[%s10799_s3 + $0x5c0] ss:$48 sps:$4 sm:$0xff]  }
 0xde0   :  { %v2621_v19 = vpop.xlane.xlu1 %2620  ;;  %v2619_v21 = vpop.xlane.xlu0 %2618 }
 0xde1   :  { %v2623_v22 = vmul.f32 0.0078125, %v2621_v19  ;;  %v2622_v23 = vmul.f32 0.0078125, %v2619_v21  ;;  %v8337_v19 = vld [vmem:[%s10799_s3 + $0x5b0] ss:$48 sps:$4 sm:$0xff]   ;;  %v8340_v21 = vld [vmem:[%s10799_s3 + $0x5b8] ss:$48 sps:$4 sm:$0xff]  }
 0xde3   :  { %v9636_v25 = vsub.f32 %v9605_v9, %v2623_v22  ;;  %v9639_v5 = vsub.f32 %v9607_v10, %v2622_v23  ;;  %v8345_v23 = vld [vmem:[%s10799_s3 + $0x554] ss:$48 sps:$4 sm:$0xff]  }
 0xde5   :  { %v2627_v26 = vmul.f32 %v9636_v25, %v9636_v25  ;;  %v2626_v27 = vmul.f32 %v9639_v5, %v9639_v5 }
 0xde7   :  { %2630 = vadd.xlane.f32.xlu1 %v2627_v26  ;;  %2628 = vadd.xlane.f32.xlu0 %v2626_v27  ;;  %v8346_v26 = vld [vmem:[%s10799_s3 + $0x558] ss:$48 sps:$4 sm:$0xff]   ;;  %v8351_v27 = vld [vmem:[%s10799_s3 + $0x4f4] ss:$48 sps:$4 sm:$0xff]  }
 0xe70   :  { %v2631_v54 = vpop.xlane.xlu1 %2630  ;;  %v2629_v59 = vpop.xlane.xlu0 %2628 }
 0xe71   :  { %v2633_v60 = vmul.f32 0.0078125, %v2631_v54  ;;  %v2632_v62 = vmul.f32 0.0078125, %v2629_v59  ;;  %v8388_v54 = vld [vmem:[%s10799_s3 + $0x5c8] ss:$48 sps:$4 sm:$0xff]   ;;  %v8393_v59 = vld [vmem:[%s10799_s3 + $0x564] ss:$48 sps:$4 sm:$0xff]  }
 0xe73   :  { %v2635_v2 = vadd.f32 1e-05, %v2633_v60  ;;  %v2634_v3 = vadd.f32 1e-05, %v2632_v62  ;;  %v8396_v60 = vld [vmem:[%s10799_s3 + $0x56c] ss:$48 sps:$4 sm:$0xff]  }
 0xe74   :  { %v8391_v62 = vld [vmem:[%s10799_s3 + $0x560] ss:$48 sps:$4 sm:$0xff]  }
 0xe75   :  { %8709 = vrsqrt.f32 %v2635_v2  ;;  %v8394_v2 = vld [vmem:[%s10799_s3 + $0x568] ss:$48 sps:$4 sm:$0xff]  }
 0xe76   :  { %8711 = vrsqrt.f32 %v2634_v3  ;;  %v8399_v3 = vld [vmem:[%s10799_s3 + $0x504] ss:$48 sps:$4 sm:$0xff]  }
 0xe82   :  { %v8710_v4 = vpop.eup %8709 }
 0xe83   :  { %v8712_v56 = vpop.eup %8711  ;;  %v2639_v61 = vmul.f32 %v8710_v4, %v9636_v25  ;;  %v8348_v25 = vld [vmem:[%s10799_s3 + $0x55c] ss:$48 sps:$4 sm:$0xff]  }
 0xe84   :  { %v2638_v63 = vmul.f32 %v8712_v56, %v9639_v5  ;;  %v8343_v5 = vld [vmem:[%s10799_s3 + $0x550] ss:$48 sps:$4 sm:$0xff]   ;;  %v8402_v4 = vld [vmem:[%s10799_s3 + $0x50c] ss:$48 sps:$4 sm:$0xff]   ;;  %v8400_v56 = vld [vmem:[%s10799_s3 + $0x508] ss:$48 sps:$4 sm:$0xff]  }
 0xe85   :  { %v2645_v14 = vmul.f32 %v6820_v7, %v2639_v61  ;;  %v8405_v61 = vld [vmem:[%s10799_s3 + $0x4a4] ss:$48 sps:$4 sm:$0xff]  }
 0xe86   :  { %v2644_v15 = vmul.f32 %v6820_v7, %v2638_v63  ;;  %v8397_v7 = vld [vmem:[%s10799_s3 + $0x500] ss:$48 sps:$4 sm:$0xff]   ;;  %v8408_v63 = vld [vmem:[%s10799_s3 + $0x4ac] ss:$48 sps:$4 sm:$0xff]  }
 0xe87   :  { %v2651_v16 = vadd.f32 %v6821_v12, %v2645_v14  ;;  %v8406_v14 = vld [vmem:[%s10799_s3 + $0x4a8] ss:$48 sps:$4 sm:$0xff]  }
 0xe88   :  { %v2650_v17 = vadd.f32 %v6821_v12, %v2644_v15  ;;  %v8403_v12 = vld [vmem:[%s10799_s3 + $0x4a0] ss:$48 sps:$4 sm:$0xff]   ;;  %v8411_v15 = vld [vmem:[%s10799_s3 + $0x444] ss:$48 sps:$4 sm:$0xff]  }
 0xe8a   :  { %v9737_v22 = vpack.c.bf16 %v2651_v16, %v2650_v17  ;;  %v8414_v16 = vld [vmem:[%s10799_s3 + $0x44c] ss:$48 sps:$4 sm:$0xff]   ;;  %v8409_v17 = vld [vmem:[%s10799_s3 + $0x440] ss:$48 sps:$4 sm:$0xff]  }
 0xe8c   :  { %3166 = vmatmul.mubr.bf16.vlgmr.msra.gmra.mxu1 %v9737_v22  ;;  %3209 = vmatmul.mubr.bf16.vlgmr.msra.gmra.mxu0 %v9737_v22 }
 0xe8d   :  { %3220 = vmatpush1.bf16.msra.mxu1 %v8337_v19  ;;  %3263 = vmatpush1.bf16.msra.mxu0 %v8340_v21  ;;  %v8412_v19 = vld [vmem:[%s10799_s3 + $0x448] ss:$48 sps:$4 sm:$0xff]   ;;  %v8417_v21 = vld [vmem:[%s10799_s3 + $0x3e4] ss:$48 sps:$4 sm:$0xff]  }
 0xe8e   :  { %3221 = vmatprep.subr.bf16.mxu1 %v8345_v23  ;;  %3264 = vmatprep.subr.bf16.mxu0 %v8348_v25  ;;  %v8420_v23 = vld [vmem:[%s10799_s3 + $0x3ec] ss:$48 sps:$4 sm:$0xff]   ;;  %v8415_v25 = vld [vmem:[%s10799_s3 + $0x3e0] ss:$48 sps:$4 sm:$0xff]  }
 0xe8f   :  { %3251 = vmatprep.mubr.bf16.mxu1 %v8825_v1  ;;  %3294 = vmatprep.mubr.bf16.mxu0 %v8825_v1 }
 0xe91   :  { %3222 = vmatpush1.bf16.msra.mxu1 %v8343_v5  ;;  %3265 = vmatpush1.bf16.msra.mxu0 %v8346_v26  ;;  %v8418_v5 = vld [vmem:[%s10799_s3 + $0x3e8] ss:$48 sps:$4 sm:$0xff]   ;;  %v8423_v26 = vld [vmem:[%s10799_s3 + $0x384] ss:$48 sps:$4 sm:$0xff]  }
 0xe92   :  { %3223 = vmatprep.subr.bf16.mxu1 %v8351_v27  ;;  %3266 = vmatprep.subr.bf16.mxu0 %v8354_v29  ;;  %v8426_v27 = vld [vmem:[%s10799_s3 + $0x38c] ss:$48 sps:$4 sm:$0xff]   ;;  %v8421_v29 = vld [vmem:[%s10799_s3 + $0x380] ss:$48 sps:$4 sm:$0xff]  }
 0xe95   :  { %3224 = vmatpush1.bf16.msra.mxu1 %v8349_v30  ;;  %3267 = vmatpush1.bf16.msra.mxu0 %v8352_v31  ;;  %v8424_v30 = vld [vmem:[%s10799_s3 + $0x388] ss:$48 sps:$4 sm:$0xff]   ;;  %v8429_v31 = vld [vmem:[%s10799_s3 + $0x324] ss:$48 sps:$4 sm:$0xff]  }
 0xe96   :  { %3225 = vmatprep.subr.bf16.mxu1 %v8357_v32  ;;  %3268 = vmatprep.subr.bf16.mxu0 %v8360_v33  ;;  %v8432_v32 = vld [vmem:[%s10799_s3 + $0x32c] ss:$48 sps:$4 sm:$0xff]   ;;  %v8427_v33 = vld [vmem:[%s10799_s3 + $0x320] ss:$48 sps:$4 sm:$0xff]  }
 0xe99   :  { %3226 = vmatpush1.bf16.msra.mxu1 %v8355_v34  ;;  %3269 = vmatpush1.bf16.msra.mxu0 %v8358_v35  ;;  %v8430_v34 = vld [vmem:[%s10799_s3 + $0x328] ss:$48 sps:$4 sm:$0xff]  }
 0xe9a   :  { %3227 = vmatprep.subr.bf16.mxu1 %v8363_v36  ;;  %3270 = vmatprep.subr.bf16.mxu0 %v8366_v37 }
 0xe9d   :  { %3228 = vmatpush1.bf16.msra.mxu1 %v8361_v38  ;;  %3271 = vmatpush1.bf16.msra.mxu0 %v8364_v39 }
 0xe9e   :  { %3229 = vmatprep.subr.bf16.mxu1 %v8369_v40  ;;  %3272 = vmatprep.subr.bf16.mxu0 %v8372_v41 }
 0xea1   :  { %3230 = vmatpush1.bf16.msra.mxu1 %v8367_v42  ;;  %3273 = vmatpush1.bf16.msra.mxu0 %v8370_v43 }
 0xea2   :  { %3231 = vmatprep.subr.bf16.mxu1 %v8375_v44  ;;  %3274 = vmatprep.subr.bf16.mxu0 %v8378_v45 }
 0xea5   :  { %3232 = vmatpush1.bf16.msra.mxu1 %v8373_v46  ;;  %3275 = vmatpush1.bf16.msra.mxu0 %v8376_v47 }
 0xea6   :  { %3233 = vmatprep.subr.bf16.mxu1 %v8381_v55  ;;  %3276 = vmatprep.subr.bf16.mxu0 %v8384_v49 }
 0xea9   :  { %3234 = vmatpush1.bf16.msra.mxu1 %v8379_v50  ;;  %3277 = vmatpush1.bf16.msra.mxu0 %v8382_v6 }
 0xeaa   :  { %3305 = vmatprep.subr.bf16.mxu1 %v8387_v51  ;;  %3348 = vmatprep.subr.bf16.mxu0 %v8390_v53 }
 0xeac   :  { %3252 = vmatmul.mubr.bf16.vlgmr.msra.gmra.mxu1 %v9737_v22  ;;  %3295 = vmatmul.mubr.bf16.vlgmr.msra.gmra.mxu0 %v9737_v22 }
 0xead   :  { %3306 = vmatpush1.bf16.msra.mxu1 %v8385_v11  ;;  %3349 = vmatpush1.bf16.msra.mxu0 %v8388_v54 }
 0xeae   :  { %3307 = vmatprep.subr.bf16.mxu1 %v8393_v59  ;;  %3350 = vmatprep.subr.bf16.mxu0 %v8396_v60 }
 0xeaf   :  { %3337 = vmatprep.mubr.bf16.mxu1 %v8825_v1  ;;  %3380 = vmatprep.mubr.bf16.mxu0 %v8825_v1 }
 0xeb1   :  { %3308 = vmatpush1.bf16.msra.mxu1 %v8391_v62  ;;  %3351 = vmatpush1.bf16.msra.mxu0 %v8394_v2 }
 0xeb2   :  { %3309 = vmatprep.subr.bf16.mxu1 %v8399_v3  ;;  %3352 = vmatprep.subr.bf16.mxu0 %v8402_v4 }
 0xeb5   :  { %3310 = vmatpush1.bf16.msra.mxu1 %v8397_v7  ;;  %3353 = vmatpush1.bf16.msra.mxu0 %v8400_v56 }
 0xeb6   :  { %3311 = vmatprep.subr.bf16.mxu1 %v8405_v61  ;;  %3354 = vmatprep.subr.bf16.mxu0 %v8408_v63 }
 0xeb9   :  { %3312 = vmatpush1.bf16.msra.mxu1 %v8403_v12  ;;  %3355 = vmatpush1.bf16.msra.mxu0 %v8406_v14 }
 0xeba   :  { %3313 = vmatprep.subr.bf16.mxu1 %v8411_v15  ;;  %3356 = vmatprep.subr.bf16.mxu0 %v8414_v16 }
 0xebd   :  { %3314 = vmatpush1.bf16.msra.mxu1 %v8409_v17  ;;  %3357 = vmatpush1.bf16.msra.mxu0 %v8412_v19 }
 0xebe   :  { %3315 = vmatprep.subr.bf16.mxu1 %v8417_v21  ;;  %3358 = vmatprep.subr.bf16.mxu0 %v8420_v23 }
 0xec1   :  { %3316 = vmatpush1.bf16.msra.mxu1 %v8415_v25  ;;  %3359 = vmatpush1.bf16.msra.mxu0 %v8418_v5 }
 0xec2   :  { %3317 = vmatprep.subr.bf16.mxu1 %v8423_v26  ;;  %3360 = vmatprep.subr.bf16.mxu0 %v8426_v27 }
 0xec5   :  { %3318 = vmatpush1.bf16.msra.mxu1 %v8421_v29  ;;  %3361 = vmatpush1.bf16.msra.mxu0 %v8424_v30 }
 0xec6   :  { %3319 = vmatprep.subr.bf16.mxu1 %v8429_v31  ;;  %3362 = vmatprep.subr.bf16.mxu0 %v8432_v32 }
 0xec9   :  { %3320 = vmatpush1.bf16.msra.mxu1 %v8427_v33  ;;  %3363 = vmatpush1.bf16.msra.mxu0 %v8430_v34 }
 0xecc   :  { %3338 = vmatmul.mubr.bf16.vlgmr.msra.gmra.mxu1 %v9737_v22  ;;  %3381 = vmatmul.mubr.bf16.vlgmr.msra.gmra.mxu0 %v9737_v22 }
 0xf4c   :  { %v3167_v35 = vpop.f32.mrf.mxu1  ;;  %v3210_v36 = vpop.f32.mrf.mxu0 }
 0xf4d   :  { %7765 = vmatprep.mubr.f32.mxu1 %v3167_v35 }
 0xf4e   :  { %v3212_v37 = vpop.f32.mrf.mxu0  ;;  %v3169_v39 = vpop.f32.mrf.mxu1 }
 0xf50   :  { %v3214_v38 = vpop.f32.mrf.mxu0  ;;  %v3171_v42 = vpop.f32.mrf.mxu1 }
 0xf52   :  { %v3216_v40 = vpop.f32.mrf.mxu0  ;;  %v3173_v45 = vpop.f32.mrf.mxu1 }
 0xf6c   :  { %v3296_v41 = vpop.f32.mrf.mxu0  ;;  %v3253_v47 = vpop.f32.mrf.mxu1 }
 0xf6e   :  { %v3298_v43 = vpop.f32.mrf.mxu0  ;;  %v3255_v55 = vpop.f32.mrf.mxu1 }
 0xf70   :  { %v3300_v44 = vpop.f32.mrf.mxu0  ;;  %v3257_v22 = vpop.f32.mrf.mxu1 }
 0xf72   :  { %v3302_v46 = vpop.f32.mrf.mxu0  ;;  %v3259_v49 = vpop.f32.mrf.mxu1 }
 0xf73   :  { %7749 = vmatprep.subr.mxu1 %v3302_v46 }
 0xf74   :  { %7750 = vmatpush3.xpose.msra.mxu1 %v3302_v46 }
 0xf75   :  { %7751 = vmatprep.subr.mxu1 %v3298_v43 }
 0xf78   :  { %7752 = vmatpush3.xpose.msra.mxu1 %v3298_v43 }
 0xf79   :  { %7753 = vmatprep.subr.mxu1 %v3300_v44 }
 0xf7c   :  { %7754 = vmatpush3.xpose.msra.mxu1 %v3300_v44 }
 0xf7d   :  { %7755 = vmatprep.subr.mxu1 %v3296_v41 }
 0xf80   :  { %7756 = vmatpush3.xpose.msra.mxu1 %v3296_v41 }
 0xf81   :  { %7757 = vmatprep.subr.mxu1 %v3259_v49 }
 0xf84   :  { %7758 = vmatpush3.xpose.msra.mxu1 %v3259_v49 }
 0xf85   :  { %7759 = vmatprep.subr.mxu1 %v3255_v55 }
 0xf88   :  { %7760 = vmatpush3.xpose.msra.mxu1 %v3255_v55 }
 0xf89   :  { %7761 = vmatprep.subr.mxu1 %v3257_v22 }
 0xf8c   :  { %v3382_v50 = vpop.f32.mrf.mxu0  ;;  %7762 = vmatpush3.xpose.msra.mxu1 %v3257_v22  ;;  %v3339_v6 = vpop.f32.mrf.mxu1 }
 0xf8d   :  { %7763 = vmatprep.subr.mxu1 %v3253_v47 }
 0xf8e   :  { %v3384_v51 = vpop.f32.mrf.mxu0  ;;  %v3341_v11 = vpop.f32.mrf.mxu1 }
 0xf90   :  { %v3386_v53 = vpop.f32.mrf.mxu0  ;;  %7764 = vmatpush3.xpose.msra.mxu1 %v3253_v47  ;;  %v3343_v59 = vpop.f32.mrf.mxu1 }
 0xf91   :  { %7825 = vmatprep.subr.bf16.mxu1 %v8826_v20 }
 0xf92   :  { %v3388_v54 = vpop.f32.mrf.mxu0  ;;  %v3345_v60 = vpop.f32.mrf.mxu1 }
 0xf93   :  { %7766 = vmatmul.mubr.f32.vlgmr.msra.gmra.mxu1 %v3171_v42  ;;  %7777 = vmatprep.subr.mxu0 %v3388_v54 }
 0xf94   :  { %7768 = vmatprep.mubr.f32.mxu1 %v3169_v39  ;;  %7778 = vmatpush3.msra.mxu0 %v3388_v54 }
 0xf95   :  { %7779 = vmatprep.subr.mxu0 %v3384_v51 }
 0xf96   :  { %7780 = vmatpush3.msra.mxu0 %v3384_v51 }
 0xf97   :  { %7769 = vmatmul.mubr.f32.gmra.mxu1 %v3173_v45  ;;  %7781 = vmatprep.subr.mxu0 %v3386_v53 }
 0xf98   :  { %7771 = vmatprep.mubr.f32.mxu1 %v3210_v36  ;;  %7782 = vmatpush3.msra.mxu0 %v3386_v53 }
 0xf99   :  { %7783 = vmatprep.subr.mxu0 %v3382_v50 }
 0xf9a   :  { %7784 = vmatpush3.msra.mxu0 %v3382_v50 }
 0xf9b   :  { %7772 = vmatmul.mubr.f32.gmra.mxu1 %v3214_v38  ;;  %7785 = vmatprep.subr.mxu0 %v3345_v60 }
 0xf9c   :  { %7774 = vmatprep.mubr.f32.mxu1 %v3212_v37  ;;  %7786 = vmatpush3.msra.mxu0 %v3345_v60 }
 0xf9d   :  { %7787 = vmatprep.subr.mxu0 %v3341_v11 }
 0xf9e   :  { %7788 = vmatpush3.msra.mxu0 %v3341_v11 }
 0xf9f   :  { %7775 = vmatmul.mubr.f32.gmra.mxu1 %v3216_v40  ;;  %7789 = vmatprep.subr.mxu0 %v3343_v59 }
 0xfa0   :  { %7790 = vmatpush3.msra.mxu0 %v3343_v59  ;;  %7841 = vmatprep.mubr.msk.bf16.mxu1 %vm8827_vm1, %v8826_v20 }
 0xfa1   :  { %7791 = vmatprep.subr.mxu0 %v3339_v6 }
 0xfa2   :  { %7792 = vmatpush3.msra.mxu0 %v3339_v6 }
 0xfa3   :  { %7805 = vmatprep.subr.bf16.mxu0 %v8826_v20 }
0x1053   :  { %v7767_v62 = vpop.f32.mrf.mxu1 }
0x1054   :  { %v3497_v2 = vmul.f32 0.125, %v7767_v62 }
0x1055   :  { %v3457_v3 = vpop.f32.mrf.mxu1 }
0x1056   :  { %v3496_v4 = vmul.f32 0.125, %v3457_v3  ;;  %v3505_v7 = vadd.f32 %v3497_v2, %v9312_v48 }
0x1057   :  { %v7770_v56 = vpop.f32.mrf.mxu1 }
0x1058   :  { %v3499_v61 = vmul.f32 0.125, %v7770_v56  ;;  %v3515_v63 = vsel %vm135_vm0, %v3505_v7, -inf  ;;  %v3504_v12 = vadd.f32 %v3496_v4, %v9315_v52 }
0x1059   :  { %3516 = vmax.xlane.f32.xlu1 %v3515_v63  ;;  %v3467_v14 = vpop.f32.mrf.mxu1 }
0x105a   :  { %v3498_v15 = vmul.f32 0.125, %v3467_v14  ;;  %v3512_v16 = vsel %vm135_vm0, %v3504_v12, -inf  ;;  %v3507_v17 = vadd.f32 %v3499_v61, %v9319_v0 }
0x105b   :  { %3513 = vmax.xlane.f32.xlu0 %v3512_v16  ;;  %v7773_v19 = vpop.f32.mrf.mxu1 }
0x105c   :  { %v3501_v21 = vmul.f32 0.125, %v7773_v19  ;;  %v3521_v23 = vsel %vm135_vm0, %v3507_v17, -inf  ;;  %v3506_v25 = vadd.f32 %v3498_v15, %v9323_v8 }
0x105d   :  { %3522 = vmax.xlane.f32.xlu1 %v3521_v23  ;;  %v3477_v5 = vpop.f32.mrf.mxu1 }
0x105e   :  { %v3500_v26 = vmul.f32 0.125, %v3477_v5  ;;  %v3518_v27 = vsel %vm135_vm0, %v3506_v25, -inf  ;;  %v3509_v29 = vadd.f32 %v3501_v21, %v9327_v13 }
0x105f   :  { %3519 = vmax.xlane.f32.xlu0 %v3518_v27  ;;  %v7776_v30 = vpop.f32.mrf.mxu1 }
0x1060   :  { %v3503_v31 = vmul.f32 0.125, %v7776_v30  ;;  %v3527_v32 = vsel %vm135_vm0, %v3509_v29, -inf  ;;  %v3508_v33 = vadd.f32 %v3500_v26, %v9331_v18 }
0x1061   :  { %3528 = vmax.xlane.f32.xlu1 %v3527_v32  ;;  %v3487_v34 = vpop.f32.mrf.mxu1  ;;  %v8437_v32 = vld [vmem:[%s10800_s4 + $0x170] sm:$0xff]  }
0x1062   :  { %v3502_v35 = vmul.f32 0.125, %v3487_v34  ;;  %v3524_v36 = vsel %vm135_vm0, %v3508_v33, -inf  ;;  %v3511_v37 = vadd.f32 %v3503_v31, %v9335_v24  ;;  %v8435_v31 = vld [vmem:[%s10800_s4 + $0x178] sm:$0xff]   ;;  %v8441_v34 = vld [vmem:[%s10800_s4 + $0x160] sm:$0xff]  }
0x1063   :  { %3525 = vmax.xlane.f32.xlu0 %v3524_v36  ;;  %7826 = vmatpush3.bf16.msra.mxu1 %v8435_v31  ;;  %v8445_v36 = vld [vmem:[%s10800_s4 + $0x150] sm:$0xff]  }
0x1064   :  { %v3533_v38 = vsel %vm135_vm0, %v3511_v37, -inf  ;;  %v3510_v39 = vadd.f32 %v3502_v35, %v9339_v28  ;;  %7827 = vmatprep.subr.bf16.mxu1 %v8826_v20  ;;  %v8443_v35 = vld [vmem:[%s10800_s4 + $0x158] sm:$0xff]   ;;  %v8453_v31 = vld [vmem:[%s10800_s4 + $0x1f0] sm:$0xff]  }
0x1065   :  { %3534 = vmax.xlane.f32.xlu1 %v3533_v38 }
0x1066   :  { %v3530_v40 = vsel %vm135_vm0, %v3510_v39, -inf }
0x1067   :  { %3531 = vmax.xlane.f32.xlu0 %v3530_v40  ;;  %7828 = vmatpush3.bf16.msra.mxu1 %v8437_v32  ;;  %v8454_v32 = vld [vmem:[%s10800_s4 + $0x1a0] sm:$0xff]  }
0x1068   :  { %7829 = vmatprep.subr.bf16.mxu1 %v8826_v20 }
0x10e2   :  { %v3517_v41 = vpop.xlane.xlu1 %3516 }
0x10e3   :  { %v3537_v42 = vsub.f32 %v3505_v7, %v3517_v41 }
0x10e4   :  { %v3514_v43 = vpop.xlane.xlu0 %3513 }
0x10e5   :  { %v3546_v44 = vmul.f32 1.442695, %v3537_v42  ;;  %v3536_v45 = vsub.f32 %v3504_v12, %v3514_v43 }
0x10e6   :  { %v3523_v46 = vpop.xlane.xlu1 %3522 }
0x10e7   :  { %8713 = vpow2.f32 %v3546_v44  ;;  %v3544_v47 = vmul.f32 1.442695, %v3536_v45  ;;  %v3539_v55 = vsub.f32 %v3507_v17, %v3523_v46 }
0x10e8   :  { %v3520_v22 = vpop.xlane.xlu0 %3519 }
0x10e9   :  { %8715 = vpow2.f32 %v3544_v47  ;;  %v3550_v49 = vmul.f32 1.442695, %v3539_v55  ;;  %v3538_v50 = vsub.f32 %v3506_v25, %v3520_v22  ;;  %v8433_v55 = vld [vmem:[%s10800_s4 + $0x138] sm:$0xff]  }
0x10ea   :  { %v3529_v6 = vpop.xlane.xlu1 %3528 }
0x10eb   :  { %8717 = vpow2.f32 %v3550_v49  ;;  %v3548_v51 = vmul.f32 1.442695, %v3538_v50  ;;  %v3541_v53 = vsub.f32 %v3509_v29, %v3529_v6 }
0x10ec   :  { %v3526_v11 = vpop.xlane.xlu0 %3525 }
0x10ed   :  { %8719 = vpow2.f32 %v3548_v51  ;;  %v3554_v54 = vmul.f32 1.442695, %v3541_v53  ;;  %v3540_v59 = vsub.f32 %v3508_v33, %v3526_v11  ;;  %v8439_v33 = vld [vmem:[%s10800_s4 + $0x168] sm:$0xff]   ;;  %v8434_v51 = vld [vmem:[%s10800_s4 + $0x130] sm:$0xff]  }
0x10ee   :  { %v3535_v60 = vpop.xlane.xlu1 %3534  ;;  %7830 = vmatpush3.bf16.msra.mxu1 %v8439_v33  ;;  %v8455_v33 = vld [vmem:[%s10800_s4 + $0x1e8] sm:$0xff]  }
0x10ef   :  { %8721 = vpow2.f32 %v3554_v54  ;;  %v3552_v62 = vmul.f32 1.442695, %v3540_v59  ;;  %v3543_v2 = vsub.f32 %v3511_v37, %v3535_v60  ;;  %7831 = vmatprep.subr.bf16.mxu1 %v8826_v20  ;;  %v8436_v60 = vld [vmem:[%s10800_s4 + $0x128] sm:$0xff]  }
0x10f0   :  { %v3532_v3 = vpop.xlane.xlu0 %3531 }
0x10f1   :  { %8723 = vpow2.f32 %v3552_v62  ;;  %v3558_v4 = vmul.f32 1.442695, %v3543_v2  ;;  %v3542_v7 = vsub.f32 %v3510_v39, %v3532_v3 }
0x10f2   :  { %7832 = vmatpush3.bf16.msra.mxu1 %v8441_v34  ;;  %v8456_v34 = vld [vmem:[%s10800_s4 + $0x198] sm:$0xff]  }
0x10f3   :  { %8725 = vpow2.f32 %v3558_v4  ;;  %v3556_v56 = vmul.f32 1.442695, %v3542_v7  ;;  %7833 = vmatprep.subr.bf16.mxu1 %v8826_v20  ;;  %v8438_v7 = vld [vmem:[%s10800_s4 + $0x120] sm:$0xff]  }
0x10f4   :  { %v9949_v61 = vpop.eup %8713 }
0x10f5   :  { %8727 = vpow2.f32 %v3556_v56  ;;  %v3563_v63 = vsel %vm135_vm0, %v9949_v61, 0.0 }
0x10f6   :  { %v8716_v12 = vpop.eup %8715  ;;  %3564 = vadd.xlane.f32.xlu1 %v3563_v63  ;;  %7834 = vmatpush3.bf16.msra.mxu1 %v8443_v35  ;;  %v8442_v63 = vld [vmem:[%s10800_s4 + $0x110] sm:$0xff]   ;;  %v8457_v35 = vld [vmem:[%s10800_s4 + $0x1e0] sm:$0xff]  }
0x10f7   :  { %v3560_v14 = vsel %vm135_vm0, %v8716_v12, 0.0  ;;  %7835 = vmatprep.subr.bf16.mxu1 %v8826_v20 }
0x10f8   :  { %v9954_v15 = vpop.eup %8717  ;;  %3561 = vadd.xlane.f32.xlu0 %v3560_v14  ;;  %v8446_v14 = vld [vmem:[%s10800_s4 + $0x100] sm:$0xff]  }
0x10f9   :  { %v3569_v16 = vsel %vm135_vm0, %v9954_v15, 0.0 }
0x10fa   :  { %v8720_v17 = vpop.eup %8719  ;;  %3570 = vadd.xlane.f32.xlu1 %v3569_v16  ;;  %7836 = vmatpush3.bf16.msra.mxu1 %v8445_v36  ;;  %v8448_v16 = vld [vmem:[%s10800_s4 + $0x140] sm:$0xff]   ;;  %v8458_v36 = vld [vmem:[%s10800_s4 + $0x190] sm:$0xff]  }
0x10fb   :  { %v3566_v19 = vsel %vm135_vm0, %v8720_v17, 0.0  ;;  %7837 = vmatprep.subr.bf16.mxu1 %v8826_v20 }
0x10fc   :  { %v9959_v21 = vpop.eup %8721  ;;  %3567 = vadd.xlane.f32.xlu0 %v3566_v19 }
0x10fd   :  { %v3575_v23 = vsel %vm135_vm0, %v9959_v21, 0.0 }
0x10fe   :  { %v8724_v25 = vpop.eup %8723  ;;  %3576 = vadd.xlane.f32.xlu1 %v3575_v23 }
0x10ff   :  { %v3572_v5 = vsel %vm135_vm0, %v8724_v25, 0.0 }
0x1100   :  { %v9964_v26 = vpop.eup %8725  ;;  %3573 = vadd.xlane.f32.xlu0 %v3572_v5 }
0x1101   :  { %v3581_v27 = vsel %vm135_vm0, %v9964_v26, 0.0 }
0x1102   :  { %v9968_v29 = vpop.eup %8727  ;;  %3582 = vadd.xlane.f32.xlu1 %v3581_v27  ;;  %v8451_v27 = vld [vmem:[%s10800_s4 + $0x1f8] sm:$0xff]  }
0x1103   :  { %v3578_v30 = vsel %vm135_vm0, %v9968_v29, 0.0 }
0x1104   :  { %3579 = vadd.xlane.f32.xlu0 %v3578_v30  ;;  %v8452_v30 = vld [vmem:[%s10800_s4 + $0x1a8] sm:$0xff]  }
0x117f   :  { %v3565_v37 = vpop.xlane.xlu1 %3564 }
0x1180   :  { %8729 = vrcp.f32 %v3565_v37  ;;  %v8459_v37 = vld [vmem:[%s10800_s4 + $0x1d8] sm:$0xff]  }
0x1181   :  { %v3562_v38 = vpop.xlane.xlu0 %3561 }
0x1182   :  { %8731 = vrcp.f32 %v3562_v38 }
0x1183   :  { %v3571_v39 = vpop.xlane.xlu1 %3570 }
0x1184   :  { %8733 = vrcp.f32 %v3571_v39  ;;  %v8460_v39 = vld [vmem:[%s10800_s4 + $0x188] sm:$0xff]  }
0x1185   :  { %v3568_v40 = vpop.xlane.xlu0 %3567 }
0x1186   :  { %8735 = vrcp.f32 %v3568_v40  ;;  %v8461_v40 = vld [vmem:[%s10800_s4 + $0x1d0] sm:$0xff]  }
0x1187   :  { %v3577_v41 = vpop.xlane.xlu1 %3576 }
0x1188   :  { %8737 = vrcp.f32 %v3577_v41 }
0x1189   :  { %v3574_v42 = vpop.xlane.xlu0 %3573 }
0x118a   :  { %8739 = vrcp.f32 %v3574_v42  ;;  %v8462_v42 = vld [vmem:[%s10800_s4 + $0x180] sm:$0xff]  }
0x118b   :  { %v3583_v43 = vpop.xlane.xlu1 %3582 }
0x118c   :  { %8741 = vrcp.f32 %v3583_v43  ;;  %v8463_v43 = vld [vmem:[%s10800_s4 + $0x1c8] sm:$0xff]  }
0x118d   :  { %v3580_v44 = vpop.xlane.xlu0 %3579  ;;  %v8730_v45 = vpop.eup %8729 }
0x118e   :  { %8743 = vrcp.f32 %v3580_v44  ;;  %v3593_v22 = vmul.f32 %v8730_v45, %v9949_v61  ;;  %v8440_v61 = vld [vmem:[%s10800_s4 + $0x118] sm:$0xff]   ;;  %v8464_v45 = vld [vmem:[%s10800_s4 + $0x1c0] sm:$0xff]  }
0x118f   :  { %v8732_v46 = vpop.eup %8731 }
0x1190   :  { %v3592_v47 = vmul.f32 %v8732_v46, %v8716_v12  ;;  %v8444_v12 = vld [vmem:[%s10800_s4 + $0x108] sm:$0xff]  }
0x1191   :  { %v8734_v49 = vpop.eup %8733 }
0x1192   :  { %7793 = vmatprep.mubr.msk.f32.mxu0 %vm135_vm0, %v3592_v47  ;;  %v3595_v53 = vmul.f32 %v8734_v49, %v9954_v15  ;;  %v8447_v15 = vld [vmem:[%s10800_s4 + $0x148] sm:$0xff]  }
0x1193   :  { %v8736_v50 = vpop.eup %8735  ;;  %7794 = vmatmul.mubr.msk.f32.vlgmr.msra.gmra.mxu0 %vm135_vm0, %v3593_v22  ;;  %7838 = vmatpush3.bf16.msra.mxu1 %v8447_v15 }
0x1194   :  { %v3594_v6 = vmul.f32 %v8736_v50, %v8720_v17  ;;  %7806 = vmatpush3.bf16.msra.mxu0 %v8433_v55  ;;  %7839 = vmatprep.subr.bf16.mxu1 %v8826_v20 }
0x1195   :  { %7807 = vmatprep.subr.bf16.mxu0 %v8826_v20  ;;  %v8738_v11 = vpop.eup %8737 }
0x1196   :  { %7796 = vmatprep.mubr.msk.f32.mxu0 %vm135_vm0, %v3594_v6  ;;  %v3597_v62 = vmul.f32 %v8738_v11, %v9959_v21  ;;  %v8449_v21 = vld [vmem:[%s10800_s4 + $0x1b8] sm:$0xff]  }
0x1197   :  { %v8740_v54 = vpop.eup %8739  ;;  %7797 = vmatmul.mubr.msk.f32.gmra.mxu0 %vm135_vm0, %v3595_v53  ;;  %7840 = vmatpush3.bf16.msra.mxu1 %v8448_v16 }
0x1198   :  { %v3596_v59 = vmul.f32 %v8740_v54, %v8724_v25  ;;  %7808 = vmatpush3.bf16.msra.mxu0 %v8434_v51  ;;  %7865 = vmatprep.subr.bf16.mxu1 %v8826_v20 }
0x1199   :  { %7809 = vmatprep.subr.bf16.mxu0 %v8826_v20  ;;  %v8742_v2 = vpop.eup %8741 }
0x119a   :  { %7799 = vmatprep.mubr.msk.f32.mxu0 %vm135_vm0, %v3596_v59  ;;  %v3599_v56 = vmul.f32 %v8742_v2, %v9964_v26  ;;  %v8450_v26 = vld [vmem:[%s10800_s4 + $0x1b0] sm:$0xff]  }
0x119b   :  { %v8744_v3 = vpop.eup %8743  ;;  %7800 = vmatmul.mubr.msk.f32.gmra.mxu0 %vm135_vm0, %v3597_v62 }
0x119c   :  { %v3598_v4 = vmul.f32 %v8744_v3, %v9968_v29  ;;  %7810 = vmatpush3.bf16.msra.mxu0 %v8436_v60 }
0x119d   :  { %7811 = vmatprep.subr.bf16.mxu0 %v8826_v20 }
0x119e   :  { %7802 = vmatprep.mubr.msk.f32.mxu0 %vm135_vm0, %v3598_v4 }
0x119f   :  { %7803 = vmatmul.mubr.msk.f32.gmra.mxu0 %vm135_vm0, %v3599_v56 }
0x11a0   :  { %7812 = vmatpush3.bf16.msra.mxu0 %v8438_v7  ;;  %7821 = vmatprep.mubr.msk.bf16.mxu0 %vm8827_vm1, %v8826_v20 }
0x11a1   :  { %7813 = vmatprep.subr.bf16.mxu0 %v8826_v20 }
0x11a4   :  { %7814 = vmatpush3.bf16.msra.mxu0 %v8440_v61 }
0x11a5   :  { %7815 = vmatprep.subr.bf16.mxu0 %v8826_v20 }
0x11a8   :  { %7816 = vmatpush3.bf16.msra.mxu0 %v8442_v63 }
0x11a9   :  { %7817 = vmatprep.subr.bf16.mxu0 %v8826_v20 }
0x11ac   :  { %7818 = vmatpush3.bf16.msra.mxu0 %v8444_v12 }
0x11ad   :  { %7819 = vmatprep.subr.bf16.mxu0 %v8826_v20 }
0x11b0   :  { %7820 = vmatpush3.bf16.msra.mxu0 %v8446_v14 }
0x11b1   :  { %7845 = vmatprep.subr.bf16.mxu0 %v8826_v20 }
0x1253   :  { %v7795_v17 = vpop.f32.mrf.mxu0 }
0x1255   :  { %v3690_v19 = vpop.f32.mrf.mxu0 }
0x1256   :  { %v3729_v23 = vpack.c.bf16 %v7795_v17, %v3690_v19 }
0x1257   :  { %v7798_v25 = vpop.f32.mrf.mxu0 }
0x1258   :  { %7822 = vmatmul.mubr.bf16.vlgmr.msra.gmra.mxu0 %v3729_v23 }
0x1259   :  { %7846 = vmatpush3.bf16.msra.mxu0 %v8449_v21  ;;  %v3700_v5 = vpop.f32.mrf.mxu0  ;;  %7861 = vmatprep.mubr.msk.bf16.mxu0 %vm8827_vm1, %v8826_v20 }
0x125a   :  { %v3821_v29 = vpack.c.bf16 %v7798_v25, %v3700_v5  ;;  %7847 = vmatprep.subr.bf16.mxu0 %v8826_v20 }
0x125b   :  { %v7801_v38 = vpop.f32.mrf.mxu0 }
0x125c   :  { %7842 = vmatmul.mubr.bf16.vlgmr.msra.gmra.mxu1 %v3821_v29 }
0x125d   :  { %7848 = vmatpush3.bf16.msra.mxu0 %v8450_v26  ;;  %7866 = vmatpush3.bf16.msra.mxu1 %v8451_v27  ;;  %v3710_v41 = vpop.f32.mrf.mxu0 }
0x125e   :  { %7849 = vmatprep.subr.bf16.mxu0 %v8826_v20  ;;  %7867 = vmatprep.subr.bf16.mxu1 %v8826_v20  ;;  %v3913_v46 = vpack.c.bf16 %v7801_v38, %v3710_v41  ;;  %v6958_v41 = vld [vmem:[%s10803_s7 + $0x8] ss:$0 sm:$0xff] }
0x125f   :  { %7881 = vmatprep.mubr.msk.bf16.mxu1 %vm8827_vm1, %v8826_v20  ;;  %v7804_v44 = vpop.f32.mrf.mxu0 }
0x1261   :  { %7850 = vmatpush3.bf16.msra.mxu0 %v8452_v30  ;;  %7868 = vmatpush3.bf16.msra.mxu1 %v8453_v31  ;;  %v3720_v47 = vpop.f32.mrf.mxu0  ;;  %v8466_v30 = vld [vmem:[%s10801_s5 + $0x50] sm:$0xff]   ;;  %v8467_v31 = vld [vmem:[%s10801_s5 + $0x48] sm:$0xff]  }
0x1262   :  { %7851 = vmatprep.subr.bf16.mxu0 %v8826_v20  ;;  %7869 = vmatprep.subr.bf16.mxu1 %v8826_v20  ;;  %v4005_v55 = vpack.c.bf16 %v7804_v44, %v3720_v47 }
0x1265   :  { %7852 = vmatpush3.bf16.msra.mxu0 %v8454_v32  ;;  %7870 = vmatpush3.bf16.msra.mxu1 %v8455_v33  ;;  %v8468_v32 = vld [vmem:[%s10801_s5 + $0x40] sm:$0xff]  }
0x1266   :  { %7853 = vmatprep.subr.bf16.mxu0 %v8826_v20  ;;  %7871 = vmatprep.subr.bf16.mxu1 %v8826_v20 }
0x1269   :  { %7854 = vmatpush3.bf16.msra.mxu0 %v8456_v34  ;;  %7872 = vmatpush3.bf16.msra.mxu1 %v8457_v35 }
0x126a   :  { %7855 = vmatprep.subr.bf16.mxu0 %v8826_v20  ;;  %7873 = vmatprep.subr.bf16.mxu1 %v8826_v20 }
0x126d   :  { %7856 = vmatpush3.bf16.msra.mxu0 %v8458_v36  ;;  %7874 = vmatpush3.bf16.msra.mxu1 %v8459_v37 }
0x126e   :  { %7857 = vmatprep.subr.bf16.mxu0 %v8826_v20  ;;  %7875 = vmatprep.subr.bf16.mxu1 %v8826_v20 }
0x1271   :  { %7858 = vmatpush3.bf16.msra.mxu0 %v8460_v39  ;;  %7876 = vmatpush3.bf16.msra.mxu1 %v8461_v40 }
0x1272   :  { %7859 = vmatprep.subr.bf16.mxu0 %v8826_v20  ;;  %7877 = vmatprep.subr.bf16.mxu1 %v8826_v20 }
0x1275   :  { %7860 = vmatpush3.bf16.msra.mxu0 %v8462_v42  ;;  %7878 = vmatpush3.bf16.msra.mxu1 %v8463_v43 }
0x1276   :  { %7879 = vmatprep.subr.bf16.mxu1 %v8826_v20  ;;  %7885 = vmatprep.subr.bf16.mxu0 %v8826_v20 }
0x1278   :  { %7862 = vmatmul.mubr.bf16.vlgmr.msra.gmra.mxu0 %v3913_v46 }
0x1279   :  { %7880 = vmatpush3.bf16.msra.mxu1 %v8464_v45  ;;  %7893 = vmatprep.mubr.msk.bf16.mxu0 %vm8827_vm1, %v8826_v20  ;;  %v6959_v45 = vld [vmem:[%s10803_s7 + $0x9] ss:$0 sm:$0xff] }
0x127a   :  { %7897 = vmatprep.subr.bf16.mxu1 %v8826_v20 }
0x127c   :  { %7882 = vmatmul.mubr.bf16.vlgmr.msra.gmra.mxu1 %v4005_v55 }
0x127d   :  { %7905 = vmatprep.mubr.msk.bf16.mxu1 %vm8827_vm1, %v8826_v20 }
0x1318   :  { %v3812_v22 = vpop.f32.mrf.mxu0 }
0x1319   :  { %v3819_v59 = vadd.f32 %v3812_v22, %v9607_v10 }
0x131a   :  { %v7823_v49 = vpop.f32.mrf.mxu0 }
0x131b   :  { %v8469_v49 = vld [vmem:[%s10801_s5 + $0x78] sm:$0xff]  }
0x131c   :  { %v3815_v50 = vpop.f32.mrf.mxu0  ;;  %v3904_v6 = vpop.f32.mrf.mxu1  ;;  %7898 = vmatpush3.bf16.msra.mxu1 %v8469_v49 }
0x131d   :  { %v3911_v62 = vadd.f32 %v3904_v6, %v3819_v59  ;;  %v3820_v3 = vadd.f32 %v3815_v50, %v9605_v9  ;;  %v8465_v9 = vld [vmem:[%s10801_s5 + $0x58] sm:$0xff]   ;;  %v8470_v50 = vld [vmem:[%s10801_s5 + $0x70] sm:$0xff]   ;;  %7899 = vmatprep.subr.bf16.mxu1 %v8826_v20  ;;  %v8471_v6 = vld [vmem:[%s10801_s5 + $0x68] sm:$0xff]  }
0x131e   :  { %v7824_v51 = vpop.f32.mrf.mxu0  ;;  %v7843_v53 = vpop.f32.mrf.mxu1  ;;  %7886 = vmatpush3.bf16.xpose.msra.mxu0 %v8465_v9 }
0x131f   :  { %7887 = vmatprep.subr.bf16.mxu0 %v8826_v20  ;;  %v8472_v51 = vld [vmem:[%s10801_s5 + $0x60] sm:$0xff]   ;;  %v6960_v53 = vld [vmem:[%s10803_s7 + $0xa] ss:$0 sm:$0xff] }
0x1320   :  { %v3907_v11 = vpop.f32.mrf.mxu1  ;;  %7900 = vmatpush3.bf16.msra.mxu1 %v8470_v50 }
0x1321   :  { %v3912_v61 = vadd.f32 %v3907_v11, %v3820_v3  ;;  %7901 = vmatprep.subr.bf16.mxu1 %v8826_v20 }
0x1322   :  { %v7844_v54 = vpop.f32.mrf.mxu1 }
0x1324   :  { %7902 = vmatpush3.bf16.msra.mxu1 %v8471_v6 }
0x1325   :  { %7903 = vmatprep.subr.bf16.mxu1 %v8826_v20 }
0x1326   :  { %7888 = vmatpush3.bf16.xpose.msra.mxu0 %v8466_v30  ;;  %v6972_v30 = vld [vmem:[%s10802_s6 + $0x48] sm:$0xff] }
0x1327   :  { %7889 = vmatprep.subr.bf16.mxu0 %v8826_v20 }
0x1328   :  { %7904 = vmatpush3.bf16.msra.mxu1 %v8472_v51 }
0x1329   :  { %7909 = vmatprep.subr.mxu1 %v8826_v20 }
0x132e   :  { %7890 = vmatpush3.bf16.xpose.msra.mxu0 %v8467_v31  ;;  %v6971_v31 = vld [vmem:[%s10802_s6 + $0x40] sm:$0xff] }
0x132f   :  { %7891 = vmatprep.subr.bf16.mxu0 %v8826_v20 }
0x1336   :  { %7892 = vmatpush3.bf16.xpose.msra.mxu0 %v8468_v32  ;;  %v6974_v32 = vld [vmem:[%s10802_s6 + $0x58] sm:$0xff] }
0x1337   :  { %7916 = vmatprep.subr.mxu0 %v8826_v20 }
0x1338   :  { %v3996_v60 = vpop.f32.mrf.mxu0 }
0x1339   :  { %v4003_v4 = vadd.f32 %v3996_v60, %v3911_v62 }
0x133a   :  { %v7863_v2 = vpop.f32.mrf.mxu0 }
0x133c   :  { %v3999_v7 = vpop.f32.mrf.mxu0  ;;  %v4088_v56 = vpop.f32.mrf.mxu1 }
0x133d   :  { %v10125_v63 = vadd.f32 %v4088_v56, %v4003_v4  ;;  %v4004_v15 = vadd.f32 %v3999_v7, %v3912_v61 }
0x133e   :  { %v7864_v12 = vpop.f32.mrf.mxu0  ;;  %v7883_v14 = vpop.f32.mrf.mxu1 }
0x133f   :  { %4099 = vadd.xlane.f32.xlu0 %v10125_v63 }
0x1340   :  { %v4091_v16 = vpop.f32.mrf.mxu1 }
0x1341   :  { %v10128_v17 = vadd.f32 %v4091_v16, %v4004_v15 }
0x1342   :  { %v7884_v10 = vpop.f32.mrf.mxu1 }
0x1343   :  { %4101 = vadd.xlane.f32.xlu1 %v10128_v17 }
0x13c8   :  { %v4100_v19 = vpop.xlane.xlu0 %4099 }
0x13c9   :  { %v4103_v21 = vmul.f32 0.0078125, %v4100_v19 }
0x13cb   :  { %v4105_v23 = vsub.f32 %v10125_v63, %v4103_v21 }
0x13cc   :  { %v4102_v25 = vpop.xlane.xlu1 %4101 }
0x13cd   :  { %v4104_v5 = vmul.f32 0.0078125, %v4102_v25  ;;  %v4107_v26 = vmul.f32 %v4105_v23, %v4105_v23 }
0x13cf   :  { %v4106_v27 = vsub.f32 %v10128_v17, %v4104_v5  ;;  %4109 = vadd.xlane.f32.xlu0 %v4107_v26 }
0x13d1   :  { %v4108_v29 = vmul.f32 %v4106_v27, %v4106_v27 }
0x13d3   :  { %4111 = vadd.xlane.f32.xlu1 %v4108_v29 }
0x1458   :  { %v4110_v33 = vpop.xlane.xlu0 %4109 }
0x1459   :  { %v4113_v34 = vmul.f32 0.0078125, %v4110_v33  ;;  %v6973_v33 = vld [vmem:[%s10802_s6 + $0x50] sm:$0xff]  ;;  %s6464_s6 = sshll.u32 %s8829_s10, 4  ;;  %s6465_s6 = int_to_ptr.vmem [resolvable:$true] %s6464_s6 }
0x145a   :  { %s8803_s11 = scalar_lea.vmem %s6465_s6, 32  ;;  %p8808_p1 = scmp.lt.s32.totalorder %s6465_s6, %s6465_s6 }
0x145b   :  { %v4115_v35 = vadd.f32 1e-05, %v4113_v34  ;;  %v6965_v34 = vld [vmem:[%s10803_s7 + $0xb] ss:$0 sm:$0xff]  ;;  %p8804_p0 = scmp.ne.s32.totalorder %s6465_s6, %s8803_s11  ;;  %p8809_p2 = scmp.lt.s32.totalorder %s8803_s11, %s8803_s11 }
0x145c   :  { %v4112_v36 = vpop.xlane.xlu1 %4111 }
0x145d   :  { %8745 = vrsqrt.f32 %v4115_v35  ;;  %v4114_v37 = vmul.f32 0.0078125, %v4112_v36  ;;  %p8810_p3 = por %p8809_p2, %p8808_p1 }
0x145f   :  { %v4116_v38 = vadd.f32 1e-05, %v4114_v37  ;;  %p8811_p4 = pnand %p8810_p3, %p8804_p0 }
0x1461   :  { %8747 = vrsqrt.f32 %v4116_v38 }
0x146a   :  { %v8746_v39 = vpop.eup %8745 }
0x146b   :  { %v4119_v40 = vmul.f32 %v8746_v39, %v4105_v23 }
0x146d   :  { %v4125_v44 = vmul.f32 %v6958_v41, %v4119_v40 }
0x146e   :  { %v8748_v42 = vpop.eup %8747 }
0x146f   :  { %v4120_v43 = vmul.f32 %v8748_v42, %v4106_v27  ;;  %v4131_v47 = vadd.f32 %v6959_v45, %v4125_v44 }
0x1471   :  { %v4126_v46 = vmul.f32 %v6958_v41, %v4120_v43 }
0x1473   :  { %v4132_v55 = vadd.f32 %v6959_v45, %v4126_v46 }
0x1475   :  { %v4133_v22 = vpack.c.bf16 %v4132_v55, %v4131_v47 }
0x1477   :  { %7894 = vmatmul.mubr.bf16.vlgmr.msra.gmra.mxu0 %v4133_v22 }
0x1478   :  { %7920 = vmatprep.mubr.msk.f32.mxu0 %vm8827_vm1, %v8826_v20  ;;  %7917 = vmatpush3.msra.mxu0 %v6974_v32 }
0x1479   :  { %7918 = vmatprep.subr.mxu0 %v8826_v20 }
0x147a   :  { %7919 = vmatpush3.msra.mxu0 %v6973_v33  ;;  %v8487_v33 = vld [vmem:[%s10799_s3 + $0x7e4] ss:$48 sps:$4 sm:$0xff]  }
0x1537   :  { %v4197_v11 = vpop.f32.mrf.mxu0 }
0x1538   :  { %v4198_v54 = vadd.f32 %v6960_v53, %v4197_v11 }
0x1539   :  { %v7895_v59 = vpop.f32.mrf.mxu0 }
0x153a   :  { %v4206_v60 = vmul.f32 0.044715, %v4198_v54  ;;  %v4204_v23 = vmul.f32 0.5, %v4198_v54 }
0x153b   :  { %v4200_v62 = vpop.f32.mrf.mxu0 }
0x153c   :  { %v4208_v2 = vmul.f32 %v4206_v60, %v4198_v54  ;;  %v4201_v3 = vadd.f32 %v6960_v53, %v4200_v62 }
0x153d   :  { %v7896_v4 = vpop.f32.mrf.mxu0 }
0x153e   :  { %v4210_v7 = vmul.f32 %v4208_v2, %v4198_v54  ;;  %v4207_v56 = vmul.f32 0.044715, %v4201_v3  ;;  %v4205_v25 = vmul.f32 0.5, %v4201_v3 }
0x1540   :  { %v4212_v61 = vadd.f32 %v4210_v7, %v4198_v54  ;;  %v4209_v12 = vmul.f32 %v4207_v56, %v4201_v3 }
0x1542   :  { %v4214_v14 = vmul.f32 0.7978846, %v4212_v61  ;;  %v4211_v15 = vmul.f32 %v4209_v12, %v4201_v3 }
0x1544   :  { %8749 = vtanh.f32 %v4214_v14  ;;  %v4213_v16 = vadd.f32 %v4211_v15, %v4201_v3 }
0x1546   :  { %v4215_v10 = vmul.f32 0.7978846, %v4213_v16  ;;  %v8473_v16 = vld [vmem:[%s10799_s3 + $0x8a0] ss:$48 sps:$4 sm:$0xff]  }
0x1548   :  { %8751 = vtanh.f32 %v4215_v10  ;;  %v8475_v10 = vld [vmem:[%s10799_s3 + $0x8a4] ss:$48 sps:$4 sm:$0xff]  }
0x1551   :  { %v8750_v9 = vpop.eup %8749 }
0x1552   :  { %v4218_v19 = vadd.f32 1.0, %v8750_v9  ;;  %v8481_v9 = vld [vmem:[%s10799_s3 + $0x844] ss:$48 sps:$4 sm:$0xff]  }
0x1554   :  { %v4220_v26 = vmul.f32 %v4218_v19, %v4204_v23  ;;  %v8484_v19 = vld [vmem:[%s10799_s3 + $0x84c] ss:$48 sps:$4 sm:$0xff]   ;;  %v8482_v23 = vld [vmem:[%s10799_s3 + $0x848] ss:$48 sps:$4 sm:$0xff]  }
0x1555   :  { %v8752_v21 = vpop.eup %8751 }
0x1556   :  { %v4219_v5 = vadd.f32 1.0, %v8752_v21  ;;  %v8479_v21 = vld [vmem:[%s10799_s3 + $0x840] ss:$48 sps:$4 sm:$0xff]  }
0x1558   :  { %v4221_v27 = vmul.f32 %v4219_v5, %v4205_v25 }
0x155a   :  { %v4222_v29 = vpack.c.bf16 %v4221_v27, %v4220_v26 }
0x155c   :  { %7906 = vmatmul.mubr.msk.bf16.vlgmr.msra.gmra.mxu1 %vm135_vm0, %v4222_v29 }
0x155d   :  { %7913 = vmatprep.mubr.msk.f32.mxu1 %vm8827_vm1, %v8826_v20  ;;  %7910 = vmatpush3.xpose.msra.mxu1 %v6972_v30 }
0x155e   :  { %7911 = vmatprep.subr.mxu1 %v8826_v20 }
0x1561   :  { %7912 = vmatpush3.xpose.msra.mxu1 %v6971_v31 }
0x1562   :  { %5174 = vmatprep.subr.bf16.mxu1 %v8475_v10  ;;  %v7154_v10 = vld [vmem:[%s10803_s7 + $0xd] ss:$0 sm:$0xff] }
0x161c   :  { %v4289_v35 = vpop.f32.mrf.mxu1 }
0x161d   :  { %v4290_v36 = vadd.f32 %v6965_v34, %v4289_v35  ;;  %v8485_v35 = vld [vmem:[%s10799_s3 + $0x7e0] ss:$48 sps:$4 sm:$0xff]  }
0x161e   :  { %v7907_v37 = vpop.f32.mrf.mxu1 }
0x161f   :  { %v4296_v38 = vadd.f32 %v4290_v36, %v10125_v63  ;;  %v8488_v36 = vld [vmem:[%s10799_s3 + $0x7e8] ss:$48 sps:$4 sm:$0xff]   ;;  %v8493_v37 = vld [vmem:[%s10799_s3 + $0x784] ss:$48 sps:$4 sm:$0xff]  }
0x1620   :  { %v4292_v39 = vpop.f32.mrf.mxu1 }
0x1621   :  { %v4482_v40 = vrot.slane %v4296_v38, 4  ;;  %v4293_v41 = vadd.f32 %v6965_v34, %v4292_v39  ;;  %v8490_v34 = vld [vmem:[%s10799_s3 + $0x7ec] ss:$48 sps:$4 sm:$0xff]   ;;  %v8491_v39 = vld [vmem:[%s10799_s3 + $0x780] ss:$48 sps:$4 sm:$0xff]  }
0x1622   :  { %v7908_v42 = vpop.f32.mrf.mxu1 }
0x1623   :  { %v4483_v43 = vadd.f32 %v4482_v40, %v4296_v38  ;;  %v4297_v44 = vadd.f32 %v4293_v41, %v10128_v17  ;;  %v8494_v40 = vld [vmem:[%s10799_s3 + $0x788] ss:$48 sps:$4 sm:$0xff]   ;;  %v8499_v41 = vld [vmem:[%s10799_s3 + $0x724] ss:$48 sps:$4 sm:$0xff]   ;;  %v8502_v42 = vld [vmem:[%s10799_s3 + $0x72c] ss:$48 sps:$4 sm:$0xff]  }
0x1625   :  { %v4484_v45 = vrot.slane %v4483_v43, 2  ;;  %v4489_v46 = vrot.slane %v4297_v44, 4 }
0x1627   :  { %v4485_v47 = vadd.f32 %v4484_v45, %v4483_v43  ;;  %v4490_v55 = vadd.f32 %v4489_v46, %v4297_v44  ;;  %v8497_v43 = vld [vmem:[%s10799_s3 + $0x720] ss:$48 sps:$4 sm:$0xff]   ;;  %v8505_v45 = vld [vmem:[%s10799_s3 + $0x6c4] ss:$48 sps:$4 sm:$0xff]   ;;  %v8508_v46 = vld [vmem:[%s10799_s3 + $0x6cc] ss:$48 sps:$4 sm:$0xff]  }
0x1629   :  { %v4491_v22 = vrot.slane %v4490_v55, 2  ;;  %v4486_v49 = vrot.slane %v4485_v47, 1 }
0x162b   :  { %v4492_v50 = vadd.f32 %v4491_v22, %v4490_v55  ;;  %v4487_v6 = vadd.f32 %v4486_v49, %v4485_v47  ;;  %v8503_v47 = vld [vmem:[%s10799_s3 + $0x6c0] ss:$48 sps:$4 sm:$0xff]   ;;  %v8506_v55 = vld [vmem:[%s10799_s3 + $0x6c8] ss:$48 sps:$4 sm:$0xff]   ;;  %v8511_v22 = vld [vmem:[%s10799_s3 + $0x664] ss:$48 sps:$4 sm:$0xff]  }
0x162c   :  { %v8514_v49 = vld [vmem:[%s10799_s3 + $0x66c] ss:$48 sps:$4 sm:$0xff]  }
0x162d   :  { %v4493_v51 = vrot.slane %v4492_v50, 1  ;;  %v4488_v11 = vmul.f32 0.125, %v4487_v6  ;;  %v8512_v6 = vld [vmem:[%s10799_s3 + $0x668] ss:$48 sps:$4 sm:$0xff]  }
0x162f   :  { %v4494_v53 = vadd.f32 %v4493_v51, %v4492_v50  ;;  %v8509_v50 = vld [vmem:[%s10799_s3 + $0x660] ss:$48 sps:$4 sm:$0xff]   ;;  %v8517_v51 = vld [vmem:[%s10799_s3 + $0x604] ss:$48 sps:$4 sm:$0xff]  }
0x1631   :  { %v4495_v54 = vmul.f32 0.125, %v4494_v53  ;;  %v8520_v53 = vld [vmem:[%s10799_s3 + $0x60c] ss:$48 sps:$4 sm:$0xff]  }
0x1633   :  { %v4496_v63 = vsel %vm411_vm2, %v4488_v11, %v4495_v54  ;;  %v8515_v11 = vld [vmem:[%s10799_s3 + $0x600] ss:$48 sps:$4 sm:$0xff]   ;;  %v8518_v54 = vld [vmem:[%s10799_s3 + $0x608] ss:$48 sps:$4 sm:$0xff]  }
0x1634   :  { %7914 = vmatmul.mubr.f32.vlgmr.msra.gmra.mxu1 %v4496_v63  ;;  %v8523_v63 = vld [vmem:[%s10799_s3 + $0x8b4] ss:$48 sps:$4 sm:$0xff]  }
0x1635   :  { %5206 = vmatprep.mubr.bf16.mxu1 %v8825_v1  ;;  %5175 = vmatpush1.bf16.msra.mxu1 %v8473_v16 }
0x1636   :  { %5176 = vmatprep.subr.bf16.mxu1 %v8481_v9 }
0x1639   :  { %5177 = vmatpush1.bf16.msra.mxu1 %v8479_v21  ;;  %v8521_v21 = vld [vmem:[%s10799_s3 + $0x8b0] ss:$48 sps:$4 sm:$0xff]  }
0x163a   :  { %5178 = vmatprep.subr.bf16.mxu1 %v8487_v33  ;;  %v8536_v33 = vld [vmem:[%s10799_s3 + $0x7f8] ss:$48 sps:$4 sm:$0xff]  }
0x163d   :  { %5179 = vmatpush1.bf16.msra.mxu1 %v8485_v35  ;;  %v8544_v35 = vld [vmem:[%s10799_s3 + $0x79c] ss:$48 sps:$4 sm:$0xff]  }
0x163e   :  { %5180 = vmatprep.subr.bf16.mxu1 %v8493_v37  ;;  %v8542_v37 = vld [vmem:[%s10799_s3 + $0x798] ss:$48 sps:$4 sm:$0xff]  }
0x1641   :  { %5181 = vmatpush1.bf16.msra.mxu1 %v8491_v39  ;;  %v8550_v39 = vld [vmem:[%s10799_s3 + $0x73c] ss:$48 sps:$4 sm:$0xff]  }
0x1642   :  { %5182 = vmatprep.subr.bf16.mxu1 %v8499_v41  ;;  %v8548_v41 = vld [vmem:[%s10799_s3 + $0x738] ss:$48 sps:$4 sm:$0xff]  }
0x1645   :  { %5183 = vmatpush1.bf16.msra.mxu1 %v8497_v43  ;;  %v8556_v43 = vld [vmem:[%s10799_s3 + $0x6dc] ss:$48 sps:$4 sm:$0xff]  }
0x1646   :  { %5184 = vmatprep.subr.bf16.mxu1 %v8505_v45  ;;  %v8554_v45 = vld [vmem:[%s10799_s3 + $0x6d8] ss:$48 sps:$4 sm:$0xff]  }
0x1649   :  { %5185 = vmatpush1.bf16.msra.mxu1 %v8503_v47  ;;  %v8562_v47 = vld [vmem:[%s10799_s3 + $0x67c] ss:$48 sps:$4 sm:$0xff]  }
0x164a   :  { %5186 = vmatprep.subr.bf16.mxu1 %v8511_v22  ;;  %v8560_v22 = vld [vmem:[%s10799_s3 + $0x678] ss:$48 sps:$4 sm:$0xff]  }
0x164d   :  { %5187 = vmatpush1.bf16.msra.mxu1 %v8509_v50  ;;  %v8568_v50 = vld [vmem:[%s10799_s3 + $0x61c] ss:$48 sps:$4 sm:$0xff]  }
0x164e   :  { %5188 = vmatprep.subr.bf16.mxu1 %v8517_v51  ;;  %v8566_v51 = vld [vmem:[%s10799_s3 + $0x618] ss:$48 sps:$4 sm:$0xff]  }
0x1651   :  { %5189 = vmatpush1.bf16.msra.mxu1 %v8515_v11  ;;  %v8574_v11 = vld [vmem:[%s10799_s3 + $0x8cc] ss:$48 sps:$4 sm:$0xff]  }
0x1652   :  { %5260 = vmatprep.subr.bf16.mxu1 %v8523_v63  ;;  %v8572_v63 = vld [vmem:[%s10799_s3 + $0x8c8] ss:$48 sps:$4 sm:$0xff]  }
0x16f4   :  { %v4563_v59 = vpop.f32.mrf.mxu1 }
0x16f5   :  { %v4567_v60 = vmax.f32 %v4563_v59, 0.0  ;;  %v8526_v59 = vld [vmem:[%s10799_s3 + $0x8bc] ss:$48 sps:$4 sm:$0xff]  }
0x16f6   :  { %v7915_v17 = vpop.f32.mrf.mxu1 }
0x16f7   :  { %7921 = vmatmul.mubr.msk.f32.vlgmr.msra.gmra.mxu0 %vm484_vm3, %v4567_v60 }
0x16f8   :  { %5249 = vmatprep.mubr.bf16.mxu0 %v8825_v1 }
0x17b7   :  { %v4637_v62 = vpop.f32.mrf.mxu0 }
0x17b8   :  { %v7152_v2 = vmul.f32 -1.442695, %v4637_v62 }
0x17b9   :  { %v7922_v3 = vpop.f32.mrf.mxu0 }
0x17ba   :  { %8753 = vpow2.f32 %v7152_v2 }
0x17c7   :  { %v8754_v4 = vpop.eup %8753 }
0x17c8   :  { %v4644_v7 = vadd.f32 1.0, %v8754_v4 }
0x17ca   :  { %8755 = vrcp.f32 %v4644_v7 }
0x17d7   :  { %v8756_v56 = vpop.eup %8755 }
0x17d8   :  { %v4655_v61 = vrot.slane %v8756_v56, %v8973_v58  ;;  %v4650_v12 = vrot.slane %v8756_v56, %v8970_v57  ;;  %v8476_v57 = vld [vmem:[%s10799_s3 + $0x8a8] ss:$48 sps:$4 sm:$0xff]   ;;  %v8478_v58 = vld [vmem:[%s10799_s3 + $0x8ac] ss:$48 sps:$4 sm:$0xff]  }
0x17d9   :  { %5217 = vmatprep.subr.bf16.mxu0 %v8478_v58  ;;  %v7153_v56 = vld [vmem:[%s10803_s7 + $0xc] ss:$0 sm:$0xff] }
0x17da   :  { %v10204_v14 = vmul.f32 %v4655_v61, %v4297_v44  ;;  %v10206_v15 = vmul.f32 %v4650_v12, %v4296_v38  ;;  %5218 = vmatpush1.bf16.msra.mxu0 %v8476_v57  ;;  %v8496_v38 = vld [vmem:[%s10799_s3 + $0x78c] ss:$48 sps:$4 sm:$0xff]   ;;  %v8500_v44 = vld [vmem:[%s10799_s3 + $0x728] ss:$48 sps:$4 sm:$0xff]  }
0x17db   :  { %5219 = vmatprep.subr.bf16.mxu0 %v8484_v19 }
0x17dc   :  { %4661 = vadd.xlane.f32.xlu1 %v10204_v14  ;;  %4659 = vadd.xlane.f32.xlu0 %v10206_v15 }
0x17de   :  { %5220 = vmatpush1.bf16.msra.mxu0 %v8482_v23  ;;  %v8524_v23 = vld [vmem:[%s10799_s3 + $0x8b8] ss:$48 sps:$4 sm:$0xff]  }
0x17df   :  { %5221 = vmatprep.subr.bf16.mxu0 %v8490_v34  ;;  %v8541_v34 = vld [vmem:[%s10799_s3 + $0x794] ss:$48 sps:$4 sm:$0xff]  }
0x17e2   :  { %5222 = vmatpush1.bf16.msra.mxu0 %v8488_v36  ;;  %v8539_v36 = vld [vmem:[%s10799_s3 + $0x790] ss:$48 sps:$4 sm:$0xff]  }
0x17e3   :  { %5223 = vmatprep.subr.bf16.mxu0 %v8496_v38  ;;  %v8547_v38 = vld [vmem:[%s10799_s3 + $0x734] ss:$48 sps:$4 sm:$0xff]  }
0x17e6   :  { %5224 = vmatpush1.bf16.msra.mxu0 %v8494_v40  ;;  %v8545_v40 = vld [vmem:[%s10799_s3 + $0x730] ss:$48 sps:$4 sm:$0xff]  }
0x17e7   :  { %5225 = vmatprep.subr.bf16.mxu0 %v8502_v42  ;;  %v8553_v42 = vld [vmem:[%s10799_s3 + $0x6d4] ss:$48 sps:$4 sm:$0xff]  }
0x17ea   :  { %5226 = vmatpush1.bf16.msra.mxu0 %v8500_v44  ;;  %v8551_v44 = vld [vmem:[%s10799_s3 + $0x6d0] ss:$48 sps:$4 sm:$0xff]  }
0x17eb   :  { %5227 = vmatprep.subr.bf16.mxu0 %v8508_v46  ;;  %v8559_v46 = vld [vmem:[%s10799_s3 + $0x674] ss:$48 sps:$4 sm:$0xff]  }
0x17ee   :  { %5228 = vmatpush1.bf16.msra.mxu0 %v8506_v55  ;;  %v8557_v55 = vld [vmem:[%s10799_s3 + $0x670] ss:$48 sps:$4 sm:$0xff]  }
0x17ef   :  { %5229 = vmatprep.subr.bf16.mxu0 %v8514_v49  ;;  %v8565_v49 = vld [vmem:[%s10799_s3 + $0x614] ss:$48 sps:$4 sm:$0xff]  }
0x17f2   :  { %5230 = vmatpush1.bf16.msra.mxu0 %v8512_v6  ;;  %v8563_v6 = vld [vmem:[%s10799_s3 + $0x610] ss:$48 sps:$4 sm:$0xff]  }
0x17f3   :  { %5231 = vmatprep.subr.bf16.mxu0 %v8520_v53  ;;  %v8571_v53 = vld [vmem:[%s10799_s3 + $0x8c4] ss:$48 sps:$4 sm:$0xff]  }
0x17f6   :  { %5232 = vmatpush1.bf16.msra.mxu0 %v8518_v54  ;;  %v8569_v54 = vld [vmem:[%s10799_s3 + $0x8c0] ss:$48 sps:$4 sm:$0xff]  }
0x17f7   :  { %5303 = vmatprep.subr.bf16.mxu0 %v8526_v59  ;;  %v8577_v59 = vld [vmem:[%s10799_s3 + $0x864] ss:$48 sps:$4 sm:$0xff]  }
0x1865   :  { %v4662_v25 = vpop.xlane.xlu1 %4661  ;;  %v4660_v5 = vpop.xlane.xlu0 %4659 }
0x1866   :  { %v4664_v26 = vmul.f32 0.0078125, %v4662_v25  ;;  %v4663_v27 = vmul.f32 0.0078125, %v4660_v5  ;;  %v8529_v5 = vld [vmem:[%s10799_s3 + $0x854] ss:$48 sps:$4 sm:$0xff]  }
0x1868   :  { %v10235_v29 = vsub.f32 %v10204_v14, %v4664_v26  ;;  %v10238_v30 = vsub.f32 %v10206_v15, %v4663_v27  ;;  %v8532_v26 = vld [vmem:[%s10799_s3 + $0x85c] ss:$48 sps:$4 sm:$0xff]   ;;  %v8527_v27 = vld [vmem:[%s10799_s3 + $0x850] ss:$48 sps:$4 sm:$0xff]  }
0x186a   :  { %v4668_v31 = vmul.f32 %v10235_v29, %v10235_v29  ;;  %v4667_v32 = vmul.f32 %v10238_v30, %v10238_v30 }
0x186c   :  { %4671 = vadd.xlane.f32.xlu1 %v4668_v31  ;;  %4669 = vadd.xlane.f32.xlu0 %v4667_v32  ;;  %v8538_v31 = vld [vmem:[%s10799_s3 + $0x7fc] ss:$48 sps:$4 sm:$0xff]   ;;  %v8533_v32 = vld [vmem:[%s10799_s3 + $0x7f0] ss:$48 sps:$4 sm:$0xff]  }
0x18f5   :  { %v4672_v60 = vpop.xlane.xlu1 %4671  ;;  %v4670_v17 = vpop.xlane.xlu0 %4669 }
0x18f6   :  { %v4674_v62 = vmul.f32 0.0078125, %v4672_v60  ;;  %v4673_v2 = vmul.f32 0.0078125, %v4670_v17  ;;  %v8580_v60 = vld [vmem:[%s10799_s3 + $0x86c] ss:$48 sps:$4 sm:$0xff]   ;;  %v8575_v17 = vld [vmem:[%s10799_s3 + $0x860] ss:$48 sps:$4 sm:$0xff]  }
0x18f8   :  { %v4676_v3 = vadd.f32 1e-05, %v4674_v62  ;;  %v4675_v4 = vadd.f32 1e-05, %v4673_v2  ;;  %v8578_v62 = vld [vmem:[%s10799_s3 + $0x868] ss:$48 sps:$4 sm:$0xff]  }
0x18f9   :  { %v8583_v2 = vld [vmem:[%s10799_s3 + $0x804] ss:$48 sps:$4 sm:$0xff]  }
0x18fa   :  { %8757 = vrsqrt.f32 %v4676_v3  ;;  %v8586_v3 = vld [vmem:[%s10799_s3 + $0x80c] ss:$48 sps:$4 sm:$0xff]  }
0x18fb   :  { %8759 = vrsqrt.f32 %v4675_v4  ;;  %v8581_v4 = vld [vmem:[%s10799_s3 + $0x800] ss:$48 sps:$4 sm:$0xff]  }
0x1907   :  { %v8758_v7 = vpop.eup %8757 }
0x1908   :  { %v8760_v61 = vpop.eup %8759  ;;  %v4680_v12 = vmul.f32 %v8758_v7, %v10235_v29  ;;  %v8530_v29 = vld [vmem:[%s10799_s3 + $0x858] ss:$48 sps:$4 sm:$0xff]  }
0x1909   :  { %v4679_v16 = vmul.f32 %v8760_v61, %v10238_v30  ;;  %v8535_v30 = vld [vmem:[%s10799_s3 + $0x7f4] ss:$48 sps:$4 sm:$0xff]   ;;  %v8584_v7 = vld [vmem:[%s10799_s3 + $0x808] ss:$48 sps:$4 sm:$0xff]   ;;  %v8587_v61 = vld [vmem:[%s10799_s3 + $0x7a0] ss:$48 sps:$4 sm:$0xff]  }
0x190a   :  { %v4686_v57 = vmul.f32 %v7153_v56, %v4680_v12  ;;  %v8590_v12 = vld [vmem:[%s10799_s3 + $0x7a8] ss:$48 sps:$4 sm:$0xff]  }
0x190b   :  { %v4685_v58 = vmul.f32 %v7153_v56, %v4679_v16  ;;  %v8589_v56 = vld [vmem:[%s10799_s3 + $0x7a4] ss:$48 sps:$4 sm:$0xff]  }
0x190c   :  { %v4692_v9 = vadd.f32 %v7154_v10, %v4686_v57  ;;  %v8595_v16 = vld [vmem:[%s10799_s3 + $0x744] ss:$48 sps:$4 sm:$0xff]   ;;  %v8593_v57 = vld [vmem:[%s10799_s3 + $0x740] ss:$48 sps:$4 sm:$0xff]  }
0x190d   :  { %v4691_v19 = vadd.f32 %v7154_v10, %v4685_v58  ;;  %v8598_v10 = vld [vmem:[%s10799_s3 + $0x74c] ss:$48 sps:$4 sm:$0xff]   ;;  %v8596_v58 = vld [vmem:[%s10799_s3 + $0x748] ss:$48 sps:$4 sm:$0xff]  }
0x190f   :  { %v10336_v25 = vpack.c.bf16 %v4692_v9, %v4691_v19  ;;  %v8601_v9 = vld [vmem:[%s10799_s3 + $0x6e4] ss:$48 sps:$4 sm:$0xff]   ;;  %v8604_v19 = vld [vmem:[%s10799_s3 + $0x6ec] ss:$48 sps:$4 sm:$0xff]  }
0x1911   :  { %5207 = vmatmul.mubr.bf16.vlgmr.msra.gmra.mxu1 %v10336_v25  ;;  %5250 = vmatmul.mubr.bf16.vlgmr.msra.gmra.mxu0 %v10336_v25 }
0x1912   :  { %5261 = vmatpush1.bf16.msra.mxu1 %v8521_v21  ;;  %5304 = vmatpush1.bf16.msra.mxu0 %v8524_v23  ;;  %v8599_v21 = vld [vmem:[%s10799_s3 + $0x6e0] ss:$48 sps:$4 sm:$0xff]   ;;  %v8602_v23 = vld [vmem:[%s10799_s3 + $0x6e8] ss:$48 sps:$4 sm:$0xff]  }
0x1913   :  { %5262 = vmatprep.subr.bf16.mxu1 %v8529_v5  ;;  %5305 = vmatprep.subr.bf16.mxu0 %v8532_v26  ;;  %v8607_v5 = vld [vmem:[%s10799_s3 + $0x684] ss:$48 sps:$4 sm:$0xff]   ;;  %v8610_v26 = vld [vmem:[%s10799_s3 + $0x68c] ss:$48 sps:$4 sm:$0xff]  }
0x1914   :  { %5292 = vmatprep.mubr.bf16.mxu1 %v8825_v1  ;;  %5335 = vmatprep.mubr.bf16.mxu0 %v8825_v1 }
0x1916   :  { %5263 = vmatpush1.bf16.msra.mxu1 %v8527_v27  ;;  %5306 = vmatpush1.bf16.msra.mxu0 %v8530_v29  ;;  %v8605_v27 = vld [vmem:[%s10799_s3 + $0x680] ss:$48 sps:$4 sm:$0xff]   ;;  %v8608_v29 = vld [vmem:[%s10799_s3 + $0x688] ss:$48 sps:$4 sm:$0xff]  }
0x1917   :  { %5264 = vmatprep.subr.bf16.mxu1 %v8535_v30  ;;  %5307 = vmatprep.subr.bf16.mxu0 %v8538_v31  ;;  %v8613_v30 = vld [vmem:[%s10799_s3 + $0x624] ss:$48 sps:$4 sm:$0xff]   ;;  %v8616_v31 = vld [vmem:[%s10799_s3 + $0x62c] ss:$48 sps:$4 sm:$0xff]  }
0x191a   :  { %5265 = vmatpush1.bf16.msra.mxu1 %v8533_v32  ;;  %5308 = vmatpush1.bf16.msra.mxu0 %v8536_v33  ;;  %v8611_v32 = vld [vmem:[%s10799_s3 + $0x620] ss:$48 sps:$4 sm:$0xff]   ;;  %v8614_v33 = vld [vmem:[%s10799_s3 + $0x628] ss:$48 sps:$4 sm:$0xff]  }
0x191b   :  { %5266 = vmatprep.subr.bf16.mxu1 %v8541_v34  ;;  %5309 = vmatprep.subr.bf16.mxu0 %v8544_v35 }
0x191e   :  { %5267 = vmatpush1.bf16.msra.mxu1 %v8539_v36  ;;  %5310 = vmatpush1.bf16.msra.mxu0 %v8542_v37 }
0x191f   :  { %5268 = vmatprep.subr.bf16.mxu1 %v8547_v38  ;;  %5311 = vmatprep.subr.bf16.mxu0 %v8550_v39 }
0x1922   :  { %5269 = vmatpush1.bf16.msra.mxu1 %v8545_v40  ;;  %5312 = vmatpush1.bf16.msra.mxu0 %v8548_v41 }
0x1923   :  { %5270 = vmatprep.subr.bf16.mxu1 %v8553_v42  ;;  %5313 = vmatprep.subr.bf16.mxu0 %v8556_v43 }
0x1926   :  { %5271 = vmatpush1.bf16.msra.mxu1 %v8551_v44  ;;  %5314 = vmatpush1.bf16.msra.mxu0 %v8554_v45 }
0x1927   :  { %5272 = vmatprep.subr.bf16.mxu1 %v8559_v46  ;;  %5315 = vmatprep.subr.bf16.mxu0 %v8562_v47 }
0x192a   :  { %5273 = vmatpush1.bf16.msra.mxu1 %v8557_v55  ;;  %5316 = vmatpush1.bf16.msra.mxu0 %v8560_v22 }
0x192b   :  { %5274 = vmatprep.subr.bf16.mxu1 %v8565_v49  ;;  %5317 = vmatprep.subr.bf16.mxu0 %v8568_v50 }
0x192e   :  { %5275 = vmatpush1.bf16.msra.mxu1 %v8563_v6  ;;  %5318 = vmatpush1.bf16.msra.mxu0 %v8566_v51 }
0x192f   :  { %5346 = vmatprep.subr.bf16.mxu1 %v8571_v53  ;;  %5389 = vmatprep.subr.bf16.mxu0 %v8574_v11 }
0x1931   :  { %5293 = vmatmul.mubr.bf16.vlgmr.msra.gmra.mxu1 %v10336_v25  ;;  %5336 = vmatmul.mubr.bf16.vlgmr.msra.gmra.mxu0 %v10336_v25 }
0x1932   :  { %5347 = vmatpush1.bf16.msra.mxu1 %v8569_v54  ;;  %5390 = vmatpush1.bf16.msra.mxu0 %v8572_v63 }
0x1933   :  { %5348 = vmatprep.subr.bf16.mxu1 %v8577_v59  ;;  %5391 = vmatprep.subr.bf16.mxu0 %v8580_v60 }
0x1934   :  { %5378 = vmatprep.mubr.bf16.mxu1 %v8825_v1  ;;  %5421 = vmatprep.mubr.bf16.mxu0 %v8825_v1  ;;  %v8592_v1 = vld [vmem:[%s10799_s3 + $0x7ac] ss:$48 sps:$4 sm:$0xff]  }
0x1936   :  { %5349 = vmatpush1.bf16.msra.mxu1 %v8575_v17  ;;  %5392 = vmatpush1.bf16.msra.mxu0 %v8578_v62 }
0x1937   :  { %5350 = vmatprep.subr.bf16.mxu1 %v8583_v2  ;;  %5393 = vmatprep.subr.bf16.mxu0 %v8586_v3 }
0x193a   :  { %5351 = vmatpush1.bf16.msra.mxu1 %v8581_v4  ;;  %5394 = vmatpush1.bf16.msra.mxu0 %v8584_v7 }
0x193b   :  { %5352 = vmatprep.subr.bf16.mxu1 %v8589_v56  ;;  %5395 = vmatprep.subr.bf16.mxu0 %v8592_v1 }
0x193e   :  { %5353 = vmatpush1.bf16.msra.mxu1 %v8587_v61  ;;  %5396 = vmatpush1.bf16.msra.mxu0 %v8590_v12 }
0x193f   :  { %5354 = vmatprep.subr.bf16.mxu1 %v8595_v16  ;;  %5397 = vmatprep.subr.bf16.mxu0 %v8598_v10 }
0x1942   :  { %5355 = vmatpush1.bf16.msra.mxu1 %v8593_v57  ;;  %5398 = vmatpush1.bf16.msra.mxu0 %v8596_v58 }
0x1943   :  { %5356 = vmatprep.subr.bf16.mxu1 %v8601_v9  ;;  %5399 = vmatprep.subr.bf16.mxu0 %v8604_v19 }
0x1946   :  { %5357 = vmatpush1.bf16.msra.mxu1 %v8599_v21  ;;  %5400 = vmatpush1.bf16.msra.mxu0 %v8602_v23 }
0x1947   :  { %5358 = vmatprep.subr.bf16.mxu1 %v8607_v5  ;;  %5401 = vmatprep.subr.bf16.mxu0 %v8610_v26 }
0x194a   :  { %5359 = vmatpush1.bf16.msra.mxu1 %v8605_v27  ;;  %5402 = vmatpush1.bf16.msra.mxu0 %v8608_v29 }
0x194b   :  { %5360 = vmatprep.subr.bf16.mxu1 %v8613_v30  ;;  %5403 = vmatprep.subr.bf16.mxu0 %v8616_v31 }
0x194e   :  { %5361 = vmatpush1.bf16.msra.mxu1 %v8611_v32  ;;  %5404 = vmatpush1.bf16.msra.mxu0 %v8614_v33 }
0x1951   :  { %5379 = vmatmul.mubr.bf16.vlgmr.msra.gmra.mxu1 %v10336_v25  ;;  %5422 = vmatmul.mubr.bf16.vlgmr.msra.gmra.mxu0 %v10336_v25 }
0x19d1   :  { %v5208_v34 = vpop.f32.mrf.mxu1  ;;  %v5251_v35 = vpop.f32.mrf.mxu0 }
0x19d2   :  { %7939 = vmatprep.mubr.f32.mxu1 %v5208_v34 }
0x19d3   :  { %v5253_v36 = vpop.f32.mrf.mxu0  ;;  %v5210_v38 = vpop.f32.mrf.mxu1 }
0x19d5   :  { %v5255_v37 = vpop.f32.mrf.mxu0  ;;  %v5212_v41 = vpop.f32.mrf.mxu1 }
0x19d7   :  { %v5257_v39 = vpop.f32.mrf.mxu0  ;;  %v5214_v44 = vpop.f32.mrf.mxu1 }
0x19f1   :  { %v5337_v40 = vpop.f32.mrf.mxu0  ;;  %v5294_v46 = vpop.f32.mrf.mxu1 }
0x19f3   :  { %v5339_v42 = vpop.f32.mrf.mxu0  ;;  %v5296_v47 = vpop.f32.mrf.mxu1 }
0x19f5   :  { %v5341_v43 = vpop.f32.mrf.mxu0  ;;  %v5298_v25 = vpop.f32.mrf.mxu1 }
0x19f7   :  { %v5343_v45 = vpop.f32.mrf.mxu0  ;;  %v5300_v55 = vpop.f32.mrf.mxu1 }
0x19f8   :  { %7923 = vmatprep.subr.mxu1 %v5343_v45 }
0x19f9   :  { %7924 = vmatpush3.xpose.msra.mxu1 %v5343_v45 }
0x19fa   :  { %7925 = vmatprep.subr.mxu1 %v5339_v42 }
0x19fd   :  { %7926 = vmatpush3.xpose.msra.mxu1 %v5339_v42 }
0x19fe   :  { %7927 = vmatprep.subr.mxu1 %v5341_v43 }
0x1a01   :  { %7928 = vmatpush3.xpose.msra.mxu1 %v5341_v43 }
0x1a02   :  { %7929 = vmatprep.subr.mxu1 %v5337_v40 }
0x1a05   :  { %7930 = vmatpush3.xpose.msra.mxu1 %v5337_v40 }
0x1a06   :  { %7931 = vmatprep.subr.mxu1 %v5300_v55 }
0x1a09   :  { %7932 = vmatpush3.xpose.msra.mxu1 %v5300_v55 }
0x1a0a   :  { %7933 = vmatprep.subr.mxu1 %v5296_v47 }
0x1a0d   :  { %7934 = vmatpush3.xpose.msra.mxu1 %v5296_v47 }
0x1a0e   :  { %7935 = vmatprep.subr.mxu1 %v5298_v25 }
0x1a11   :  { %v5423_v22 = vpop.f32.mrf.mxu0  ;;  %7936 = vmatpush3.xpose.msra.mxu1 %v5298_v25  ;;  %v5380_v49 = vpop.f32.mrf.mxu1 }
0x1a12   :  { %7937 = vmatprep.subr.mxu1 %v5294_v46 }
0x1a13   :  { %v5425_v50 = vpop.f32.mrf.mxu0  ;;  %v5382_v51 = vpop.f32.mrf.mxu1 }
0x1a15   :  { %v5427_v6 = vpop.f32.mrf.mxu0  ;;  %7938 = vmatpush3.xpose.msra.mxu1 %v5294_v46  ;;  %v5384_v11 = vpop.f32.mrf.mxu1 }
0x1a16   :  { %7999 = vmatprep.subr.bf16.mxu1 %v8826_v20 }
0x1a17   :  { %v5429_v53 = vpop.f32.mrf.mxu0  ;;  %v5386_v54 = vpop.f32.mrf.mxu1 }
0x1a18   :  { %7940 = vmatmul.mubr.f32.vlgmr.msra.gmra.mxu1 %v5212_v41  ;;  %7951 = vmatprep.subr.mxu0 %v5429_v53 }
0x1a19   :  { %7942 = vmatprep.mubr.f32.mxu1 %v5210_v38  ;;  %7952 = vmatpush3.msra.mxu0 %v5429_v53 }
0x1a1a   :  { %7953 = vmatprep.subr.mxu0 %v5425_v50 }
0x1a1b   :  { %7954 = vmatpush3.msra.mxu0 %v5425_v50 }
0x1a1c   :  { %7943 = vmatmul.mubr.f32.gmra.mxu1 %v5214_v44  ;;  %7955 = vmatprep.subr.mxu0 %v5427_v6 }
0x1a1d   :  { %7945 = vmatprep.mubr.f32.mxu1 %v5251_v35  ;;  %7956 = vmatpush3.msra.mxu0 %v5427_v6 }
0x1a1e   :  { %7957 = vmatprep.subr.mxu0 %v5423_v22 }
0x1a1f   :  { %7958 = vmatpush3.msra.mxu0 %v5423_v22 }
0x1a20   :  { %7946 = vmatmul.mubr.f32.gmra.mxu1 %v5255_v37  ;;  %7959 = vmatprep.subr.mxu0 %v5386_v54 }
0x1a21   :  { %7948 = vmatprep.mubr.f32.mxu1 %v5253_v36  ;;  %7960 = vmatpush3.msra.mxu0 %v5386_v54 }
0x1a22   :  { %7961 = vmatprep.subr.mxu0 %v5382_v51 }
0x1a23   :  { %7962 = vmatpush3.msra.mxu0 %v5382_v51 }
0x1a24   :  { %7949 = vmatmul.mubr.f32.gmra.mxu1 %v5257_v39  ;;  %7963 = vmatprep.subr.mxu0 %v5384_v11 }
0x1a25   :  { %7964 = vmatpush3.msra.mxu0 %v5384_v11  ;;  %8015 = vmatprep.mubr.msk.bf16.mxu1 %vm8827_vm1, %v8826_v20 }
0x1a26   :  { %7965 = vmatprep.subr.mxu0 %v5380_v49 }
0x1a27   :  { %7966 = vmatpush3.msra.mxu0 %v5380_v49 }
0x1a28   :  { %7979 = vmatprep.subr.bf16.mxu0 %v8826_v20 }
0x1ad8   :  { %v7941_v63 = vpop.f32.mrf.mxu1 }
0x1ad9   :  { %v5538_v59 = vmul.f32 0.125, %v7941_v63 }
0x1ada   :  { %v5498_v60 = vpop.f32.mrf.mxu1 }
0x1adb   :  { %v5537_v17 = vmul.f32 0.125, %v5498_v60  ;;  %v5546_v62 = vadd.f32 %v5538_v59, %v9312_v48 }
0x1adc   :  { %v7944_v2 = vpop.f32.mrf.mxu1 }
0x1add   :  { %v5540_v3 = vmul.f32 0.125, %v7944_v2  ;;  %v5556_v4 = vsel %vm135_vm0, %v5546_v62, -inf  ;;  %v5545_v7 = vadd.f32 %v5537_v17, %v9315_v52 }
0x1ade   :  { %5557 = vmax.xlane.f32.xlu1 %v5556_v4  ;;  %v5508_v56 = vpop.f32.mrf.mxu1 }
0x1adf   :  { %v5539_v1 = vmul.f32 0.125, %v5508_v56  ;;  %v5553_v61 = vsel %vm135_vm0, %v5545_v7, -inf  ;;  %v5548_v12 = vadd.f32 %v5540_v3, %v9319_v0 }
0x1ae0   :  { %5554 = vmax.xlane.f32.xlu0 %v5553_v61  ;;  %v7947_v16 = vpop.f32.mrf.mxu1  ;;  %v8619_v61 = vld [vmem:[%s10800_s4 + $0x278] sm:$0xff]  }
0x1ae1   :  { %v5542_v10 = vmul.f32 0.125, %v7947_v16  ;;  %v5562_v57 = vsel %vm135_vm0, %v5548_v12, -inf  ;;  %v5547_v48 = vadd.f32 %v5539_v1, %v9323_v8  ;;  %8000 = vmatpush3.bf16.msra.mxu1 %v8619_v61  ;;  %v8623_v16 = vld [vmem:[%s10800_s4 + $0x268] sm:$0xff]   ;;  %v8646_v61 = vld [vmem:[%s10800_s4 + $0x280] sm:$0xff]  }
0x1ae2   :  { %5563 = vmax.xlane.f32.xlu1 %v5562_v57  ;;  %v5518_v58 = vpop.f32.mrf.mxu1  ;;  %8001 = vmatprep.subr.bf16.mxu1 %v8826_v20  ;;  %v8627_v57 = vld [vmem:[%s10800_s4 + $0x258] sm:$0xff]  }
0x1ae3   :  { %v5541_v9 = vmul.f32 0.125, %v5518_v58  ;;  %v5559_v19 = vsel %vm135_vm0, %v5547_v48, -inf  ;;  %v5550_v52 = vadd.f32 %v5542_v10, %v9327_v13  ;;  %v8625_v10 = vld [vmem:[%s10800_s4 + $0x260] sm:$0xff]  }
0x1ae4   :  { %5560 = vmax.xlane.f32.xlu0 %v5559_v19  ;;  %v7950_v21 = vpop.f32.mrf.mxu1 }
0x1ae5   :  { %v5544_v23 = vmul.f32 0.125, %v7950_v21  ;;  %v5568_v5 = vsel %vm135_vm0, %v5550_v52, -inf  ;;  %v5549_v0 = vadd.f32 %v5541_v9, %v9331_v18 }
0x1ae6   :  { %5569 = vmax.xlane.f32.xlu1 %v5568_v5  ;;  %v5528_v26 = vpop.f32.mrf.mxu1 }
0x1ae7   :  { %v5543_v27 = vmul.f32 0.125, %v5528_v26  ;;  %v5565_v29 = vsel %vm135_vm0, %v5549_v0, -inf  ;;  %v5552_v8 = vadd.f32 %v5544_v23, %v9335_v24 }
0x1ae8   :  { %5566 = vmax.xlane.f32.xlu0 %v5565_v29 }
0x1ae9   :  { %v5574_v30 = vsel %vm135_vm0, %v5552_v8, -inf  ;;  %v5551_v31 = vadd.f32 %v5543_v27, %v9339_v28 }
0x1aea   :  { %5575 = vmax.xlane.f32.xlu1 %v5574_v30 }
0x1aeb   :  { %v5571_v13 = vsel %vm135_vm0, %v5551_v31, -inf }
0x1aec   :  { %5572 = vmax.xlane.f32.xlu0 %v5571_v13 }
0x1b67   :  { %v5558_v32 = vpop.xlane.xlu1 %5557 }
0x1b68   :  { %v5578_v33 = vsub.f32 %v5546_v62, %v5558_v32 }
0x1b69   :  { %v5555_v34 = vpop.xlane.xlu0 %5554 }
0x1b6a   :  { %v5587_v18 = vmul.f32 1.442695, %v5578_v33  ;;  %v5577_v35 = vsub.f32 %v5545_v7, %v5555_v34  ;;  %v8618_v33 = vld [vmem:[%s10800_s4 + $0x230] sm:$0xff]  }
0x1b6b   :  { %v5564_v36 = vpop.xlane.xlu1 %5563 }
0x1b6c   :  { %8761 = vpow2.f32 %v5587_v18  ;;  %v5585_v37 = vmul.f32 1.442695, %v5577_v35  ;;  %v5580_v38 = vsub.f32 %v5548_v12, %v5564_v36  ;;  %v8621_v12 = vld [vmem:[%s10800_s4 + $0x270] sm:$0xff]  }
0x1b6d   :  { %v5561_v39 = vpop.xlane.xlu0 %5560  ;;  %8002 = vmatpush3.bf16.msra.mxu1 %v8621_v12  ;;  %v8647_v12 = vld [vmem:[%s10800_s4 + $0x2c8] sm:$0xff]  }
0x1b6e   :  { %8763 = vpow2.f32 %v5585_v37  ;;  %v5591_v24 = vmul.f32 1.442695, %v5580_v38  ;;  %v5579_v40 = vsub.f32 %v5547_v48, %v5561_v39  ;;  %8003 = vmatprep.subr.bf16.mxu1 %v8826_v20  ;;  %v8629_v48 = vld [vmem:[%s10800_s4 + $0x250] sm:$0xff]   ;;  %v8620_v37 = vld [vmem:[%s10800_s4 + $0x228] sm:$0xff]  }
0x1b6f   :  { %v5570_v41 = vpop.xlane.xlu1 %5569 }
0x1b70   :  { %8765 = vpow2.f32 %v5591_v24  ;;  %v5589_v28 = vmul.f32 1.442695, %v5579_v40  ;;  %v5582_v42 = vsub.f32 %v5550_v52, %v5570_v41  ;;  %v8622_v41 = vld [vmem:[%s10800_s4 + $0x220] sm:$0xff]  }
0x1b71   :  { %v5567_v43 = vpop.xlane.xlu0 %5566  ;;  %8004 = vmatpush3.bf16.msra.mxu1 %v8623_v16 }
0x1b72   :  { %8767 = vpow2.f32 %v5589_v28  ;;  %v5595_v44 = vmul.f32 1.442695, %v5582_v42  ;;  %v5581_v45 = vsub.f32 %v5549_v0, %v5567_v43  ;;  %8005 = vmatprep.subr.bf16.mxu1 %v8826_v20  ;;  %v8624_v42 = vld [vmem:[%s10800_s4 + $0x218] sm:$0xff]   ;;  %v8626_v43 = vld [vmem:[%s10800_s4 + $0x210] sm:$0xff]  }
0x1b73   :  { %v5576_v46 = vpop.xlane.xlu1 %5575 }
0x1b74   :  { %8769 = vpow2.f32 %v5595_v44  ;;  %v5593_v47 = vmul.f32 1.442695, %v5581_v45  ;;  %v5584_v25 = vsub.f32 %v5552_v8, %v5576_v46  ;;  %v8617_v8 = vld [vmem:[%s10800_s4 + $0x238] sm:$0xff]   ;;  %v8628_v44 = vld [vmem:[%s10800_s4 + $0x208] sm:$0xff]   ;;  %v8630_v45 = vld [vmem:[%s10800_s4 + $0x200] sm:$0xff]  }
0x1b75   :  { %v5573_v55 = vpop.xlane.xlu0 %5572  ;;  %8006 = vmatpush3.bf16.msra.mxu1 %v8625_v10  ;;  %v8631_v46 = vld [vmem:[%s10800_s4 + $0x248] sm:$0xff]   ;;  %v8648_v10 = vld [vmem:[%s10800_s4 + $0x2c0] sm:$0xff]  }
0x1b76   :  { %8771 = vpow2.f32 %v5593_v47  ;;  %v5599_v22 = vmul.f32 1.442695, %v5584_v25  ;;  %v5583_v49 = vsub.f32 %v5551_v31, %v5573_v55  ;;  %8007 = vmatprep.subr.bf16.mxu1 %v8826_v20  ;;  %v8632_v47 = vld [vmem:[%s10800_s4 + $0x240] sm:$0xff]  }
0x1b78   :  { %8773 = vpow2.f32 %v5599_v22  ;;  %v5597_v50 = vmul.f32 1.442695, %v5583_v49  ;;  %v8633_v22 = vld [vmem:[%s10800_s4 + $0x2b8] sm:$0xff]  }
0x1b79   :  { %v10548_v6 = vpop.eup %8761  ;;  %8008 = vmatpush3.bf16.msra.mxu1 %v8627_v57 }
0x1b7a   :  { %8775 = vpow2.f32 %v5597_v50  ;;  %v5604_v51 = vsel %vm135_vm0, %v10548_v6, 0.0  ;;  %8009 = vmatprep.subr.bf16.mxu1 %v8826_v20 }
0x1b7b   :  { %v8764_v53 = vpop.eup %8763  ;;  %5605 = vadd.xlane.f32.xlu1 %v5604_v51  ;;  %v8634_v51 = vld [vmem:[%s10800_s4 + $0x2b0] sm:$0xff]  }
0x1b7c   :  { %v5601_v11 = vsel %vm135_vm0, %v8764_v53, 0.0 }
0x1b7d   :  { %v10553_v54 = vpop.eup %8765  ;;  %5602 = vadd.xlane.f32.xlu0 %v5601_v11  ;;  %8010 = vmatpush3.bf16.msra.mxu1 %v8629_v48 }
0x1b7e   :  { %v5610_v63 = vsel %vm135_vm0, %v10553_v54, 0.0  ;;  %8011 = vmatprep.subr.bf16.mxu1 %v8826_v20 }
0x1b7f   :  { %v8768_v59 = vpop.eup %8767  ;;  %5611 = vadd.xlane.f32.xlu1 %v5610_v63  ;;  %v8637_v63 = vld [vmem:[%s10800_s4 + $0x2f0] sm:$0xff]  }
0x1b80   :  { %v5607_v60 = vsel %vm135_vm0, %v8768_v59, 0.0 }
0x1b81   :  { %v10558_v17 = vpop.eup %8769  ;;  %5608 = vadd.xlane.f32.xlu0 %v5607_v60  ;;  %8012 = vmatpush3.bf16.msra.mxu1 %v8631_v46  ;;  %v8639_v60 = vld [vmem:[%s10800_s4 + $0x2e8] sm:$0xff]   ;;  %v8650_v46 = vld [vmem:[%s10801_s5 + $0x90] sm:$0xff]  }
0x1b82   :  { %v5616_v62 = vsel %vm135_vm0, %v10558_v17, 0.0  ;;  %8013 = vmatprep.subr.bf16.mxu1 %v8826_v20 }
0x1b83   :  { %v8772_v2 = vpop.eup %8771  ;;  %5617 = vadd.xlane.f32.xlu1 %v5616_v62  ;;  %v8641_v62 = vld [vmem:[%s10800_s4 + $0x2e0] sm:$0xff]  }
0x1b84   :  { %v5613_v3 = vsel %vm135_vm0, %v8772_v2, 0.0 }
0x1b85   :  { %v10563_v4 = vpop.eup %8773  ;;  %5614 = vadd.xlane.f32.xlu0 %v5613_v3  ;;  %8014 = vmatpush3.bf16.msra.mxu1 %v8632_v47  ;;  %v8643_v3 = vld [vmem:[%s10800_s4 + $0x2d8] sm:$0xff]   ;;  %v8651_v47 = vld [vmem:[%s10801_s5 + $0x88] sm:$0xff]  }
0x1b86   :  { %v5622_v7 = vsel %vm135_vm0, %v10563_v4, 0.0  ;;  %8039 = vmatprep.subr.bf16.mxu1 %v8826_v20 }
0x1b87   :  { %v10567_v56 = vpop.eup %8775  ;;  %5623 = vadd.xlane.f32.xlu1 %v5622_v7  ;;  %v8644_v7 = vld [vmem:[%s10800_s4 + $0x288] sm:$0xff]  }
0x1b88   :  { %v5619_v1 = vsel %vm135_vm0, %v10567_v56, 0.0 }
0x1b89   :  { %5620 = vadd.xlane.f32.xlu0 %v5619_v1 }
0x1c04   :  { %v5606_v58 = vpop.xlane.xlu1 %5605 }
0x1c05   :  { %8777 = vrcp.f32 %v5606_v58 }
0x1c06   :  { %v5603_v9 = vpop.xlane.xlu0 %5602 }
0x1c07   :  { %8779 = vrcp.f32 %v5603_v9 }
0x1c08   :  { %v5612_v19 = vpop.xlane.xlu1 %5611 }
0x1c09   :  { %8781 = vrcp.f32 %v5612_v19 }
0x1c0a   :  { %v5609_v52 = vpop.xlane.xlu0 %5608 }
0x1c0b   :  { %8783 = vrcp.f32 %v5609_v52 }
0x1c0c   :  { %v5618_v21 = vpop.xlane.xlu1 %5617 }
0x1c0d   :  { %8785 = vrcp.f32 %v5618_v21 }
0x1c0e   :  { %v5615_v23 = vpop.xlane.xlu0 %5614 }
0x1c0f   :  { %8787 = vrcp.f32 %v5615_v23 }
0x1c10   :  { %v5624_v5 = vpop.xlane.xlu1 %5623 }
0x1c11   :  { %8789 = vrcp.f32 %v5624_v5 }
0x1c12   :  { %v5621_v0 = vpop.xlane.xlu0 %5620  ;;  %v8778_v26 = vpop.eup %8777 }
0x1c13   :  { %8791 = vrcp.f32 %v5621_v0  ;;  %v5634_v30 = vmul.f32 %v8778_v26, %v10548_v6 }
0x1c14   :  { %v8780_v27 = vpop.eup %8779 }
0x1c15   :  { %v5633_v29 = vmul.f32 %v8780_v27, %v8764_v53  ;;  %v8635_v53 = vld [vmem:[%s10800_s4 + $0x2f8] sm:$0xff]  }
0x1c16   :  { %v8782_v31 = vpop.eup %8781 }
0x1c17   :  { %7967 = vmatprep.mubr.msk.f32.mxu0 %vm135_vm0, %v5633_v29  ;;  %v5636_v34 = vmul.f32 %v8782_v31, %v10553_v54  ;;  %v8636_v54 = vld [vmem:[%s10800_s4 + $0x2a8] sm:$0xff]  }
0x1c18   :  { %v8784_v13 = vpop.eup %8783  ;;  %7968 = vmatmul.mubr.msk.f32.vlgmr.msra.gmra.mxu0 %vm135_vm0, %v5634_v30 }
0x1c19   :  { %v5635_v32 = vmul.f32 %v8784_v13, %v8768_v59  ;;  %7980 = vmatpush3.bf16.msra.mxu0 %v8617_v8  ;;  %v8638_v59 = vld [vmem:[%s10800_s4 + $0x2a0] sm:$0xff]  }
0x1c1a   :  { %7981 = vmatprep.subr.bf16.mxu0 %v8826_v20  ;;  %v8786_v18 = vpop.eup %8785 }
0x1c1b   :  { %7970 = vmatprep.mubr.msk.f32.mxu0 %vm135_vm0, %v5635_v32  ;;  %v5638_v38 = vmul.f32 %v8786_v18, %v10558_v17  ;;  %v8640_v17 = vld [vmem:[%s10800_s4 + $0x298] sm:$0xff]  }
0x1c1c   :  { %v8788_v35 = vpop.eup %8787  ;;  %7971 = vmatmul.mubr.msk.f32.gmra.mxu0 %vm135_vm0, %v5636_v34 }
0x1c1d   :  { %v5637_v36 = vmul.f32 %v8788_v35, %v8772_v2  ;;  %7982 = vmatpush3.bf16.msra.mxu0 %v8618_v33  ;;  %v8642_v2 = vld [vmem:[%s10800_s4 + $0x290] sm:$0xff]  }
0x1c1e   :  { %7983 = vmatprep.subr.bf16.mxu0 %v8826_v20  ;;  %v8790_v39 = vpop.eup %8789 }
0x1c1f   :  { %7973 = vmatprep.mubr.msk.f32.mxu0 %vm135_vm0, %v5637_v36  ;;  %v5640_v28 = vmul.f32 %v8790_v39, %v10563_v4 }
0x1c20   :  { %v8792_v24 = vpop.eup %8791  ;;  %7974 = vmatmul.mubr.msk.f32.gmra.mxu0 %vm135_vm0, %v5638_v38 }
0x1c21   :  { %v5639_v40 = vmul.f32 %v8792_v24, %v10567_v56  ;;  %7984 = vmatpush3.bf16.msra.mxu0 %v8620_v37  ;;  %v8645_v56 = vld [vmem:[%s10800_s4 + $0x2d0] sm:$0xff]  }
0x1c22   :  { %7985 = vmatprep.subr.bf16.mxu0 %v8826_v20 }
0x1c23   :  { %7976 = vmatprep.mubr.msk.f32.mxu0 %vm135_vm0, %v5639_v40 }
0x1c24   :  { %7977 = vmatmul.mubr.msk.f32.gmra.mxu0 %vm135_vm0, %v5640_v28 }
0x1c25   :  { %7986 = vmatpush3.bf16.msra.mxu0 %v8622_v41  ;;  %7995 = vmatprep.mubr.msk.bf16.mxu0 %vm8827_vm1, %v8826_v20 }
0x1c26   :  { %7987 = vmatprep.subr.bf16.mxu0 %v8826_v20 }
0x1c29   :  { %7988 = vmatpush3.bf16.msra.mxu0 %v8624_v42 }
0x1c2a   :  { %7989 = vmatprep.subr.bf16.mxu0 %v8826_v20 }
0x1c2d   :  { %7990 = vmatpush3.bf16.msra.mxu0 %v8626_v43 }
0x1c2e   :  { %7991 = vmatprep.subr.bf16.mxu0 %v8826_v20 }
0x1c31   :  { %7992 = vmatpush3.bf16.msra.mxu0 %v8628_v44 }
0x1c32   :  { %7993 = vmatprep.subr.bf16.mxu0 %v8826_v20 }
0x1c35   :  { %7994 = vmatpush3.bf16.msra.mxu0 %v8630_v45 }
0x1c36   :  { %8019 = vmatprep.subr.bf16.mxu0 %v8826_v20 }
0x1cd8   :  { %v7969_v25 = vpop.f32.mrf.mxu0 }
0x1cda   :  { %v5731_v55 = vpop.f32.mrf.mxu0 }
0x1cdb   :  { %v5770_v49 = vpack.c.bf16 %v7969_v25, %v5731_v55  ;;  %v8652_v25 = vld [vmem:[%s10801_s5 + $0x80] sm:$0xff]  }
0x1cdc   :  { %v7972_v50 = vpop.f32.mrf.mxu0 }
0x1cdd   :  { %7996 = vmatmul.mubr.bf16.vlgmr.msra.gmra.mxu0 %v5770_v49 }
0x1cde   :  { %8020 = vmatpush3.bf16.msra.mxu0 %v8633_v22  ;;  %v5741_v6 = vpop.f32.mrf.mxu0  ;;  %8035 = vmatprep.mubr.msk.bf16.mxu0 %vm8827_vm1, %v8826_v20 }
0x1cdf   :  { %v5862_v11 = vpack.c.bf16 %v7972_v50, %v5741_v6  ;;  %8021 = vmatprep.subr.bf16.mxu0 %v8826_v20 }
0x1ce0   :  { %v7975_v4 = vpop.f32.mrf.mxu0 }
0x1ce1   :  { %8016 = vmatmul.mubr.bf16.vlgmr.msra.gmra.mxu1 %v5862_v11 }
0x1ce2   :  { %8022 = vmatpush3.bf16.msra.mxu0 %v8634_v51  ;;  %8040 = vmatpush3.bf16.msra.mxu1 %v8635_v53  ;;  %v5751_v1 = vpop.f32.mrf.mxu0 }
0x1ce3   :  { %8023 = vmatprep.subr.bf16.mxu0 %v8826_v20  ;;  %8041 = vmatprep.subr.bf16.mxu1 %v8826_v20  ;;  %v5954_v57 = vpack.c.bf16 %v7975_v4, %v5751_v1  ;;  %v8655_v1 = vld [vmem:[%s10801_s5 + $0xa8] sm:$0xff]  }
0x1ce4   :  { %8055 = vmatprep.mubr.msk.bf16.mxu1 %vm8827_vm1, %v8826_v20  ;;  %v7978_v16 = vpop.f32.mrf.mxu0 }
0x1ce6   :  { %8024 = vmatpush3.bf16.msra.mxu0 %v8636_v54  ;;  %8042 = vmatpush3.bf16.msra.mxu1 %v8637_v63  ;;  %v5761_v48 = vpop.f32.mrf.mxu0  ;;  %v7291_v54 = vld [vmem:[%s10803_s7 + $0xe] ss:$0 sm:$0xff] }
0x1ce7   :  { %8025 = vmatprep.subr.bf16.mxu0 %v8826_v20  ;;  %8043 = vmatprep.subr.bf16.mxu1 %v8826_v20  ;;  %v6046_v58 = vpack.c.bf16 %v7978_v16, %v5761_v48 }
0x1cea   :  { %8026 = vmatpush3.bf16.msra.mxu0 %v8638_v59  ;;  %8044 = vmatpush3.bf16.msra.mxu1 %v8639_v60 }
0x1ceb   :  { %8027 = vmatprep.subr.bf16.mxu0 %v8826_v20  ;;  %8045 = vmatprep.subr.bf16.mxu1 %v8826_v20 }
0x1cee   :  { %8028 = vmatpush3.bf16.msra.mxu0 %v8640_v17  ;;  %8046 = vmatpush3.bf16.msra.mxu1 %v8641_v62  ;;  %v7292_v17 = vld [vmem:[%s10803_s7 + $0xf] ss:$0 sm:$0xff] }
0x1cef   :  { %8029 = vmatprep.subr.bf16.mxu0 %v8826_v20  ;;  %8047 = vmatprep.subr.bf16.mxu1 %v8826_v20 }
0x1cf2   :  { %8030 = vmatpush3.bf16.msra.mxu0 %v8642_v2  ;;  %8048 = vmatpush3.bf16.msra.mxu1 %v8643_v3 }
0x1cf3   :  { %8031 = vmatprep.subr.bf16.mxu0 %v8826_v20  ;;  %8049 = vmatprep.subr.bf16.mxu1 %v8826_v20 }
0x1cf6   :  { %8032 = vmatpush3.bf16.msra.mxu0 %v8644_v7  ;;  %8050 = vmatpush3.bf16.msra.mxu1 %v8645_v56  ;;  %v8653_v7 = vld [vmem:[%s10801_s5 + $0xb8] sm:$0xff]   ;;  %v8654_v56 = vld [vmem:[%s10801_s5 + $0xb0] sm:$0xff]  }
0x1cf7   :  { %8033 = vmatprep.subr.bf16.mxu0 %v8826_v20  ;;  %8051 = vmatprep.subr.bf16.mxu1 %v8826_v20 }
0x1cfa   :  { %8034 = vmatpush3.bf16.msra.mxu0 %v8646_v61  ;;  %8052 = vmatpush3.bf16.msra.mxu1 %v8647_v12  ;;  %v8656_v61 = vld [vmem:[%s10801_s5 + $0xa0] sm:$0xff]   ;;  %v7293_v12 = vld [vmem:[%s10803_s7 + $0x10] ss:$0 sm:$0xff] }
0x1cfb   :  { %8053 = vmatprep.subr.bf16.mxu1 %v8826_v20  ;;  %8059 = vmatprep.subr.bf16.mxu0 %v8826_v20 }
0x1cfd   :  { %8036 = vmatmul.mubr.bf16.vlgmr.msra.gmra.mxu0 %v5954_v57 }
0x1cfe   :  { %8054 = vmatpush3.bf16.msra.mxu1 %v8648_v10  ;;  %8067 = vmatprep.mubr.msk.bf16.mxu0 %vm8827_vm1, %v8826_v20 }
0x1cff   :  { %8071 = vmatprep.subr.bf16.mxu1 %v8826_v20 }
0x1d01   :  { %8056 = vmatmul.mubr.bf16.vlgmr.msra.gmra.mxu1 %v6046_v58 }
0x1d02   :  { %8079 = vmatprep.mubr.msk.bf16.mxu1 %vm8827_vm1, %v8826_v20  ;;  %8072 = vmatpush3.bf16.msra.mxu1 %v8653_v7 }
0x1d03   :  { %8073 = vmatprep.subr.bf16.mxu1 %v8826_v20 }
0x1d06   :  { %8074 = vmatpush3.bf16.msra.mxu1 %v8654_v56  ;;  %v7304_v56 = vld [vmem:[%s10803_s7 + $0x12] ss:$0 sm:$0xff] }
0x1d07   :  { %8075 = vmatprep.subr.bf16.mxu1 %v8826_v20 }
0x1d0a   :  { %8076 = vmatpush3.bf16.msra.mxu1 %v8655_v1 }
0x1d0b   :  { %8077 = vmatprep.subr.bf16.mxu1 %v8826_v20 }
0x1d0e   :  { %8078 = vmatpush3.bf16.msra.mxu1 %v8656_v61  ;;  %v7305_v61 = vld [vmem:[%s10803_s7 + $0x13] ss:$0 sm:$0xff] }
0x1d0f   :  { %8083 = vmatprep.subr.mxu1 %v8826_v20 }
0x1d9d   :  { %v5853_v9 = vpop.f32.mrf.mxu0 }
0x1d9e   :  { %v5860_v27 = vadd.f32 %v5853_v9, %v10206_v15 }
0x1d9f   :  { %v7997_v19 = vpop.f32.mrf.mxu0 }
0x1da1   :  { %v5856_v52 = vpop.f32.mrf.mxu0  ;;  %v5945_v21 = vpop.f32.mrf.mxu1 }
0x1da2   :  { %v5952_v8 = vadd.f32 %v5945_v21, %v5860_v27  ;;  %v5861_v31 = vadd.f32 %v5856_v52, %v10204_v14  ;;  %v8649_v14 = vld [vmem:[%s10801_s5 + $0x98] sm:$0xff]  }
0x1da3   :  { %v7998_v23 = vpop.f32.mrf.mxu0  ;;  %v8017_v5 = vpop.f32.mrf.mxu1  ;;  %8060 = vmatpush3.bf16.xpose.msra.mxu0 %v8649_v14 }
0x1da4   :  { %8061 = vmatprep.subr.bf16.mxu0 %v8826_v20 }
0x1da5   :  { %v5948_v0 = vpop.f32.mrf.mxu1 }
0x1da6   :  { %v5953_v34 = vadd.f32 %v5948_v0, %v5861_v31 }
0x1da7   :  { %v8018_v26 = vpop.f32.mrf.mxu1 }
0x1dab   :  { %8062 = vmatpush3.bf16.xpose.msra.mxu0 %v8650_v46 }
0x1dac   :  { %8063 = vmatprep.subr.bf16.mxu0 %v8826_v20 }
0x1db3   :  { %8064 = vmatpush3.bf16.xpose.msra.mxu0 %v8651_v47 }
0x1db4   :  { %8065 = vmatprep.subr.bf16.mxu0 %v8826_v20 }
0x1dbb   :  { %8066 = vmatpush3.bf16.xpose.msra.mxu0 %v8652_v25 }
0x1dbd   :  { %v6037_v29 = vpop.f32.mrf.mxu0 }
0x1dbe   :  { %v6044_v13 = vadd.f32 %v6037_v29, %v5952_v8 }
0x1dbf   :  { %v8037_v30 = vpop.f32.mrf.mxu0 }
0x1dc1   :  { %v6040_v32 = vpop.f32.mrf.mxu0  ;;  %v6129_v33 = vpop.f32.mrf.mxu1 }
0x1dc2   :  { %v10724_v18 = vadd.f32 %v6129_v33, %v6044_v13  ;;  %v6045_v37 = vadd.f32 %v6040_v32, %v5953_v34 }
0x1dc3   :  { %v8038_v35 = vpop.f32.mrf.mxu0  ;;  %v8057_v36 = vpop.f32.mrf.mxu1 }
0x1dc4   :  { %6140 = vadd.xlane.f32.xlu0 %v10724_v18 }
0x1dc5   :  { %v6132_v38 = vpop.f32.mrf.mxu1 }
0x1dc6   :  { %v10727_v39 = vadd.f32 %v6132_v38, %v6045_v37  ;;  %v7298_v38 = vld [vmem:[%s10803_s7 + $0x11] ss:$0 sm:$0xff] }
0x1dc7   :  { %v8058_v15 = vpop.f32.mrf.mxu1 }
0x1dc8   :  { %6142 = vadd.xlane.f32.xlu1 %v10727_v39 }
0x1e4d   :  { %v6141_v24 = vpop.xlane.xlu0 %6140 }
0x1e4e   :  { %v6144_v40 = vmul.f32 0.0078125, %v6141_v24 }
0x1e50   :  { %v6146_v41 = vsub.f32 %v10724_v18, %v6144_v40 }
0x1e51   :  { %v6143_v28 = vpop.xlane.xlu1 %6142 }
0x1e52   :  { %v6145_v42 = vmul.f32 0.0078125, %v6143_v28  ;;  %v6148_v43 = vmul.f32 %v6146_v41, %v6146_v41 }
0x1e54   :  { %v6147_v44 = vsub.f32 %v10727_v39, %v6145_v42  ;;  %6150 = vadd.xlane.f32.xlu0 %v6148_v43 }
0x1e56   :  { %v6149_v45 = vmul.f32 %v6147_v44, %v6147_v44 }
0x1e58   :  { %6152 = vadd.xlane.f32.xlu1 %v6149_v45 }
0x1edd   :  { %v6151_v55 = vpop.xlane.xlu0 %6150 }
0x1ede   :  { %v6154_v22 = vmul.f32 0.0078125, %v6151_v55 }
0x1ee0   :  { %v6156_v49 = vadd.f32 1e-05, %v6154_v22 }
0x1ee1   :  { %v6153_v50 = vpop.xlane.xlu1 %6152 }
0x1ee2   :  { %8793 = vrsqrt.f32 %v6156_v49  ;;  %v6155_v6 = vmul.f32 0.0078125, %v6153_v50 }
0x1ee4   :  { %v6157_v51 = vadd.f32 1e-05, %v6155_v6 }
0x1ee6   :  { %8795 = vrsqrt.f32 %v6157_v51 }
0x1eef   :  { %v8794_v53 = vpop.eup %8793 }
0x1ef0   :  { %v6160_v11 = vmul.f32 %v8794_v53, %v6146_v41 }
0x1ef2   :  { %v6166_v60 = vmul.f32 %v7291_v54, %v6160_v11 }
0x1ef3   :  { %v8796_v63 = vpop.eup %8795 }
0x1ef4   :  { %v6161_v59 = vmul.f32 %v8796_v63, %v6147_v44  ;;  %v6172_v2 = vadd.f32 %v7292_v17, %v6166_v60 }
0x1ef6   :  { %v6167_v62 = vmul.f32 %v7291_v54, %v6161_v59 }
0x1ef8   :  { %v6173_v3 = vadd.f32 %v7292_v17, %v6167_v62  ;;  %v6380_v62 = vld [vmem:[%s10803_s7 + $0x14] sm:$0x3] }
0x1efa   :  { %v6174_v4 = vpack.c.bf16 %v6173_v3, %v6172_v2 }
0x1efc   :  { %8068 = vmatmul.mubr.bf16.vlgmr.msra.gmra.mxu0 %v6174_v4 }
0x1fbc   :  { %v6238_v16 = vpop.f32.mrf.mxu0 }
0x1fbd   :  { %v6239_v10 = vadd.f32 %v7293_v12, %v6238_v16 }
0x1fbe   :  { %v8069_v57 = vpop.f32.mrf.mxu0 }
0x1fbf   :  { %v6247_v48 = vmul.f32 0.044715, %v6239_v10  ;;  %v6245_v32 = vmul.f32 0.5, %v6239_v10 }
0x1fc0   :  { %v6241_v58 = vpop.f32.mrf.mxu0 }
0x1fc1   :  { %v6249_v9 = vmul.f32 %v6247_v48, %v6239_v10  ;;  %v6242_v19 = vadd.f32 %v7293_v12, %v6241_v58 }
0x1fc2   :  { %v8070_v52 = vpop.f32.mrf.mxu0 }
0x1fc3   :  { %v6251_v21 = vmul.f32 %v6249_v9, %v6239_v10  ;;  %v6248_v23 = vmul.f32 0.044715, %v6242_v19  ;;  %v6246_v33 = vmul.f32 0.5, %v6242_v19 }
0x1fc5   :  { %v6253_v5 = vadd.f32 %v6251_v21, %v6239_v10  ;;  %v6250_v0 = vmul.f32 %v6248_v23, %v6242_v19  ;;  %v7306_v10 = vld [vmem:[%s10803_s7 + $0x16] ss:$0 sm:$0xff] }
0x1fc7   :  { %v6255_v26 = vmul.f32 0.7978846, %v6253_v5  ;;  %v6252_v27 = vmul.f32 %v6250_v0, %v6242_v19 }
0x1fc9   :  { %8797 = vtanh.f32 %v6255_v26  ;;  %v6254_v29 = vadd.f32 %v6252_v27, %v6242_v19 }
0x1fcb   :  { %v6256_v8 = vmul.f32 0.7978846, %v6254_v29 }
0x1fcd   :  { %8799 = vtanh.f32 %v6256_v8 }
0x1fd6   :  { %v8798_v30 = vpop.eup %8797 }
0x1fd7   :  { %v6259_v31 = vadd.f32 1.0, %v8798_v30 }
0x1fd9   :  { %v6261_v35 = vmul.f32 %v6259_v31, %v6245_v32 }
0x1fda   :  { %v8800_v13 = vpop.eup %8799 }
0x1fdb   :  { %v6260_v34 = vadd.f32 1.0, %v8800_v13 }
0x1fdd   :  { %v6262_v36 = vmul.f32 %v6260_v34, %v6246_v33 }
0x1fdf   :  { %v6263_v37 = vpack.c.bf16 %v6262_v36, %v6261_v35 }
0x1fe1   :  { %8080 = vmatmul.mubr.msk.bf16.vlgmr.msra.gmra.mxu1 %vm135_vm0, %v6263_v37 }
0x1fe2   :  { %8085 = vmatprep.mubr.msk.f32.mxu1 %vm8827_vm1, %v8826_v20  ;;  %8084 = vmatpush3.xpose.msra.mxu1 %v6380_v62 }
0x20a1   :  { %v6330_v15 = vpop.f32.mrf.mxu1 }
0x20a2   :  { %v6331_v14 = vadd.f32 %v7298_v38, %v6330_v15 }
0x20a3   :  { %v8081_v24 = vpop.f32.mrf.mxu1 }
0x20a4   :  { %v6337_v40 = vadd.f32 %v6331_v14, %v10724_v18 }
0x20a5   :  { %v6333_v41 = vpop.f32.mrf.mxu1 }
0x20a6   :  { %v6339_v28 = vrot.slane %v6337_v40, 4  ;;  %v6334_v42 = vadd.f32 %v7298_v38, %v6333_v41 }
0x20a7   :  { %v8082_v43 = vpop.f32.mrf.mxu1 }
0x20a8   :  { %v6340_v44 = vadd.f32 %v6339_v28, %v6337_v40  ;;  %v6338_v45 = vadd.f32 %v6334_v42, %v10727_v39 }
0x20aa   :  { %v6341_v46 = vrot.slane %v6340_v44, 2  ;;  %v6346_v47 = vrot.slane %v6338_v45, 4 }
0x20ac   :  { %v6342_v25 = vadd.f32 %v6341_v46, %v6340_v44  ;;  %v6347_v20 = vadd.f32 %v6346_v47, %v6338_v45 }
0x20ae   :  { %v6348_v55 = vrot.slane %v6347_v20, 2  ;;  %v6343_v22 = vrot.slane %v6342_v25, 1 }
0x20b0   :  { %v6349_v49 = vadd.f32 %v6348_v55, %v6347_v20  ;;  %v6344_v50 = vadd.f32 %v6343_v22, %v6342_v25 }
0x20b2   :  { %v6350_v6 = vrot.slane %v6349_v49, 1  ;;  %v6345_v53 = vmul.f32 0.125, %v6344_v50 }
0x20b4   :  { %v6351_v51 = vadd.f32 %v6350_v6, %v6349_v49 }
0x20b6   :  { %v6352_v11 = vmul.f32 0.125, %v6351_v51 }
0x20b8   :  { %v6353_v18 = vsel %vm411_vm2, %v6345_v53, %v6352_v11 }
0x20b9   :  { %v6357_v54 = vsel %vm6356_vm12, %v6353_v18, 0.0 }
0x20ba   :  { %6358 = vadd.xlane.f32.xlu0 %v6357_v54 }
0x2143   :  { %v6359_v63 = vpop.xlane.xlu0 %6358 }
0x2144   :  { %v6360_v59 = vmul.f32 0.0078125, %v6359_v63 }
0x2146   :  { %v6361_v39 = vsub.f32 %v6353_v18, %v6360_v59 }
0x2148   :  { %v6362_v60 = vmul.f32 %v6361_v39, %v6361_v39 }
0x214a   :  { %v6363_v17 = vsel %vm6356_vm12, %v6362_v60, 0.0 }
0x214b   :  { %6364 = vadd.xlane.f32.xlu1 %v6363_v17 }
0x21d4   :  { %v6365_v2 = vpop.xlane.xlu1 %6364 }
0x21d5   :  { %v6366_v3 = vmul.f32 0.0078125, %v6365_v2 }
0x21d7   :  { %v6367_v4 = vadd.f32 1e-05, %v6366_v3 }
0x21d9   :  { %8801 = vrsqrt.f32 %v6367_v4 }
0x21e6   :  { %v8802_v7 = vpop.eup %8801 }
0x21e7   :  { %v6369_v1 = vmul.f32 %v8802_v7, %v6361_v39 }
0x21e9   :  { %v6374_v12 = vmul.f32 %v7304_v56, %v6369_v1 }
0x21eb   :  { %v6379_v16 = vadd.f32 %v7305_v61, %v6374_v12 }
0x21ed   :  { %8086 = vmatmul.mubr.f32.vlgmr.msra.gmra.mxu1 %v6379_v16 }
0x22ad   :  { %v6452_v57 = vpop.f32.mrf.mxu1 }
0x22ae   :  { %v6453_v48 = vadd.f32 %v7306_v10, %v6452_v57 }
0x22af   :  { %v8087_v58 = vpop.f32.mrf.mxu1 }
0x22b0   :  { %6457 = vst.msk [vmem:[#allocation2] sm:$0x3] %vm6456_vm13, %v6453_v48 }
0x22b1   :  { %8814 = shalt.err (!%p8811_p4)
}
0x22b2   :  { %6467 = dma.vmem_to_hbm [thread:$0]  %s6465_s6, 32, %s10804_s8, [#allocation3]  }
0x22b3   :  { %8823 = dma.done.wait [#allocation3], 32  }
0x22b4   :  { %8824 = vsyncadd [#allocation3], 4294967264 }
0x22b5   :  { %6471 = vsyncpa [#allocation3], 1 }

</bundles_post_ra>
